<compile_context>
chip_gen: v6e
topology: v6e:2x2x1
jax: 0.10.0
libtpu: 0.0.40
codegen_flags: <defaults>
</compile_context>

<pallas_src>
import jax
import jax.numpy as jnp
import numpy as np
from jax.experimental import pallas as pl
from jax.experimental.pallas import tpu as pltpu

_LANE = 128


def _round_up(x, m):
    return (x + m - 1) // m * m


def _recursor_kernel(node_ref, left_ref, right_ref,          # SMEM scalar prefetch
                     x_ref,                                  # (N, TB, F)      VMEM
                     wemb_ref, bemb_ref,                     # (F, Lp), (1, Lp)
                     wcomb_ref, bcomb_ref,                   # (3*Lp, Lp), (1, Lp)
                     wproj_ref, bproj_ref,                   # (Lp, Cp), (1, Cp)
                     out_ref,                                # (TB, Cp)
                     hid_scratch):                           # (N, TB, Lp)     VMEM
    n_nodes = x_ref.shape[0]
    n_internal = node_ref.shape[0]

    # ---- phase 1: embed every node of every tree in this batch tile --------
    # hidden[i] starts as relu(embedding(leaf_inputs_i)): that is already the
    # final hidden state for leaves and the "embedded" operand for internals.
    w_emb = wemb_ref[...]
    b_emb = bemb_ref[...]
    for nidx in range(n_nodes):                              # static, small
        e = jnp.dot(x_ref[nidx], w_emb, preferred_element_type=jnp.float32)
        hid_scratch[nidx] = jnp.maximum(e + b_emb, 0.0)

    # ---- phase 2: serial walk over *internal* nodes only -------------------
    # Loop-invariant weights: load once, close over the values.
    w_comb = wcomb_ref[...]
    b_comb = bcomb_ref[...]

    # Statically unrolled serial reduction (children before parents).  The
    # read of hid_scratch[i] (still relu(emb_i)) strictly precedes the write
    # via the data dependence through `cat`.
    for k in range(n_internal):
        i = node_ref[k]
        hl = hid_scratch[left_ref[k]]                        # (TB, Lp)
        hr = hid_scratch[right_ref[k]]                       # (TB, Lp)
        e = hid_scratch[i]                                   # (TB, Lp)
        cat = jnp.concatenate([hl, hr, e], axis=-1)          # (TB, 3*Lp)
        h = jnp.dot(cat, w_comb, preferred_element_type=jnp.float32) + b_comb
        hid_scratch[i] = jnp.maximum(h, 0.0)

    # ---- phase 3: projection of the root hidden state ----------------------
    root = hid_scratch[n_nodes - 1]                          # (TB, Lp)
    out_ref[...] = (jnp.dot(root, wproj_ref[...],
                            preferred_element_type=jnp.float32)
                    + bproj_ref[...])


def pseudo_state_recursor(left, right, is_leaf, x,
                          w_emb, b_emb, w_comb, b_comb, w_proj, b_proj,
                          *, batch_tile=128):
    """Batched forward pass.

    left/right/is_leaf : int [N] host-known topology (children before parents,
                         root last; leaves ignore their left/right entries).
    x                  : f32 [N, B, F] leaf_inputs for every node of B trees
                         that share the topology.
    weights            : [in, out] layout (transpose of torch Linear.weight).
    returns            : f32 [B, num_classes]
    """
    n_nodes, batch, n_feat = x.shape
    latent = w_emb.shape[1]
    n_classes = w_proj.shape[1]
    assert batch % batch_tile == 0, "batch must be a multiple of batch_tile"

    l_pad = _round_up(latent, _LANE)
    c_pad = _round_up(n_classes, _LANE)
    f32 = jnp.float32

    # Lane-pad weights/biases to 128-wide so all in-kernel stores are dense.
    # Padded lanes see 0-weight + 0-bias -> relu(0) = 0, so numerics match.
    w_emb_p = jnp.zeros((n_feat, l_pad), f32).at[:, :latent].set(w_emb)
    b_emb_p = jnp.zeros((1, l_pad), f32).at[0, :latent].set(b_emb)
    w_comb_p = jnp.zeros((3 * l_pad, l_pad), f32)
    for blk in range(3):   # cat order: (hidden_left, hidden_right, embedded)
        w_comb_p = w_comb_p.at[blk * l_pad:blk * l_pad + latent, :latent].set(
            w_comb[blk * latent:(blk + 1) * latent, :])
    b_comb_p = jnp.zeros((1, l_pad), f32).at[0, :latent].set(b_comb)
    w_proj_p = jnp.zeros((l_pad, c_pad), f32).at[:latent, :n_classes].set(w_proj)
    b_proj_p = jnp.zeros((1, c_pad), f32).at[0, :n_classes].set(b_proj)

    # Compact the (static, host-known) topology: the serial loop only visits
    # internal nodes.  These int32 arrays land in SMEM via scalar prefetch.
    left_np = np.asarray(left, dtype=np.int32)
    right_np = np.asarray(right, dtype=np.int32)
    leaf_np = np.asarray(is_leaf, dtype=np.int32)
    internal = np.nonzero(leaf_np == 0)[0].astype(np.int32)
    node_idx = jnp.asarray(internal)
    left_idx = jnp.asarray(left_np[internal])
    right_idx = jnp.asarray(right_np[internal])

    const = lambda shape: pl.BlockSpec(shape, lambda b, *refs: (0,) * len(shape))

    grid_spec = pltpu.PrefetchScalarGridSpec(
        num_scalar_prefetch=3,
        grid=(batch // batch_tile,),
        in_specs=[
            pl.BlockSpec((n_nodes, batch_tile, n_feat),
                         lambda b, *refs: (0, b, 0)),        # x (batch-tiled)
            const((n_feat, l_pad)),                          # w_emb
            const((1, l_pad)),                               # b_emb
            const((3 * l_pad, l_pad)),                       # w_comb (fused K)
            const((1, l_pad)),                               # b_comb
            const((l_pad, c_pad)),                           # w_proj
            const((1, c_pad)),                               # b_proj
        ],
        out_specs=pl.BlockSpec((batch_tile, c_pad), lambda b, *refs: (b, 0)),
        scratch_shapes=[
            pltpu.VMEM((n_nodes, batch_tile, l_pad), jnp.float32),  # hidden states
        ],
    )

    out_padded = pl.pallas_call(
        _recursor_kernel,
        out_shape=jax.ShapeDtypeStruct((batch, c_pad), jnp.float32),
        grid_spec=grid_spec,
        compiler_params=pltpu.CompilerParams(
            # Batch tiles are independent trees -> shard across TensorCores.
            dimension_semantics=("parallel",)),
    )(node_idx, left_idx, right_idx, x,
      w_emb_p, b_emb_p, w_comb_p, b_comb_p, w_proj_p, b_proj_p)

    return out_padded[:, :n_classes]


def reference_forward(left, right, is_leaf, x,
                      w_emb, b_emb, w_comb, b_comb, w_proj, b_proj):
    """Pure-JAX batched re-implementation of the recursive traverse()."""
    n_nodes = x.shape[0]
    emb = jnp.maximum(jnp.einsum("nbf,fl->nbl", x, w_emb) + b_emb, 0.0)
    hidden = [None] * n_nodes
    for i in range(n_nodes):
        if int(is_leaf[i]) == 1:
            hidden[i] = emb[i]
        else:
            cat = jnp.concatenate(
                [hidden[int(left[i])], hidden[int(right[i])], emb[i]], axis=-1)
            hidden[i] = jnp.maximum(cat @ w_comb + b_comb, 0.0)
    return hidden[-1] @ w_proj + b_proj


if __name__ == "__main__":
    # Small shapes consistent with the module: num_jet_features=4,
    # latent_dimensions=32, num_classes=1; a 7-node binary tree (4 leaves);
    # 256 same-topology trees batched (2 parallel grid tiles of 128).
    NUM_JET_FEATURES = 4
    LATENT = 32
    NUM_CLASSES = 1
    N_NODES = 7
    BATCH = 256

    # Tree (children before parents, root last):
    #   0,1 -> 2 ; 3,4 -> 5 ; 2,5 -> 6 (root)
    left = jnp.array([0, 0, 0, 0, 0, 3, 2], dtype=jnp.int32)
    right = jnp.array([0, 0, 1, 0, 0, 4, 5], dtype=jnp.int32)
    is_leaf = jnp.array([1, 1, 0, 1, 1, 0, 0], dtype=jnp.int32)

    key = jax.random.PRNGKey(0)
    k = jax.random.split(key, 8)
    x = jax.random.normal(k[0], (N_NODES, BATCH, NUM_JET_FEATURES), jnp.float32)
    w_emb = jax.random.normal(k[1], (NUM_JET_FEATURES, LATENT), jnp.float32) * 0.2
    b_emb = jax.random.normal(k[2], (LATENT,), jnp.float32) * 0.1
    w_comb = jax.random.normal(k[3], (3 * LATENT, LATENT), jnp.float32) * 0.1
    b_comb = jax.random.normal(k[4], (LATENT,), jnp.float32) * 0.1
    w_proj = jax.random.normal(k[5], (LATENT, NUM_CLASSES), jnp.float32) * 0.2
    b_proj = jax.random.normal(k[6], (NUM_CLASSES,), jnp.float32) * 0.1

    out = pseudo_state_recursor(left, right, is_leaf, x,
                                w_emb, b_emb, w_comb, b_comb, w_proj, b_proj)
    out = jax.block_until_ready(out)

    ref = reference_forward(left, right, is_leaf, x,
                            w_emb, b_emb, w_comb, b_comb, w_proj, b_proj)
    np.testing.assert_allclose(np.asarray(out), np.asarray(ref),
                               rtol=1e-4, atol=1e-4)
    print("KERNEL_OK")
</pallas_src>

<mosaic_0001>
module attributes {stable_mosaic.version = 11 : i64} {
  func.func @_recursor_kernel(%arg0: i32, %arg1: memref<3xi32, #tpu.memory_space<smem>>, %arg2: memref<3xi32, #tpu.memory_space<smem>>, %arg3: memref<3xi32, #tpu.memory_space<smem>>, %arg4: memref<7x128x4xf32, #tpu.memory_space<vmem>>, %arg5: memref<4x128xf32, #tpu.memory_space<vmem>>, %arg6: memref<1x128xf32, #tpu.memory_space<vmem>>, %arg7: memref<384x128xf32, #tpu.memory_space<vmem>>, %arg8: memref<1x128xf32, #tpu.memory_space<vmem>>, %arg9: memref<128x128xf32, #tpu.memory_space<vmem>>, %arg10: memref<1x128xf32, #tpu.memory_space<vmem>>, %arg11: memref<128x128xf32, #tpu.memory_space<vmem>>, %arg12: memref<7x128x128xf32, #tpu.memory_space<vmem>>) attributes {dimension_semantics = [#tpu.dimension_semantics<parallel>], iteration_bounds = array<i64: 2>, scalar_prefetch = 3 : i64, scratch_operands = 1 : i64, tpu.core_type = #tpu.core_type<tc>, window_params = [{transform_indices = @transform_0, window_bounds = array<i64: 7, 128, 4>}, {pipeline_mode = #tpu.pipeline_mode<synchronous>, transform_indices = @transform_1, window_bounds = array<i64: 4, 128>}, {pipeline_mode = #tpu.pipeline_mode<synchronous>, transform_indices = @transform_2, window_bounds = array<i64: 1, 128>}, {pipeline_mode = #tpu.pipeline_mode<synchronous>, transform_indices = @transform_3, window_bounds = array<i64: 384, 128>}, {pipeline_mode = #tpu.pipeline_mode<synchronous>, transform_indices = @transform_4, window_bounds = array<i64: 1, 128>}, {pipeline_mode = #tpu.pipeline_mode<synchronous>, transform_indices = @transform_5, window_bounds = array<i64: 128, 128>}, {pipeline_mode = #tpu.pipeline_mode<synchronous>, transform_indices = @transform_6, window_bounds = array<i64: 1, 128>}, {transform_indices = @transform_7, window_bounds = array<i64: 128, 128>}]} {
    %c0 = arith.constant 0 : index
    %c0_0 = arith.constant 0 : index
    %0 = vector.load %arg5[%c0, %c0_0] : memref<4x128xf32, #tpu.memory_space<vmem>>, vector<4x128xf32>
    %c0_1 = arith.constant 0 : index
    %c0_2 = arith.constant 0 : index
    %1 = vector.load %arg6[%c0_1, %c0_2] : memref<1x128xf32, #tpu.memory_space<vmem>>, vector<1x128xf32>
    %c0_3 = arith.constant 0 : index
    %c0_4 = arith.constant 0 : index
    %c0_5 = arith.constant 0 : index
    %2 = vector.load %arg4[%c0_3, %c0_4, %c0_5] : memref<7x128x4xf32, #tpu.memory_space<vmem>>, vector<1x128x4xf32>
    %3 = vector.shape_cast %2 : vector<1x128x4xf32> to vector<128x4xf32>
    %cst = arith.constant dense<0.000000e+00> : vector<128x128xf32>
    %4 = tpu.matmul %3, %0, %cst {dimension_numbers = #tpu.dot_dimension_numbers<[1], [0], [0], [1], [0, 0, 1, 1], [], []>} : vector<128x4xf32>, vector<4x128xf32>, vector<128x128xf32> -> vector<128x128xf32>
    %5 = vector.broadcast %1 : vector<1x128xf32> to vector<128x128xf32>
    %6 = arith.addf %4, %5 : vector<128x128xf32>
    %cst_6 = arith.constant 0.000000e+00 : f32
    %7 = vector.broadcast %cst_6 : f32 to vector<128x128xf32>
    %8 = arith.maximumf %6, %7 : vector<128x128xf32>
    %c0_7 = arith.constant 0 : index
    %c0_8 = arith.constant 0 : index
    %c0_9 = arith.constant 0 : index
    %9 = vector.load %arg12[%c0_7, %c0_8, %c0_9] : memref<7x128x128xf32, #tpu.memory_space<vmem>>, vector<1x128x128xf32>
    %10 = vector.shape_cast %9 : vector<1x128x128xf32> to vector<128x128xf32>
    %11 = vector.shape_cast %8 : vector<128x128xf32> to vector<1x128x128xf32>
    tpu.vector_store %arg12[%c0_7, %c0_8, %c0_9], %11 {strides = array<i32>} : memref<7x128x128xf32, #tpu.memory_space<vmem>>, vector<1x128x128xf32>,
    %c1 = arith.constant 1 : index
    %c0_10 = arith.constant 0 : index
    %c0_11 = arith.constant 0 : index
    %12 = vector.load %arg4[%c1, %c0_10, %c0_11] : memref<7x128x4xf32, #tpu.memory_space<vmem>>, vector<1x128x4xf32>
    %13 = vector.shape_cast %12 : vector<1x128x4xf32> to vector<128x4xf32>
    %cst_12 = arith.constant dense<0.000000e+00> : vector<128x128xf32>
    %14 = tpu.matmul %13, %0, %cst_12 {dimension_numbers = #tpu.dot_dimension_numbers<[1], [0], [0], [1], [0, 0, 1, 1], [], []>} : vector<128x4xf32>, vector<4x128xf32>, vector<128x128xf32> -> vector<128x128xf32>
    %15 = vector.broadcast %1 : vector<1x128xf32> to vector<128x128xf32>
    %16 = arith.addf %14, %15 : vector<128x128xf32>
    %cst_13 = arith.constant 0.000000e+00 : f32
    %17 = vector.broadcast %cst_13 : f32 to vector<128x128xf32>
    %18 = arith.maximumf %16, %17 : vector<128x128xf32>
    %c1_14 = arith.constant 1 : index
    %c0_15 = arith.constant 0 : index
    %c0_16 = arith.constant 0 : index
    %19 = vector.load %arg12[%c1_14, %c0_15, %c0_16] : memref<7x128x128xf32, #tpu.memory_space<vmem>>, vector<1x128x128xf32>
    %20 = vector.shape_cast %19 : vector<1x128x128xf32> to vector<128x128xf32>
    %21 = vector.shape_cast %18 : vector<128x128xf32> to vector<1x128x128xf32>
    tpu.vector_store %arg12[%c1_14, %c0_15, %c0_16], %21 {strides = array<i32>} : memref<7x128x128xf32, #tpu.memory_space<vmem>>, vector<1x128x128xf32>,
    %c2 = arith.constant 2 : index
    %c0_17 = arith.constant 0 : index
    %c0_18 = arith.constant 0 : index
    %22 = vector.load %arg4[%c2, %c0_17, %c0_18] : memref<7x128x4xf32, #tpu.memory_space<vmem>>, vector<1x128x4xf32>
    %23 = vector.shape_cast %22 : vector<1x128x4xf32> to vector<128x4xf32>
    %cst_19 = arith.constant dense<0.000000e+00> : vector<128x128xf32>
    %24 = tpu.matmul %23, %0, %cst_19 {dimension_numbers = #tpu.dot_dimension_numbers<[1], [0], [0], [1], [0, 0, 1, 1], [], []>} : vector<128x4xf32>, vector<4x128xf32>, vector<128x128xf32> -> vector<128x128xf32>
    %25 = vector.broadcast %1 : vector<1x128xf32> to vector<128x128xf32>
    %26 = arith.addf %24, %25 : vector<128x128xf32>
    %cst_20 = arith.constant 0.000000e+00 : f32
    %27 = vector.broadcast %cst_20 : f32 to vector<128x128xf32>
    %28 = arith.maximumf %26, %27 : vector<128x128xf32>
    %c2_21 = arith.constant 2 : index
    %c0_22 = arith.constant 0 : index
    %c0_23 = arith.constant 0 : index
    %29 = vector.load %arg12[%c2_21, %c0_22, %c0_23] : memref<7x128x128xf32, #tpu.memory_space<vmem>>, vector<1x128x128xf32>
    %30 = vector.shape_cast %29 : vector<1x128x128xf32> to vector<128x128xf32>
    %31 = vector.shape_cast %28 : vector<128x128xf32> to vector<1x128x128xf32>
    tpu.vector_store %arg12[%c2_21, %c0_22, %c0_23], %31 {strides = array<i32>} : memref<7x128x128xf32, #tpu.memory_space<vmem>>, vector<1x128x128xf32>,
    %c3 = arith.constant 3 : index
    %c0_24 = arith.constant 0 : index
    %c0_25 = arith.constant 0 : index
    %32 = vector.load %arg4[%c3, %c0_24, %c0_25] : memref<7x128x4xf32, #tpu.memory_space<vmem>>, vector<1x128x4xf32>
    %33 = vector.shape_cast %32 : vector<1x128x4xf32> to vector<128x4xf32>
    %cst_26 = arith.constant dense<0.000000e+00> : vector<128x128xf32>
    %34 = tpu.matmul %33, %0, %cst_26 {dimension_numbers = #tpu.dot_dimension_numbers<[1], [0], [0], [1], [0, 0, 1, 1], [], []>} : vector<128x4xf32>, vector<4x128xf32>, vector<128x128xf32> -> vector<128x128xf32>
    %35 = vector.broadcast %1 : vector<1x128xf32> to vector<128x128xf32>
    %36 = arith.addf %34, %35 : vector<128x128xf32>
    %cst_27 = arith.constant 0.000000e+00 : f32
    %37 = vector.broadcast %cst_27 : f32 to vector<128x128xf32>
    %38 = arith.maximumf %36, %37 : vector<128x128xf32>
    %c3_28 = arith.constant 3 : index
    %c0_29 = arith.constant 0 : index
    %c0_30 = arith.constant 0 : index
    %39 = vector.load %arg12[%c3_28, %c0_29, %c0_30] : memref<7x128x128xf32, #tpu.memory_space<vmem>>, vector<1x128x128xf32>
    %40 = vector.shape_cast %39 : vector<1x128x128xf32> to vector<128x128xf32>
    %41 = vector.shape_cast %38 : vector<128x128xf32> to vector<1x128x128xf32>
    tpu.vector_store %arg12[%c3_28, %c0_29, %c0_30], %41 {strides = array<i32>} : memref<7x128x128xf32, #tpu.memory_space<vmem>>, vector<1x128x128xf32>,
    %c4 = arith.constant 4 : index
    %c0_31 = arith.constant 0 : index
    %c0_32 = arith.constant 0 : index
    %42 = vector.load %arg4[%c4, %c0_31, %c0_32] : memref<7x128x4xf32, #tpu.memory_space<vmem>>, vector<1x128x4xf32>
    %43 = vector.shape_cast %42 : vector<1x128x4xf32> to vector<128x4xf32>
    %cst_33 = arith.constant dense<0.000000e+00> : vector<128x128xf32>
    %44 = tpu.matmul %43, %0, %cst_33 {dimension_numbers = #tpu.dot_dimension_numbers<[1], [0], [0], [1], [0, 0, 1, 1], [], []>} : vector<128x4xf32>, vector<4x128xf32>, vector<128x128xf32> -> vector<128x128xf32>
    %45 = vector.broadcast %1 : vector<1x128xf32> to vector<128x128xf32>
    %46 = arith.addf %44, %45 : vector<128x128xf32>
    %cst_34 = arith.constant 0.000000e+00 : f32
    %47 = vector.broadcast %cst_34 : f32 to vector<128x128xf32>
    %48 = arith.maximumf %46, %47 : vector<128x128xf32>
    %c4_35 = arith.constant 4 : index
    %c0_36 = arith.constant 0 : index
    %c0_37 = arith.constant 0 : index
    %49 = vector.load %arg12[%c4_35, %c0_36, %c0_37] : memref<7x128x128xf32, #tpu.memory_space<vmem>>, vector<1x128x128xf32>
    %50 = vector.shape_cast %49 : vector<1x128x128xf32> to vector<128x128xf32>
    %51 = vector.shape_cast %48 : vector<128x128xf32> to vector<1x128x128xf32>
    tpu.vector_store %arg12[%c4_35, %c0_36, %c0_37], %51 {strides = array<i32>} : memref<7x128x128xf32, #tpu.memory_space<vmem>>, vector<1x128x128xf32>,
    %c5 = arith.constant 5 : index
    %c0_38 = arith.constant 0 : index
    %c0_39 = arith.constant 0 : index
    %52 = vector.load %arg4[%c5, %c0_38, %c0_39] : memref<7x128x4xf32, #tpu.memory_space<vmem>>, vector<1x128x4xf32>
    %53 = vector.shape_cast %52 : vector<1x128x4xf32> to vector<128x4xf32>
    %cst_40 = arith.constant dense<0.000000e+00> : vector<128x128xf32>
    %54 = tpu.matmul %53, %0, %cst_40 {dimension_numbers = #tpu.dot_dimension_numbers<[1], [0], [0], [1], [0, 0, 1, 1], [], []>} : vector<128x4xf32>, vector<4x128xf32>, vector<128x128xf32> -> vector<128x128xf32>
    %55 = vector.broadcast %1 : vector<1x128xf32> to vector<128x128xf32>
    %56 = arith.addf %54, %55 : vector<128x128xf32>
    %cst_41 = arith.constant 0.000000e+00 : f32
    %57 = vector.broadcast %cst_41 : f32 to vector<128x128xf32>
    %58 = arith.maximumf %56, %57 : vector<128x128xf32>
    %c5_42 = arith.constant 5 : index
    %c0_43 = arith.constant 0 : index
    %c0_44 = arith.constant 0 : index
    %59 = vector.load %arg12[%c5_42, %c0_43, %c0_44] : memref<7x128x128xf32, #tpu.memory_space<vmem>>, vector<1x128x128xf32>
    %60 = vector.shape_cast %59 : vector<1x128x128xf32> to vector<128x128xf32>
    %61 = vector.shape_cast %58 : vector<128x128xf32> to vector<1x128x128xf32>
    tpu.vector_store %arg12[%c5_42, %c0_43, %c0_44], %61 {strides = array<i32>} : memref<7x128x128xf32, #tpu.memory_space<vmem>>, vector<1x128x128xf32>,
    %c6 = arith.constant 6 : index
    %c0_45 = arith.constant 0 : index
    %c0_46 = arith.constant 0 : index
    %62 = vector.load %arg4[%c6, %c0_45, %c0_46] : memref<7x128x4xf32, #tpu.memory_space<vmem>>, vector<1x128x4xf32>
    %63 = vector.shape_cast %62 : vector<1x128x4xf32> to vector<128x4xf32>
    %cst_47 = arith.constant dense<0.000000e+00> : vector<128x128xf32>
    %64 = tpu.matmul %63, %0, %cst_47 {dimension_numbers = #tpu.dot_dimension_numbers<[1], [0], [0], [1], [0, 0, 1, 1], [], []>} : vector<128x4xf32>, vector<4x128xf32>, vector<128x128xf32> -> vector<128x128xf32>
    %65 = vector.broadcast %1 : vector<1x128xf32> to vector<128x128xf32>
    %66 = arith.addf %64, %65 : vector<128x128xf32>
    %cst_48 = arith.constant 0.000000e+00 : f32
    %67 = vector.broadcast %cst_48 : f32 to vector<128x128xf32>
    %68 = arith.maximumf %66, %67 : vector<128x128xf32>
    %c6_49 = arith.constant 6 : index
    %c0_50 = arith.constant 0 : index
    %c0_51 = arith.constant 0 : index
    %69 = vector.load %arg12[%c6_49, %c0_50, %c0_51] : memref<7x128x128xf32, #tpu.memory_space<vmem>>, vector<1x128x128xf32>
    %70 = vector.shape_cast %69 : vector<1x128x128xf32> to vector<128x128xf32>
    %71 = vector.shape_cast %68 : vector<128x128xf32> to vector<1x128x128xf32>
    tpu.vector_store %arg12[%c6_49, %c0_50, %c0_51], %71 {strides = array<i32>} : memref<7x128x128xf32, #tpu.memory_space<vmem>>, vector<1x128x128xf32>,
    %c0_52 = arith.constant 0 : index
    %c0_53 = arith.constant 0 : index
    %72 = vector.load %arg7[%c0_52, %c0_53] : memref<384x128xf32, #tpu.memory_space<vmem>>, vector<384x128xf32>
    %c0_54 = arith.constant 0 : index
    %c0_55 = arith.constant 0 : index
    %73 = vector.load %arg8[%c0_54, %c0_55] : memref<1x128xf32, #tpu.memory_space<vmem>>, vector<1x128xf32>
    %c0_56 = arith.constant 0 : index
    %74 = memref.load %arg1[%c0_56] : memref<3xi32, #tpu.memory_space<smem>>
    %c0_57 = arith.constant 0 : index
    %75 = memref.load %arg2[%c0_57] : memref<3xi32, #tpu.memory_space<smem>>
    %76 = arith.index_cast %75 : i32 to index
    %c0_58 = arith.constant 0 : index
    %c0_59 = arith.constant 0 : index
    %77 = vector.load %arg12[%76, %c0_58, %c0_59] : memref<7x128x128xf32, #tpu.memory_space<vmem>>, vector<1x128x128xf32>
    %78 = vector.shape_cast %77 : vector<1x128x128xf32> to vector<128x128xf32>
    %c0_60 = arith.constant 0 : index
    %79 = memref.load %arg3[%c0_60] : memref<3xi32, #tpu.memory_space<smem>>
    %80 = arith.index_cast %79 : i32 to index
    %c0_61 = arith.constant 0 : index
    %c0_62 = arith.constant 0 : index
    %81 = vector.load %arg12[%80, %c0_61, %c0_62] : memref<7x128x128xf32, #tpu.memory_space<vmem>>, vector<1x128x128xf32>
    %82 = vector.shape_cast %81 : vector<1x128x128xf32> to vector<128x128xf32>
    %83 = arith.index_cast %74 : i32 to index
    %c0_63 = arith.constant 0 : index
    %c0_64 = arith.constant 0 : index
    %84 = vector.load %arg12[%83, %c0_63, %c0_64] : memref<7x128x128xf32, #tpu.memory_space<vmem>>, vector<1x128x128xf32>
    %85 = vector.shape_cast %84 : vector<1x128x128xf32> to vector<128x128xf32>
    %86 = tpu.concatenate %78, %82, %85 in 1 : vector<128x128xf32>, vector<128x128xf32>, vector<128x128xf32> -> vector<128x384xf32>
    %cst_65 = arith.constant dense<0.000000e+00> : vector<128x128xf32>
    %87 = tpu.matmul %86, %72, %cst_65 {dimension_numbers = #tpu.dot_dimension_numbers<[1], [0], [0], [1], [0, 0, 1, 1], [], []>} : vector<128x384xf32>, vector<384x128xf32>, vector<128x128xf32> -> vector<128x128xf32>
    %88 = vector.broadcast %73 : vector<1x128xf32> to vector<128x128xf32>
    %89 = arith.addf %87, %88 : vector<128x128xf32>
    %cst_66 = arith.constant 0.000000e+00 : f32
    %90 = vector.broadcast %cst_66 : f32 to vector<128x128xf32>
    %91 = arith.maximumf %89, %90 : vector<128x128xf32>
    %92 = arith.index_cast %74 : i32 to index
    %c0_67 = arith.constant 0 : index
    %c0_68 = arith.constant 0 : index
    %93 = vector.load %arg12[%92, %c0_67, %c0_68] : memref<7x128x128xf32, #tpu.memory_space<vmem>>, vector<1x128x128xf32>
    %94 = vector.shape_cast %93 : vector<1x128x128xf32> to vector<128x128xf32>
    %95 = vector.shape_cast %91 : vector<128x128xf32> to vector<1x128x128xf32>
    tpu.vector_store %arg12[%92, %c0_67, %c0_68], %95 {strides = array<i32>} : memref<7x128x128xf32, #tpu.memory_space<vmem>>, vector<1x128x128xf32>,
    %c1_69 = arith.constant 1 : index
    %96 = memref.load %arg1[%c1_69] : memref<3xi32, #tpu.memory_space<smem>>
    %c1_70 = arith.constant 1 : index
    %97 = memref.load %arg2[%c1_70] : memref<3xi32, #tpu.memory_space<smem>>
    %98 = arith.index_cast %97 : i32 to index
    %c0_71 = arith.constant 0 : index
    %c0_72 = arith.constant 0 : index
    %99 = vector.load %arg12[%98, %c0_71, %c0_72] : memref<7x128x128xf32, #tpu.memory_space<vmem>>, vector<1x128x128xf32>
    %100 = vector.shape_cast %99 : vector<1x128x128xf32> to vector<128x128xf32>
    %c1_73 = arith.constant 1 : index
    %101 = memref.load %arg3[%c1_73] : memref<3xi32, #tpu.memory_space<smem>>
    %102 = arith.index_cast %101 : i32 to index
    %c0_74 = arith.constant 0 : index
    %c0_75 = arith.constant 0 : index
    %103 = vector.load %arg12[%102, %c0_74, %c0_75] : memref<7x128x128xf32, #tpu.memory_space<vmem>>, vector<1x128x128xf32>
    %104 = vector.shape_cast %103 : vector<1x128x128xf32> to vector<128x128xf32>
    %105 = arith.index_cast %96 : i32 to index
    %c0_76 = arith.constant 0 : index
    %c0_77 = arith.constant 0 : index
    %106 = vector.load %arg12[%105, %c0_76, %c0_77] : memref<7x128x128xf32, #tpu.memory_space<vmem>>, vector<1x128x128xf32>
    %107 = vector.shape_cast %106 : vector<1x128x128xf32> to vector<128x128xf32>
    %108 = tpu.concatenate %100, %104, %107 in 1 : vector<128x128xf32>, vector<128x128xf32>, vector<128x128xf32> -> vector<128x384xf32>
    %cst_78 = arith.constant dense<0.000000e+00> : vector<128x128xf32>
    %109 = tpu.matmul %108, %72, %cst_78 {dimension_numbers = #tpu.dot_dimension_numbers<[1], [0], [0], [1], [0, 0, 1, 1], [], []>} : vector<128x384xf32>, vector<384x128xf32>, vector<128x128xf32> -> vector<128x128xf32>
    %110 = vector.broadcast %73 : vector<1x128xf32> to vector<128x128xf32>
    %111 = arith.addf %109, %110 : vector<128x128xf32>
    %cst_79 = arith.constant 0.000000e+00 : f32
    %112 = vector.broadcast %cst_79 : f32 to vector<128x128xf32>
    %113 = arith.maximumf %111, %112 : vector<128x128xf32>
    %114 = arith.index_cast %96 : i32 to index
    %c0_80 = arith.constant 0 : index
    %c0_81 = arith.constant 0 : index
    %115 = vector.load %arg12[%114, %c0_80, %c0_81] : memref<7x128x128xf32, #tpu.memory_space<vmem>>, vector<1x128x128xf32>
    %116 = vector.shape_cast %115 : vector<1x128x128xf32> to vector<128x128xf32>
    %117 = vector.shape_cast %113 : vector<128x128xf32> to vector<1x128x128xf32>
    tpu.vector_store %arg12[%114, %c0_80, %c0_81], %117 {strides = array<i32>} : memref<7x128x128xf32, #tpu.memory_space<vmem>>, vector<1x128x128xf32>,
    %c2_82 = arith.constant 2 : index
    %118 = memref.load %arg1[%c2_82] : memref<3xi32, #tpu.memory_space<smem>>
    %c2_83 = arith.constant 2 : index
    %119 = memref.load %arg2[%c2_83] : memref<3xi32, #tpu.memory_space<smem>>
    %120 = arith.index_cast %119 : i32 to index
    %c0_84 = arith.constant 0 : index
    %c0_85 = arith.constant 0 : index
    %121 = vector.load %arg12[%120, %c0_84, %c0_85] : memref<7x128x128xf32, #tpu.memory_space<vmem>>, vector<1x128x128xf32>
    %122 = vector.shape_cast %121 : vector<1x128x128xf32> to vector<128x128xf32>
    %c2_86 = arith.constant 2 : index
    %123 = memref.load %arg3[%c2_86] : memref<3xi32, #tpu.memory_space<smem>>
    %124 = arith.index_cast %123 : i32 to index
    %c0_87 = arith.constant 0 : index
    %c0_88 = arith.constant 0 : index
    %125 = vector.load %arg12[%124, %c0_87, %c0_88] : memref<7x128x128xf32, #tpu.memory_space<vmem>>, vector<1x128x128xf32>
    %126 = vector.shape_cast %125 : vector<1x128x128xf32> to vector<128x128xf32>
    %127 = arith.index_cast %118 : i32 to index
    %c0_89 = arith.constant 0 : index
    %c0_90 = arith.constant 0 : index
    %128 = vector.load %arg12[%127, %c0_89, %c0_90] : memref<7x128x128xf32, #tpu.memory_space<vmem>>, vector<1x128x128xf32>
    %129 = vector.shape_cast %128 : vector<1x128x128xf32> to vector<128x128xf32>
    %130 = tpu.concatenate %122, %126, %129 in 1 : vector<128x128xf32>, vector<128x128xf32>, vector<128x128xf32> -> vector<128x384xf32>
    %cst_91 = arith.constant dense<0.000000e+00> : vector<128x128xf32>
    %131 = tpu.matmul %130, %72, %cst_91 {dimension_numbers = #tpu.dot_dimension_numbers<[1], [0], [0], [1], [0, 0, 1, 1], [], []>} : vector<128x384xf32>, vector<384x128xf32>, vector<128x128xf32> -> vector<128x128xf32>
    %132 = vector.broadcast %73 : vector<1x128xf32> to vector<128x128xf32>
    %133 = arith.addf %131, %132 : vector<128x128xf32>
    %cst_92 = arith.constant 0.000000e+00 : f32
    %134 = vector.broadcast %cst_92 : f32 to vector<128x128xf32>
    %135 = arith.maximumf %133, %134 : vector<128x128xf32>
    %136 = arith.index_cast %118 : i32 to index
    %c0_93 = arith.constant 0 : index
    %c0_94 = arith.constant 0 : index
    %137 = vector.load %arg12[%136, %c0_93, %c0_94] : memref<7x128x128xf32, #tpu.memory_space<vmem>>, vector<1x128x128xf32>
    %138 = vector.shape_cast %137 : vector<1x128x128xf32> to vector<128x128xf32>
    %139 = vector.shape_cast %135 : vector<128x128xf32> to vector<1x128x128xf32>
    tpu.vector_store %arg12[%136, %c0_93, %c0_94], %139 {strides = array<i32>} : memref<7x128x128xf32, #tpu.memory_space<vmem>>, vector<1x128x128xf32>,
    %c6_95 = arith.constant 6 : index
    %c0_96 = arith.constant 0 : index
    %c0_97 = arith.constant 0 : index
    %140 = vector.load %arg12[%c6_95, %c0_96, %c0_97] : memref<7x128x128xf32, #tpu.memory_space<vmem>>, vector<1x128x128xf32>
    %141 = vector.shape_cast %140 : vector<1x128x128xf32> to vector<128x128xf32>
    %c0_98 = arith.constant 0 : index
    %c0_99 = arith.constant 0 : index
    %142 = vector.load %arg9[%c0_98, %c0_99] : memref<128x128xf32, #tpu.memory_space<vmem>>, vector<128x128xf32>
    %cst_100 = arith.constant dense<0.000000e+00> : vector<128x128xf32>
    %143 = tpu.matmul %141, %142, %cst_100 {dimension_numbers = #tpu.dot_dimension_numbers<[1], [0], [0], [1], [0, 0, 1, 1], [], []>} : vector<128x128xf32>, vector<128x128xf32>, vector<128x128xf32> -> vector<128x128xf32>
    %c0_101 = arith.constant 0 : index
    %c0_102 = arith.constant 0 : index
    %144 = vector.load %arg10[%c0_101, %c0_102] : memref<1x128xf32, #tpu.memory_space<vmem>>, vector<1x128xf32>
    %145 = vector.broadcast %144 : vector<1x128xf32> to vector<128x128xf32>
    %146 = arith.addf %143, %145 : vector<128x128xf32>
    %c0_103 = arith.constant 0 : index
    %c0_104 = arith.constant 0 : index
    %147 = vector.load %arg11[%c0_103, %c0_104] : memref<128x128xf32, #tpu.memory_space<vmem>>, vector<128x128xf32>
    tpu.vector_store %arg11[%c0_103, %c0_104], %146 {strides = array<i32>} : memref<128x128xf32, #tpu.memory_space<vmem>>, vector<128x128xf32>,
    return
  }
  func.func @transform_0(%arg0: i32, %arg1: memref<3xi32, #tpu.memory_space<smem>>, %arg2: memref<3xi32, #tpu.memory_space<smem>>, %arg3: memref<3xi32, #tpu.memory_space<smem>>) -> (i32, i32, i32) {
    %c0_i32 = arith.constant 0 : i32
    %c0_i32_0 = arith.constant 0 : i32
    %c0_i32_1 = arith.constant 0 : i32
    return %c0_i32, %arg0, %c0_i32_0 : i32, i32, i32
  }
  func.func @transform_1(%arg0: i32, %arg1: memref<3xi32, #tpu.memory_space<smem>>, %arg2: memref<3xi32, #tpu.memory_space<smem>>, %arg3: memref<3xi32, #tpu.memory_space<smem>>) -> (i32, i32) {
    %c0_i32 = arith.constant 0 : i32
    %c0_i32_0 = arith.constant 0 : i32
    %c0_i32_1 = arith.constant 0 : i32
    return %c0_i32, %c0_i32_0 : i32, i32
  }
  func.func @transform_2(%arg0: i32, %arg1: memref<3xi32, #tpu.memory_space<smem>>, %arg2: memref<3xi32, #tpu.memory_space<smem>>, %arg3: memref<3xi32, #tpu.memory_space<smem>>) -> (i32, i32) {
    %c0_i32 = arith.constant 0 : i32
    %c0_i32_0 = arith.constant 0 : i32
    %c0_i32_1 = arith.constant 0 : i32
    return %c0_i32, %c0_i32_0 : i32, i32
  }
  func.func @transform_3(%arg0: i32, %arg1: memref<3xi32, #tpu.memory_space<smem>>, %arg2: memref<3xi32, #tpu.memory_space<smem>>, %arg3: memref<3xi32, #tpu.memory_space<smem>>) -> (i32, i32) {
    %c0_i32 = arith.constant 0 : i32
    %c0_i32_0 = arith.constant 0 : i32
    %c0_i32_1 = arith.constant 0 : i32
    return %c0_i32, %c0_i32_0 : i32, i32
  }
  func.func @transform_4(%arg0: i32, %arg1: memref<3xi32, #tpu.memory_space<smem>>, %arg2: memref<3xi32, #tpu.memory_space<smem>>, %arg3: memref<3xi32, #tpu.memory_space<smem>>) -> (i32, i32) {
    %c0_i32 = arith.constant 0 : i32
    %c0_i32_0 = arith.constant 0 : i32
    %c0_i32_1 = arith.constant 0 : i32
    return %c0_i32, %c0_i32_0 : i32, i32
  }
  func.func @transform_5(%arg0: i32, %arg1: memref<3xi32, #tpu.memory_space<smem>>, %arg2: memref<3xi32, #tpu.memory_space<smem>>, %arg3: memref<3xi32, #tpu.memory_space<smem>>) -> (i32, i32) {
    %c0_i32 = arith.constant 0 : i32
    %c0_i32_0 = arith.constant 0 : i32
    %c0_i32_1 = arith.constant 0 : i32
    return %c0_i32, %c0_i32_0 : i32, i32
  }
  func.func @transform_6(%arg0: i32, %arg1: memref<3xi32, #tpu.memory_space<smem>>, %arg2: memref<3xi32, #tpu.memory_space<smem>>, %arg3: memref<3xi32, #tpu.memory_space<smem>>) -> (i32, i32) {
    %c0_i32 = arith.constant 0 : i32
    %c0_i32_0 = arith.constant 0 : i32
    %c0_i32_1 = arith.constant 0 : i32
    return %c0_i32, %c0_i32_0 : i32, i32
  }
  func.func @transform_7(%arg0: i32, %arg1: memref<3xi32, #tpu.memory_space<smem>>, %arg2: memref<3xi32, #tpu.memory_space<smem>>, %arg3: memref<3xi32, #tpu.memory_space<smem>>) -> (i32, i32) {
    %c0_i32 = arith.constant 0 : i32
    %c0_i32_0 = arith.constant 0 : i32
    return %arg0, %c0_i32 : i32, i32
  }
}

</mosaic_0001>

<bundles_post_ra>
// kernel: tpu_custom_call.1
= control target key start
LH: loop header
LB: loop body
LE: loop exit
PB: predicated region body
PF: predicated region fallthrough
CT: control target
= control target key end

     0   :  { %s6966_s0 = inlined_call_operand.vmem [shape: s32[3], index: 0, kind: input, shape index: {}]   ;;  %s6967_s3 = inlined_call_operand.vmem [shape: f32[7,256,4], index: 3, kind: input, shape index: {}]   ;;  %s6968_s4 = inlined_call_operand.vmem [shape: f32[4,128], index: 4, kind: input, shape index: {}]   ;;  %s6969_s5 = inlined_call_operand.vmem [shape: f32[1,128], index: 5, kind: input, shape index: {}]   ;;  %s6970_s6 = inlined_call_operand.vmem [shape: f32[384,128], index: 6, kind: input, shape index: {}]   ;;  %s6971_s7 = inlined_call_operand.vmem [shape: f32[1,128], index: 7, kind: input, shape index: {}]   ;;  %s6972_s8 = inlined_call_operand.vmem [shape: f32[128,128], index: 8, kind: input, shape index: {}]   ;;  %s6973_s9 = inlined_call_operand.vmem [shape: f32[1,128], index: 9, kind: input, shape index: {}]   ;;  %s6974_s10 = inlined_call_operand.hbm [shape: f32[256,128], index: 10, kind: output, shape index: {}]   ;;  %s6975_s1 = inlined_call_operand.vmem [shape: s32[3], index: 1, kind: input, shape index: {}]   ;;  %s6976_s2 = inlined_call_operand.vmem [shape: s32[3], index: 2, kind: input, shape index: {}]  }
   0x1   :  { %s15_s15 = sshll.u32 %s6966_s0, 4  ;;  %s19_s18 = sshll.u32 %s6975_s1, 4  ;;  %s16_s15 = int_to_ptr.vmem [resolvable:$true] %s15_s15  ;;  %s20_s18 = int_to_ptr.vmem [resolvable:$true] %s19_s18 }
   0x2   :  { %s5217_s19 = scalar_lea.vmem %s16_s15, 16  ;;  %p5222_p1 = scmp.lt.s32.totalorder %s16_s15, %s16_s15 }
   0x3   :  { %p5218_p0 = scmp.ne.s32.totalorder %s16_s15, %s5217_s19  ;;  %p5223_p2 = scmp.lt.s32.totalorder %s5217_s19, %s5217_s19 }
   0x5   :  { %p5224_p3 = por %p5223_p2, %p5222_p1 }
   0x7   :  { %p5225_p4 = pnand %p5224_p3, %p5218_p0 }
   0x9   :  { %5228 = shalt.err (!%p5225_p4)  }
   0xa   :  { %s5317_s20 = smov [#allocation4]   ;;  %s5229_s21 = scalar_lea.vmem %s20_s18, 16 }
   0xb   :  { %18 = dma.vmem_to_smem %s16_s15, 16, %s5317_s20, [#allocation3] }
   0xc   :  { %p5230_p5 = scmp.ne.s32.totalorder %s20_s18, %s5229_s21  ;;  %p5234_p6 = scmp.lt.s32.totalorder %s20_s18, %s20_s18 }
   0xd   :  { %p5235_p7 = scmp.lt.s32.totalorder %s5229_s21, %s5229_s21 }
   0xf   :  { %p5236_p8 = por %p5235_p7, %p5234_p6 }
  0x11   :  { %p5237_p9 = pnand %p5236_p8, %p5230_p5 }
  0x13   :  { %5240 = shalt.err (!%p5237_p9)  }
  0x14   :  { %s5318_s0 = smov [#allocation5]   ;;  %s23_s23 = sshll.u32 %s6976_s2, 4  ;;  %s24_s23 = int_to_ptr.vmem [resolvable:$true] %s23_s23 }
  0x15   :  { %22 = dma.vmem_to_smem %s20_s18, 16, %s5318_s0, [#allocation3] }
  0x16   :  { %s5241_s24 = scalar_lea.vmem %s24_s23, 16  ;;  %p5246_p11 = scmp.lt.s32.totalorder %s24_s23, %s24_s23 }
  0x17   :  { %p5242_p10 = scmp.ne.s32.totalorder %s24_s23, %s5241_s24  ;;  %p5247_p12 = scmp.lt.s32.totalorder %s5241_s24, %s5241_s24 }
  0x19   :  { %p5248_p13 = por %p5247_p12, %p5246_p11 }
  0x1b   :  { %p5249_p0 = pnand %p5248_p13, %p5242_p10 }
  0x1d   :  { %5252 = shalt.err (!%p5249_p0)  }
  0x1e   :  { %s5319_s25 = smov [#allocation6]  }
  0x1f   :  { %26 = dma.vmem_to_smem %s24_s23, 16, %s5319_s25, [#allocation3] }
  0x20   :  { %5295 = dma.done.wait [#allocation3], 48 }
  0x21   :  { %5296 = vsyncadd [#allocation3], 4294967248 }
  0x22   :  { %28 = sfence }
  0x23   :  { %29 = vsyncpa [#allocation9], 0 }
  0x24   :  { %31 = vsyncpa [#allocation9 + $0x1], 0  ;;  %s5387_s26 = smov 0   ;;  %s5389_s27 = smov 0  }
  0x25   :  { %s5391_s2 = smov 0   ;;  %s5393_s28 = smov 0  }
  0x26 LB: > { %s3979_s29 = sadd.s32 4294967295, %s5315_s28   ;;  %s3980_s30 = sadd.s32 4294967294, %s5315_s28   ;;  %s5315_s28 = sphi %s5393_s28, %s6996_s28   ;;  %s5311_s2 = sphi %s5391_s2, %s6995_s2   ;;  %s5307_s27 = sphi %s5389_s27, %s6994_s27   ;;  %s5303_s26 = sphi %s5387_s26, %s6993_s26  }
  0x27   : > { %s5410_s11 = sadd.s32 1, %s5315_s28   ;;  %s44_s12 = sadd.s32 1, %s5311_s2 }
  0x28   : > { %s41_s13 = ssub.s32 %s5315_s28, %s5410_s11  ;;  %p51_p1 = scmp.ne.s32.totalorder %s5311_s2, %s5307_s27 }
  0x29   : > { %p42_p2 = scmp.eq.s32.totalorder %s41_s13, 0  ;;  %p52_p3 = scmp.eq.s32.totalorder %s5315_s28, 0 }
  0x2a   : > { %p207_p4 = scmp.eq.s32.totalorder %s3979_s29, 1  ;;  %p212_p5 = scmp.ne.s32.totalorder %s5307_s27, %s5303_s26 }
  0x2b   : > { %s5423_s14 = scalar_select %p42_p2, %s5311_s2, %s44_s12  }
  0x2c   : > { %p53_p6 = por %p52_p3, %p51_p1  ;;  %p5425_p7 = por %p207_p4, %p51_p1 }
  0x2d   : > { %p213_p8 = scmp.eq.s32.totalorder %s3980_s30, 1  ;;  %p3982_p10 = scmp.ge.s32.totalorder %s5315_s28, 2 }
  0x2f   : > { %p5429_p9 = por %p213_p8, %p212_p5  ;;  %247 = sbr.rel (%p3982_p10) target bundleno = 113 (0x71), region = 40 }
  0x34   : > { %250 = sbr.rel (!%p53_p6) target bundleno = 113 (0x71), region = 44  ;;  %s252_s17 = sand.u32 (%p53_p6), 1, %s5311_s2  }
  0x35   : > { %s4225_s18 = sshll.u32 (%p53_p6), %s5315_s28, 7  ;;  %s5122_s19 = smul.u32 (%p53_p6), 896, %s252_s17 }
  0x36   : > { %s5441_s0 = scalar_lea.vmem (%p53_p6), %s6967_s3, %s4225_s18 }
  0x37   : > { %v508_v0 = vld [vmem:[%s5441_s0] sm:$0xff] (%p53_p6)  ;;  %v510_v1 = vld [vmem:[%s5441_s0 + $0x8] sm:$0xff] (%p53_p6)  ;;  %v512_v2 = vld [vmem:[%s5441_s0 + $0x10] sm:$0xff] (%p53_p6)  ;;  %s5449_s1 = scalar_lea.vmem (%p53_p6), [#allocation7], %s5122_s19 }
  0x38   : > { %v514_v3 = vld [vmem:[%s5441_s0 + $0x18] sm:$0xff] (%p53_p6)  ;;  %v516_v4 = vld [vmem:[%s5441_s0 + $0x20] sm:$0xff] (%p53_p6)  ;;  %v518_v5 = vld [vmem:[%s5441_s0 + $0x28] sm:$0xff] (%p53_p6)  ;;  %509 = vst [vmem:[%s5449_s1] sm:$0xff] (%p53_p6), %v508_v0 }
  0x39   : > { %511 = vst [vmem:[%s5449_s1 + $0x8] sm:$0xff] %v510_v1  ;;  %513 = vst [vmem:[%s5449_s1 + $0x10] sm:$0xff] %v512_v2  ;;  %v520_v6 = vld [vmem:[%s5441_s0 + $0x30] sm:$0xff]  ;;  %v522_v7 = vld [vmem:[%s5441_s0 + $0x38] sm:$0xff] }
  0x3a   : > { %515 = vst [vmem:[%s5449_s1 + $0x18] sm:$0xff] %v514_v3  ;;  %517 = vst [vmem:[%s5449_s1 + $0x20] sm:$0xff] %v516_v4  ;;  %v524_v8 = vld [vmem:[%s5441_s0 + $0x40] sm:$0xff]  ;;  %v526_v9 = vld [vmem:[%s5441_s0 + $0x48] sm:$0xff] }
  0x3b   : > { %519 = vst [vmem:[%s5449_s1 + $0x28] sm:$0xff] %v518_v5  ;;  %521 = vst [vmem:[%s5449_s1 + $0x30] sm:$0xff] %v520_v6  ;;  %v528_v10 = vld [vmem:[%s5441_s0 + $0x50] sm:$0xff]  ;;  %v530_v11 = vld [vmem:[%s5441_s0 + $0x58] sm:$0xff] }
  0x3c   : > { %523 = vst [vmem:[%s5449_s1 + $0x38] sm:$0xff] %v522_v7  ;;  %525 = vst [vmem:[%s5449_s1 + $0x40] sm:$0xff] %v524_v8  ;;  %v532_v12 = vld [vmem:[%s5441_s0 + $0x60] sm:$0xff]  ;;  %v534_v13 = vld [vmem:[%s5441_s0 + $0x68] sm:$0xff] }
  0x3d   : > { %527 = vst [vmem:[%s5449_s1 + $0x48] sm:$0xff] %v526_v9  ;;  %529 = vst [vmem:[%s5449_s1 + $0x50] sm:$0xff] %v528_v10  ;;  %v536_v14 = vld [vmem:[%s5441_s0 + $0x70] sm:$0xff]  ;;  %v538_v15 = vld [vmem:[%s5441_s0 + $0x78] sm:$0xff] }
  0x3e   : > { %531 = vst [vmem:[%s5449_s1 + $0x58] sm:$0xff] %v530_v11  ;;  %533 = vst [vmem:[%s5449_s1 + $0x60] sm:$0xff] %v532_v12  ;;  %v540_v16 = vld [vmem:[%s5441_s0 + $0x100] sm:$0xff]  ;;  %v542_v17 = vld [vmem:[%s5441_s0 + $0x108] sm:$0xff] }
  0x3f   : > { %535 = vst [vmem:[%s5449_s1 + $0x68] sm:$0xff] %v534_v13  ;;  %537 = vst [vmem:[%s5449_s1 + $0x70] sm:$0xff] %v536_v14  ;;  %v544_v18 = vld [vmem:[%s5441_s0 + $0x110] sm:$0xff]  ;;  %v546_v19 = vld [vmem:[%s5441_s0 + $0x118] sm:$0xff] }
  0x40   : > { %539 = vst [vmem:[%s5449_s1 + $0x78] sm:$0xff] %v538_v15  ;;  %541 = vst [vmem:[%s5449_s1 + $0x80] sm:$0xff] %v540_v16  ;;  %v548_v20 = vld [vmem:[%s5441_s0 + $0x120] sm:$0xff]  ;;  %v550_v21 = vld [vmem:[%s5441_s0 + $0x128] sm:$0xff] }
  0x41   : > { %543 = vst [vmem:[%s5449_s1 + $0x88] sm:$0xff] %v542_v17  ;;  %545 = vst [vmem:[%s5449_s1 + $0x90] sm:$0xff] %v544_v18  ;;  %v552_v22 = vld [vmem:[%s5441_s0 + $0x130] sm:$0xff]  ;;  %v554_v23 = vld [vmem:[%s5441_s0 + $0x138] sm:$0xff] }
  0x42   : > { %547 = vst [vmem:[%s5449_s1 + $0x98] sm:$0xff] %v546_v19  ;;  %549 = vst [vmem:[%s5449_s1 + $0xa0] sm:$0xff] %v548_v20  ;;  %v556_v24 = vld [vmem:[%s5441_s0 + $0x140] sm:$0xff]  ;;  %v558_v25 = vld [vmem:[%s5441_s0 + $0x148] sm:$0xff] }
  0x43   : > { %551 = vst [vmem:[%s5449_s1 + $0xa8] sm:$0xff] %v550_v21  ;;  %553 = vst [vmem:[%s5449_s1 + $0xb0] sm:$0xff] %v552_v22  ;;  %v560_v26 = vld [vmem:[%s5441_s0 + $0x150] sm:$0xff]  ;;  %v562_v27 = vld [vmem:[%s5441_s0 + $0x158] sm:$0xff] }
  0x44   : > { %555 = vst [vmem:[%s5449_s1 + $0xb8] sm:$0xff] %v554_v23  ;;  %557 = vst [vmem:[%s5449_s1 + $0xc0] sm:$0xff] %v556_v24  ;;  %v564_v28 = vld [vmem:[%s5441_s0 + $0x160] sm:$0xff]  ;;  %v566_v29 = vld [vmem:[%s5441_s0 + $0x168] sm:$0xff] }
  0x45   : > { %559 = vst [vmem:[%s5449_s1 + $0xc8] sm:$0xff] %v558_v25  ;;  %561 = vst [vmem:[%s5449_s1 + $0xd0] sm:$0xff] %v560_v26  ;;  %v568_v30 = vld [vmem:[%s5441_s0 + $0x170] sm:$0xff]  ;;  %v570_v31 = vld [vmem:[%s5441_s0 + $0x178] sm:$0xff] }
  0x46   : > { %563 = vst [vmem:[%s5449_s1 + $0xd8] sm:$0xff] %v562_v27  ;;  %565 = vst [vmem:[%s5449_s1 + $0xe0] sm:$0xff] %v564_v28  ;;  %v572_v32 = vld [vmem:[%s5441_s0 + $0x200] sm:$0xff]  ;;  %v574_v33 = vld [vmem:[%s5441_s0 + $0x208] sm:$0xff] }
  0x47   : > { %567 = vst [vmem:[%s5449_s1 + $0xe8] sm:$0xff] %v566_v29  ;;  %569 = vst [vmem:[%s5449_s1 + $0xf0] sm:$0xff] %v568_v30  ;;  %v576_v34 = vld [vmem:[%s5441_s0 + $0x210] sm:$0xff]  ;;  %v578_v35 = vld [vmem:[%s5441_s0 + $0x218] sm:$0xff] }
  0x48   : > { %571 = vst [vmem:[%s5449_s1 + $0xf8] sm:$0xff] %v570_v31  ;;  %573 = vst [vmem:[%s5449_s1 + $0x100] sm:$0xff] %v572_v32  ;;  %v580_v36 = vld [vmem:[%s5441_s0 + $0x220] sm:$0xff]  ;;  %v582_v37 = vld [vmem:[%s5441_s0 + $0x228] sm:$0xff] }
  0x49   : > { %575 = vst [vmem:[%s5449_s1 + $0x108] sm:$0xff] %v574_v33  ;;  %577 = vst [vmem:[%s5449_s1 + $0x110] sm:$0xff] %v576_v34  ;;  %v584_v38 = vld [vmem:[%s5441_s0 + $0x230] sm:$0xff]  ;;  %v586_v39 = vld [vmem:[%s5441_s0 + $0x238] sm:$0xff] }
  0x4a   : > { %579 = vst [vmem:[%s5449_s1 + $0x118] sm:$0xff] %v578_v35  ;;  %581 = vst [vmem:[%s5449_s1 + $0x120] sm:$0xff] %v580_v36  ;;  %v588_v40 = vld [vmem:[%s5441_s0 + $0x240] sm:$0xff]  ;;  %v590_v41 = vld [vmem:[%s5441_s0 + $0x248] sm:$0xff] }
  0x4b   : > { %583 = vst [vmem:[%s5449_s1 + $0x128] sm:$0xff] %v582_v37  ;;  %585 = vst [vmem:[%s5449_s1 + $0x130] sm:$0xff] %v584_v38  ;;  %v592_v42 = vld [vmem:[%s5441_s0 + $0x250] sm:$0xff]  ;;  %v594_v43 = vld [vmem:[%s5441_s0 + $0x258] sm:$0xff] }
  0x4c   : > { %587 = vst [vmem:[%s5449_s1 + $0x138] sm:$0xff] %v586_v39  ;;  %589 = vst [vmem:[%s5449_s1 + $0x140] sm:$0xff] %v588_v40  ;;  %v596_v44 = vld [vmem:[%s5441_s0 + $0x260] sm:$0xff]  ;;  %v598_v45 = vld [vmem:[%s5441_s0 + $0x268] sm:$0xff] }
  0x4d   : > { %591 = vst [vmem:[%s5449_s1 + $0x148] sm:$0xff] %v590_v41  ;;  %593 = vst [vmem:[%s5449_s1 + $0x150] sm:$0xff] %v592_v42  ;;  %v600_v46 = vld [vmem:[%s5441_s0 + $0x270] sm:$0xff]  ;;  %v602_v47 = vld [vmem:[%s5441_s0 + $0x278] sm:$0xff] }
  0x4e   : > { %595 = vst [vmem:[%s5449_s1 + $0x158] sm:$0xff] %v594_v43  ;;  %597 = vst [vmem:[%s5449_s1 + $0x160] sm:$0xff] %v596_v44  ;;  %v604_v48 = vld [vmem:[%s5441_s0 + $0x300] sm:$0xff]  ;;  %v606_v49 = vld [vmem:[%s5441_s0 + $0x308] sm:$0xff] }
  0x4f   : > { %599 = vst [vmem:[%s5449_s1 + $0x168] sm:$0xff] %v598_v45  ;;  %601 = vst [vmem:[%s5449_s1 + $0x170] sm:$0xff] %v600_v46  ;;  %v608_v50 = vld [vmem:[%s5441_s0 + $0x310] sm:$0xff]  ;;  %v610_v51 = vld [vmem:[%s5441_s0 + $0x318] sm:$0xff] }
  0x50   : > { %603 = vst [vmem:[%s5449_s1 + $0x178] sm:$0xff] %v602_v47  ;;  %605 = vst [vmem:[%s5449_s1 + $0x180] sm:$0xff] %v604_v48  ;;  %v612_v52 = vld [vmem:[%s5441_s0 + $0x320] sm:$0xff]  ;;  %v614_v53 = vld [vmem:[%s5441_s0 + $0x328] sm:$0xff] }
  0x51   : > { %607 = vst [vmem:[%s5449_s1 + $0x188] sm:$0xff] %v606_v49  ;;  %609 = vst [vmem:[%s5449_s1 + $0x190] sm:$0xff] %v608_v50  ;;  %v616_v54 = vld [vmem:[%s5441_s0 + $0x330] sm:$0xff]  ;;  %v618_v55 = vld [vmem:[%s5441_s0 + $0x338] sm:$0xff] }
  0x52   : > { %611 = vst [vmem:[%s5449_s1 + $0x198] sm:$0xff] %v610_v51  ;;  %613 = vst [vmem:[%s5449_s1 + $0x1a0] sm:$0xff] %v612_v52  ;;  %v620_v56 = vld [vmem:[%s5441_s0 + $0x340] sm:$0xff]  ;;  %v622_v57 = vld [vmem:[%s5441_s0 + $0x348] sm:$0xff] }
  0x53   : > { %615 = vst [vmem:[%s5449_s1 + $0x1a8] sm:$0xff] %v614_v53  ;;  %617 = vst [vmem:[%s5449_s1 + $0x1b0] sm:$0xff] %v616_v54  ;;  %v624_v58 = vld [vmem:[%s5441_s0 + $0x350] sm:$0xff]  ;;  %v626_v59 = vld [vmem:[%s5441_s0 + $0x358] sm:$0xff] }
  0x54   : > { %619 = vst [vmem:[%s5449_s1 + $0x1b8] sm:$0xff] %v618_v55  ;;  %621 = vst [vmem:[%s5449_s1 + $0x1c0] sm:$0xff] %v620_v56  ;;  %v628_v60 = vld [vmem:[%s5441_s0 + $0x360] sm:$0xff]  ;;  %v630_v61 = vld [vmem:[%s5441_s0 + $0x368] sm:$0xff] }
  0x55   : > { %623 = vst [vmem:[%s5449_s1 + $0x1c8] sm:$0xff] %v622_v57  ;;  %625 = vst [vmem:[%s5449_s1 + $0x1d0] sm:$0xff] %v624_v58  ;;  %v632_v62 = vld [vmem:[%s5441_s0 + $0x370] sm:$0xff]  ;;  %v634_v63 = vld [vmem:[%s5441_s0 + $0x378] sm:$0xff] }
  0x56   : > { %627 = vst [vmem:[%s5449_s1 + $0x1d8] sm:$0xff] %v626_v59  ;;  %629 = vst [vmem:[%s5449_s1 + $0x1e0] sm:$0xff] %v628_v60  ;;  %v636_v0 = vld [vmem:[%s5441_s0 + $0x400] sm:$0xff]  ;;  %v638_v1 = vld [vmem:[%s5441_s0 + $0x408] sm:$0xff] }
  0x57   : > { %631 = vst [vmem:[%s5449_s1 + $0x1e8] sm:$0xff] %v630_v61  ;;  %633 = vst [vmem:[%s5449_s1 + $0x1f0] sm:$0xff] %v632_v62  ;;  %v640_v2 = vld [vmem:[%s5441_s0 + $0x410] sm:$0xff]  ;;  %v642_v3 = vld [vmem:[%s5441_s0 + $0x418] sm:$0xff] }
  0x58   : > { %635 = vst [vmem:[%s5449_s1 + $0x1f8] sm:$0xff] %v634_v63  ;;  %637 = vst [vmem:[%s5449_s1 + $0x200] sm:$0xff] %v636_v0  ;;  %v644_v4 = vld [vmem:[%s5441_s0 + $0x420] sm:$0xff]  ;;  %v646_v5 = vld [vmem:[%s5441_s0 + $0x428] sm:$0xff] }
  0x59   : > { %639 = vst [vmem:[%s5449_s1 + $0x208] sm:$0xff] %v638_v1  ;;  %641 = vst [vmem:[%s5449_s1 + $0x210] sm:$0xff] %v640_v2  ;;  %v648_v6 = vld [vmem:[%s5441_s0 + $0x430] sm:$0xff]  ;;  %v650_v7 = vld [vmem:[%s5441_s0 + $0x438] sm:$0xff] }
  0x5a   : > { %643 = vst [vmem:[%s5449_s1 + $0x218] sm:$0xff] %v642_v3  ;;  %645 = vst [vmem:[%s5449_s1 + $0x220] sm:$0xff] %v644_v4  ;;  %v652_v8 = vld [vmem:[%s5441_s0 + $0x440] sm:$0xff]  ;;  %v654_v9 = vld [vmem:[%s5441_s0 + $0x448] sm:$0xff] }
  0x5b   : > { %647 = vst [vmem:[%s5449_s1 + $0x228] sm:$0xff] %v646_v5  ;;  %649 = vst [vmem:[%s5449_s1 + $0x230] sm:$0xff] %v648_v6  ;;  %v656_v10 = vld [vmem:[%s5441_s0 + $0x450] sm:$0xff]  ;;  %v658_v11 = vld [vmem:[%s5441_s0 + $0x458] sm:$0xff] }
  0x5c   : > { %651 = vst [vmem:[%s5449_s1 + $0x238] sm:$0xff] %v650_v7  ;;  %653 = vst [vmem:[%s5449_s1 + $0x240] sm:$0xff] %v652_v8  ;;  %v660_v12 = vld [vmem:[%s5441_s0 + $0x460] sm:$0xff]  ;;  %v662_v13 = vld [vmem:[%s5441_s0 + $0x468] sm:$0xff] }
  0x5d   : > { %655 = vst [vmem:[%s5449_s1 + $0x248] sm:$0xff] %v654_v9  ;;  %657 = vst [vmem:[%s5449_s1 + $0x250] sm:$0xff] %v656_v10  ;;  %v664_v14 = vld [vmem:[%s5441_s0 + $0x470] sm:$0xff]  ;;  %v666_v15 = vld [vmem:[%s5441_s0 + $0x478] sm:$0xff] }
  0x5e   : > { %659 = vst [vmem:[%s5449_s1 + $0x258] sm:$0xff] %v658_v11  ;;  %661 = vst [vmem:[%s5449_s1 + $0x260] sm:$0xff] %v660_v12  ;;  %v668_v16 = vld [vmem:[%s5441_s0 + $0x500] sm:$0xff]  ;;  %v670_v17 = vld [vmem:[%s5441_s0 + $0x508] sm:$0xff] }
  0x5f   : > { %663 = vst [vmem:[%s5449_s1 + $0x268] sm:$0xff] %v662_v13  ;;  %665 = vst [vmem:[%s5449_s1 + $0x270] sm:$0xff] %v664_v14  ;;  %v672_v18 = vld [vmem:[%s5441_s0 + $0x510] sm:$0xff]  ;;  %v674_v19 = vld [vmem:[%s5441_s0 + $0x518] sm:$0xff] }
  0x60   : > { %667 = vst [vmem:[%s5449_s1 + $0x278] sm:$0xff] %v666_v15  ;;  %669 = vst [vmem:[%s5449_s1 + $0x280] sm:$0xff] %v668_v16  ;;  %v676_v20 = vld [vmem:[%s5441_s0 + $0x520] sm:$0xff]  ;;  %v678_v21 = vld [vmem:[%s5441_s0 + $0x528] sm:$0xff] }
  0x61   : > { %671 = vst [vmem:[%s5449_s1 + $0x288] sm:$0xff] %v670_v17  ;;  %673 = vst [vmem:[%s5449_s1 + $0x290] sm:$0xff] %v672_v18  ;;  %v680_v22 = vld [vmem:[%s5441_s0 + $0x530] sm:$0xff]  ;;  %v682_v23 = vld [vmem:[%s5441_s0 + $0x538] sm:$0xff] }
  0x62   : > { %675 = vst [vmem:[%s5449_s1 + $0x298] sm:$0xff] %v674_v19  ;;  %677 = vst [vmem:[%s5449_s1 + $0x2a0] sm:$0xff] %v676_v20  ;;  %v684_v24 = vld [vmem:[%s5441_s0 + $0x540] sm:$0xff]  ;;  %v686_v25 = vld [vmem:[%s5441_s0 + $0x548] sm:$0xff] }
  0x63   : > { %679 = vst [vmem:[%s5449_s1 + $0x2a8] sm:$0xff] %v678_v21  ;;  %681 = vst [vmem:[%s5449_s1 + $0x2b0] sm:$0xff] %v680_v22  ;;  %v688_v26 = vld [vmem:[%s5441_s0 + $0x550] sm:$0xff]  ;;  %v690_v27 = vld [vmem:[%s5441_s0 + $0x558] sm:$0xff] }
  0x64   : > { %683 = vst [vmem:[%s5449_s1 + $0x2b8] sm:$0xff] %v682_v23  ;;  %685 = vst [vmem:[%s5449_s1 + $0x2c0] sm:$0xff] %v684_v24  ;;  %v692_v28 = vld [vmem:[%s5441_s0 + $0x560] sm:$0xff]  ;;  %v694_v29 = vld [vmem:[%s5441_s0 + $0x568] sm:$0xff] }
  0x65   : > { %687 = vst [vmem:[%s5449_s1 + $0x2c8] sm:$0xff] %v686_v25  ;;  %689 = vst [vmem:[%s5449_s1 + $0x2d0] sm:$0xff] %v688_v26  ;;  %v696_v30 = vld [vmem:[%s5441_s0 + $0x570] sm:$0xff]  ;;  %v698_v31 = vld [vmem:[%s5441_s0 + $0x578] sm:$0xff] }
  0x66   : > { %691 = vst [vmem:[%s5449_s1 + $0x2d8] sm:$0xff] %v690_v27  ;;  %693 = vst [vmem:[%s5449_s1 + $0x2e0] sm:$0xff] %v692_v28  ;;  %v700_v32 = vld [vmem:[%s5441_s0 + $0x600] sm:$0xff]  ;;  %v702_v33 = vld [vmem:[%s5441_s0 + $0x608] sm:$0xff] }
  0x67   : > { %695 = vst [vmem:[%s5449_s1 + $0x2e8] sm:$0xff] %v694_v29  ;;  %697 = vst [vmem:[%s5449_s1 + $0x2f0] sm:$0xff] %v696_v30  ;;  %v704_v34 = vld [vmem:[%s5441_s0 + $0x610] sm:$0xff]  ;;  %v706_v35 = vld [vmem:[%s5441_s0 + $0x618] sm:$0xff] }
  0x68   : > { %699 = vst [vmem:[%s5449_s1 + $0x2f8] sm:$0xff] %v698_v31  ;;  %701 = vst [vmem:[%s5449_s1 + $0x300] sm:$0xff] %v700_v32  ;;  %v708_v36 = vld [vmem:[%s5441_s0 + $0x620] sm:$0xff]  ;;  %v710_v37 = vld [vmem:[%s5441_s0 + $0x628] sm:$0xff] }
  0x69   : > { %703 = vst [vmem:[%s5449_s1 + $0x308] sm:$0xff] %v702_v33  ;;  %705 = vst [vmem:[%s5449_s1 + $0x310] sm:$0xff] %v704_v34  ;;  %v712_v38 = vld [vmem:[%s5441_s0 + $0x630] sm:$0xff]  ;;  %v714_v39 = vld [vmem:[%s5441_s0 + $0x638] sm:$0xff] }
  0x6a   : > { %707 = vst [vmem:[%s5449_s1 + $0x318] sm:$0xff] %v706_v35  ;;  %709 = vst [vmem:[%s5449_s1 + $0x320] sm:$0xff] %v708_v36  ;;  %v716_v40 = vld [vmem:[%s5441_s0 + $0x640] sm:$0xff]  ;;  %v718_v41 = vld [vmem:[%s5441_s0 + $0x648] sm:$0xff] }
  0x6b   : > { %711 = vst [vmem:[%s5449_s1 + $0x328] sm:$0xff] %v710_v37  ;;  %713 = vst [vmem:[%s5449_s1 + $0x330] sm:$0xff] %v712_v38  ;;  %v720_v42 = vld [vmem:[%s5441_s0 + $0x650] sm:$0xff]  ;;  %v722_v43 = vld [vmem:[%s5441_s0 + $0x658] sm:$0xff] }
  0x6c   : > { %715 = vst [vmem:[%s5449_s1 + $0x338] sm:$0xff] %v714_v39  ;;  %717 = vst [vmem:[%s5449_s1 + $0x340] sm:$0xff] %v716_v40  ;;  %v724_v44 = vld [vmem:[%s5441_s0 + $0x660] sm:$0xff]  ;;  %v726_v45 = vld [vmem:[%s5441_s0 + $0x668] sm:$0xff] }
  0x6d   : > { %719 = vst [vmem:[%s5449_s1 + $0x348] sm:$0xff] %v718_v41  ;;  %721 = vst [vmem:[%s5449_s1 + $0x350] sm:$0xff] %v720_v42  ;;  %v728_v46 = vld [vmem:[%s5441_s0 + $0x670] sm:$0xff]  ;;  %v730_v47 = vld [vmem:[%s5441_s0 + $0x678] sm:$0xff] }
  0x6e   : > { %723 = vst [vmem:[%s5449_s1 + $0x358] sm:$0xff] %v722_v43  ;;  %725 = vst [vmem:[%s5449_s1 + $0x360] sm:$0xff] %v724_v44 }
  0x6f   : > { %727 = vst [vmem:[%s5449_s1 + $0x368] sm:$0xff] %v726_v45  ;;  %729 = vst [vmem:[%s5449_s1 + $0x370] sm:$0xff] %v728_v46 }
  0x70   : > { %731 = vst [vmem:[%s5449_s1 + $0x378] sm:$0xff] %v730_v47 }
  0x71 PF: > { %p3985_p11 = scmp.ge.s32.totalorder %s5315_s28, 1  ;;  %p736_p12 = scmp.lt.s32.totalorder %s5315_s28, 3 }
  0x73   : > { %p737_p13 = pnand %p3985_p11, %p736_p12 }
  0x75   : > { %740 = sbr.rel (%p737_p13) target bundleno = 1503 (0x5df), region = 82 }
  0x7a   : > { %v5674_v48 = vld [vmem:[%s6968_s4] sm:$0xf]  ;;  %vm849_vm0 = vcmask 1043456   ;;  %s5677_s24 = sand.u32 1, %s5307_s27   ;;  %vm800_vm1 = vcmask 31744   ;;  %s6202_s0 = sld [smem:[#allocation6]] }
  0x7b   : > { %4714 = vmatprep.subr.msk.mxu0 %vm849_vm0, %v5674_v48  ;;  %5120 = vmatprep.subr.msk.mxu1 %vm849_vm0, %v5674_v48  ;;  %s5123_s25 = smul.u32 896, %s5677_s24  ;;  %s6206_s1 = sld [smem:[#allocation4]] }
  0x7c   : > { %4715 = vmatpush3.msk.msra.mxu0 %vm849_vm0, %v5674_v48  ;;  %5121 = vmatpush3.msk.msra.mxu1 %vm849_vm0, %v5674_v48  ;;  %s2538_s22 = sld [smem:[#allocation5]] }
  0x7d   : > { %4740 = vmatprep.subr.msk.mxu1 %vm849_vm0, %v5674_v48  ;;  %4766 = vmatprep.subr.msk.mxu0 %vm849_vm0, %v5674_v48  ;;  %s5692_s30 = scalar_lea.vmem [#allocation7], %s5123_s25 }
  0x7e   : > { %v778_v49 = vld [vmem:[%s5692_s30] sm:$0xff]  ;;  %v779_v51 = vld [vmem:[%s5692_s30 + $0x8] sm:$0xff]  ;;  %v780_v53 = vld [vmem:[%s5692_s30 + $0x10] sm:$0xff] }
  0x7f   : > { %v786_v50 = vld [vmem:[%s5692_s30 + $0x40] sm:$0xff]  ;;  %4716 = vmatprep.mubr.msk.f32.mxu0 %vm800_vm1, %v778_v49  ;;  %v787_v52 = vld [vmem:[%s5692_s30 + $0x48] sm:$0xff]  ;;  %v788_v54 = vld [vmem:[%s5692_s30 + $0x50] sm:$0xff] }
  0x80   : > { %4728 = vmatprep.mubr.msk.f32.mxu1 %vm800_vm1, %v786_v50  ;;  %4717 = vmatmul.mubr.msk.f32.vlgmr.msra.gmra.mxu0 %vm800_vm1, %v779_v51  ;;  %v781_v55 = vld [vmem:[%s5692_s30 + $0x18] sm:$0xff]  ;;  %v782_v57 = vld [vmem:[%s5692_s30 + $0x20] sm:$0xff]  ;;  %v783_v59 = vld [vmem:[%s5692_s30 + $0x28] sm:$0xff]  ;;  %s4204_s23 = sshll.u32 %s6202_s0, 7 }
  0x81   : > { %4729 = vmatmul.mubr.msk.f32.vlgmr.msra.gmra.mxu1 %vm800_vm1, %v787_v52  ;;  %4767 = vmatpush3.msk.msra.mxu0 %vm849_vm0, %v5674_v48  ;;  %v789_v56 = vld [vmem:[%s5692_s30 + $0x58] sm:$0xff]  ;;  %v790_v58 = vld [vmem:[%s5692_s30 + $0x60] sm:$0xff]  ;;  %v791_v60 = vld [vmem:[%s5692_s30 + $0x68] sm:$0xff]  ;;  %s4205_s25 = sshll.u32 %s6206_s1, 7  ;;  %s6214_s12 = scalar_lea.vmem [#allocation2], %s4204_s23 }
  0x82   : > { %4741 = vmatpush3.msk.msra.mxu1 %vm849_vm0, %v5674_v48  ;;  %4719 = vmatprep.mubr.msk.f32.mxu0 %vm800_vm1, %v780_v53  ;;  %v784_v61 = vld [vmem:[%s5692_s30 + $0x30] sm:$0xff]  ;;  %v785_v63 = vld [vmem:[%s5692_s30 + $0x38] sm:$0xff]  ;;  %v4005_v1 = vld [vmem:[%s5692_s30 + $0x80] sm:$0xff]  ;;  %s6217_s13 = scalar_lea.vmem [#allocation2], %s4205_s25  ;;  %s4208_s25 = sld [smem:[#allocation5 + $0x1]] }
  0x83   : > { %4731 = vmatprep.mubr.msk.f32.mxu1 %vm800_vm1, %v788_v54  ;;  %4792 = vmatprep.subr.msk.mxu1 %vm849_vm0, %v5674_v48  ;;  %v792_v62 = vld [vmem:[%s5692_s30 + $0x70] sm:$0xff]  ;;  %v793_v0 = vld [vmem:[%s5692_s30 + $0x78] sm:$0xff]  ;;  %v4038_v2 = vld [vmem:[%s5692_s30 + $0x100] sm:$0xff]  ;;  %s4213_s1 = sld [smem:[#allocation4 + $0x2]] }
  0x84   : > { %4818 = vmatprep.subr.msk.mxu0 %vm849_vm0, %v5674_v48  ;;  %4720 = vmatmul.mubr.msk.f32.gmra.mxu0 %vm800_vm1, %v781_v55  ;;  %v4006_v3 = vld [vmem:[%s5692_s30 + $0x88] sm:$0xff]  ;;  %v4007_v5 = vld [vmem:[%s5692_s30 + $0x90] sm:$0xff]  ;;  %v4008_v7 = vld [vmem:[%s5692_s30 + $0x98] sm:$0xff] }
  0x85   : > { %4732 = vmatmul.mubr.msk.f32.gmra.mxu1 %vm800_vm1, %v789_v56  ;;  %4722 = vmatprep.mubr.msk.f32.mxu0 %vm800_vm1, %v782_v57  ;;  %v4039_v4 = vld [vmem:[%s5692_s30 + $0x108] sm:$0xff]  ;;  %v4040_v6 = vld [vmem:[%s5692_s30 + $0x110] sm:$0xff]  ;;  %v4041_v8 = vld [vmem:[%s5692_s30 + $0x118] sm:$0xff] }
  0x86   : > { %4734 = vmatprep.mubr.msk.f32.mxu1 %vm800_vm1, %v790_v58  ;;  %v4009_v9 = vld [vmem:[%s5692_s30 + $0xa0] sm:$0xff]  ;;  %v4010_v11 = vld [vmem:[%s5692_s30 + $0xa8] sm:$0xff]  ;;  %v4011_v13 = vld [vmem:[%s5692_s30 + $0xb0] sm:$0xff] }
  0x87   : > { %v4042_v10 = vld [vmem:[%s5692_s30 + $0x120] sm:$0xff]  ;;  %v4043_v12 = vld [vmem:[%s5692_s30 + $0x128] sm:$0xff]  ;;  %v4044_v14 = vld [vmem:[%s5692_s30 + $0x130] sm:$0xff] }
  0x88   : > { %4723 = vmatmul.mubr.msk.f32.gmra.mxu0 %vm800_vm1, %v783_v59  ;;  %v4012_v15 = vld [vmem:[%s5692_s30 + $0xb8] sm:$0xff]  ;;  %v4013_v17 = vld [vmem:[%s5692_s30 + $0xc0] sm:$0xff]  ;;  %v4014_v19 = vld [vmem:[%s5692_s30 + $0xc8] sm:$0xff]  ;;  %s4209_s19 = sshll.u32 %s4208_s25, 7 }
  0x89   : > { %4735 = vmatmul.mubr.msk.f32.gmra.mxu1 %vm800_vm1, %v791_v60  ;;  %4725 = vmatprep.mubr.msk.f32.mxu0 %vm800_vm1, %v784_v61  ;;  %v4045_v16 = vld [vmem:[%s5692_s30 + $0x138] sm:$0xff]  ;;  %v4046_v18 = vld [vmem:[%s5692_s30 + $0x140] sm:$0xff]  ;;  %v4047_v20 = vld [vmem:[%s5692_s30 + $0x148] sm:$0xff]  ;;  %s6612_s0 = scalar_lea.vmem [#allocation2], %s4209_s19 }
  0x8a   : > { %4737 = vmatprep.mubr.msk.f32.mxu1 %vm800_vm1, %v792_v62  ;;  %v4015_v21 = vld [vmem:[%s5692_s30 + $0xd0] sm:$0xff]  ;;  %v4016_v23 = vld [vmem:[%s5692_s30 + $0xd8] sm:$0xff]  ;;  %v4017_v25 = vld [vmem:[%s5692_s30 + $0xe0] sm:$0xff] }
  0x8b   : > { %v4048_v22 = vld [vmem:[%s5692_s30 + $0x150] sm:$0xff]  ;;  %v4049_v24 = vld [vmem:[%s5692_s30 + $0x158] sm:$0xff]  ;;  %v4050_v26 = vld [vmem:[%s5692_s30 + $0x160] sm:$0xff] }
  0x8c   : > { %4726 = vmatmul.mubr.msk.f32.gmra.mxu0 %vm800_vm1, %v785_v63  ;;  %v4018_v27 = vld [vmem:[%s5692_s30 + $0xe8] sm:$0xff]  ;;  %v4019_v29 = vld [vmem:[%s5692_s30 + $0xf0] sm:$0xff]  ;;  %v4020_v31 = vld [vmem:[%s5692_s30 + $0xf8] sm:$0xff] }
  0x8d   : > { %4738 = vmatmul.mubr.msk.f32.gmra.mxu1 %vm800_vm1, %v793_v0  ;;  %4768 = vmatprep.mubr.msk.f32.mxu0 %vm800_vm1, %v4038_v2  ;;  %v4051_v28 = vld [vmem:[%s5692_s30 + $0x168] sm:$0xff]  ;;  %v4052_v30 = vld [vmem:[%s5692_s30 + $0x170] sm:$0xff]  ;;  %v4053_v32 = vld [vmem:[%s5692_s30 + $0x178] sm:$0xff] }
  0x8e   : > { %4742 = vmatprep.mubr.msk.f32.mxu1 %vm800_vm1, %v4005_v1  ;;  %v4071_v33 = vld [vmem:[%s5692_s30 + $0x180] sm:$0xff]  ;;  %v4072_v35 = vld [vmem:[%s5692_s30 + $0x188] sm:$0xff]  ;;  %v4073_v37 = vld [vmem:[%s5692_s30 + $0x190] sm:$0xff] }
  0x8f   : > { %v4104_v34 = vld [vmem:[%s5692_s30 + $0x200] sm:$0xff]  ;;  %v4105_v36 = vld [vmem:[%s5692_s30 + $0x208] sm:$0xff]  ;;  %v4106_v38 = vld [vmem:[%s5692_s30 + $0x210] sm:$0xff] }
  0x90   : > { %4769 = vmatmul.mubr.msk.f32.vlgmr.msra.gmra.mxu0 %vm800_vm1, %v4039_v4  ;;  %v4074_v39 = vld [vmem:[%s5692_s30 + $0x198] sm:$0xff]  ;;  %v4075_v41 = vld [vmem:[%s5692_s30 + $0x1a0] sm:$0xff]  ;;  %v4076_v43 = vld [vmem:[%s5692_s30 + $0x1a8] sm:$0xff] }
  0x91   : > { %4743 = vmatmul.mubr.msk.f32.vlgmr.msra.gmra.mxu1 %vm800_vm1, %v4006_v3  ;;  %4819 = vmatpush3.msk.msra.mxu0 %vm849_vm0, %v5674_v48  ;;  %v4107_v40 = vld [vmem:[%s5692_s30 + $0x218] sm:$0xff]  ;;  %v4108_v42 = vld [vmem:[%s5692_s30 + $0x220] sm:$0xff]  ;;  %v4109_v44 = vld [vmem:[%s5692_s30 + $0x228] sm:$0xff] }
  0x92   : > { %4793 = vmatpush3.msk.msra.mxu1 %vm849_vm0, %v5674_v48  ;;  %4745 = vmatprep.mubr.msk.f32.mxu1 %vm800_vm1, %v4007_v5  ;;  %v4077_v45 = vld [vmem:[%s5692_s30 + $0x1b0] sm:$0xff]  ;;  %v4078_v47 = vld [vmem:[%s5692_s30 + $0x1b8] sm:$0xff]  ;;  %v4079_v49 = vld [vmem:[%s5692_s30 + $0x1c0] sm:$0xff] }
  0x93   : > { %4771 = vmatprep.mubr.msk.f32.mxu0 %vm800_vm1, %v4040_v6  ;;  %4844 = vmatprep.subr.msk.mxu1 %vm849_vm0, %v5674_v48  ;;  %v4110_v46 = vld [vmem:[%s5692_s30 + $0x230] sm:$0xff]  ;;  %v4112_v50 = vld [vmem:[%s5692_s30 + $0x240] sm:$0xff]  ;;  %v4080_v51 = vld [vmem:[%s5692_s30 + $0x1c8] sm:$0xff] }
  0x94   : > { %4870 = vmatprep.subr.msk.mxu0 %vm849_vm0, %v5674_v48  ;;  %4772 = vmatmul.mubr.msk.f32.gmra.mxu0 %vm800_vm1, %v4041_v8  ;;  %v4113_v52 = vld [vmem:[%s5692_s30 + $0x248] sm:$0xff]  ;;  %v4081_v53 = vld [vmem:[%s5692_s30 + $0x1d0] sm:$0xff]  ;;  %v4082_v55 = vld [vmem:[%s5692_s30 + $0x1d8] sm:$0xff] }
  0x95   : > { %4746 = vmatmul.mubr.msk.f32.gmra.mxu1 %vm800_vm1, %v4008_v7  ;;  %4774 = vmatprep.mubr.msk.f32.mxu0 %vm800_vm1, %v4042_v10  ;;  %v4114_v54 = vld [vmem:[%s5692_s30 + $0x250] sm:$0xff]  ;;  %v4115_v56 = vld [vmem:[%s5692_s30 + $0x258] sm:$0xff]  ;;  %v4083_v57 = vld [vmem:[%s5692_s30 + $0x1e0] sm:$0xff] }
  0x96   : > { %4748 = vmatprep.mubr.msk.f32.mxu1 %vm800_vm1, %v4009_v9  ;;  %v4116_v58 = vld [vmem:[%s5692_s30 + $0x260] sm:$0xff]  ;;  %v4084_v59 = vld [vmem:[%s5692_s30 + $0x1e8] sm:$0xff]  ;;  %v4085_v61 = vld [vmem:[%s5692_s30 + $0x1f0] sm:$0xff] }
  0x97   : > { %v4117_v60 = vld [vmem:[%s5692_s30 + $0x268] sm:$0xff]  ;;  %v4118_v62 = vld [vmem:[%s5692_s30 + $0x270] sm:$0xff]  ;;  %v4086_v63 = vld [vmem:[%s5692_s30 + $0x1f8] sm:$0xff] }
  0x98   : > { %4775 = vmatmul.mubr.msk.f32.gmra.mxu0 %vm800_vm1, %v4043_v12  ;;  %v4119_v0 = vld [vmem:[%s5692_s30 + $0x278] sm:$0xff]  ;;  %v4137_v1 = vld [vmem:[%s5692_s30 + $0x280] sm:$0xff]  ;;  %v4138_v3 = vld [vmem:[%s5692_s30 + $0x288] sm:$0xff] }
  0x99   : > { %4749 = vmatmul.mubr.msk.f32.gmra.mxu1 %vm800_vm1, %v4010_v11  ;;  %4777 = vmatprep.mubr.msk.f32.mxu0 %vm800_vm1, %v4044_v14  ;;  %v4170_v2 = vld [vmem:[%s5692_s30 + $0x300] sm:$0xff]  ;;  %v4171_v4 = vld [vmem:[%s5692_s30 + $0x308] sm:$0xff]  ;;  %v4139_v5 = vld [vmem:[%s5692_s30 + $0x290] sm:$0xff] }
  0x9a   : > { %4751 = vmatprep.mubr.msk.f32.mxu1 %vm800_vm1, %v4011_v13  ;;  %v4172_v6 = vld [vmem:[%s5692_s30 + $0x310] sm:$0xff]  ;;  %v4140_v7 = vld [vmem:[%s5692_s30 + $0x298] sm:$0xff]  ;;  %v4141_v9 = vld [vmem:[%s5692_s30 + $0x2a0] sm:$0xff] }
  0x9b   : > { %v4173_v8 = vld [vmem:[%s5692_s30 + $0x318] sm:$0xff]  ;;  %v4174_v10 = vld [vmem:[%s5692_s30 + $0x320] sm:$0xff]  ;;  %v4142_v11 = vld [vmem:[%s5692_s30 + $0x2a8] sm:$0xff] }
  0x9c   : > { %4778 = vmatmul.mubr.msk.f32.gmra.mxu0 %vm800_vm1, %v4045_v16  ;;  %v4175_v12 = vld [vmem:[%s5692_s30 + $0x328] sm:$0xff]  ;;  %v4143_v13 = vld [vmem:[%s5692_s30 + $0x2b0] sm:$0xff]  ;;  %v4177_v16 = vld [vmem:[%s5692_s30 + $0x338] sm:$0xff] }
  0x9d   : > { %4752 = vmatmul.mubr.msk.f32.gmra.mxu1 %vm800_vm1, %v4012_v15  ;;  %4780 = vmatprep.mubr.msk.f32.mxu0 %vm800_vm1, %v4046_v18  ;;  %v4176_v14 = vld [vmem:[%s5692_s30 + $0x330] sm:$0xff]  ;;  %v4144_v15 = vld [vmem:[%s5692_s30 + $0x2b8] sm:$0xff]  ;;  %v4178_v18 = vld [vmem:[%s5692_s30 + $0x340] sm:$0xff] }
  0x9e   : > { %4754 = vmatprep.mubr.msk.f32.mxu1 %vm800_vm1, %v4013_v17  ;;  %v4145_v17 = vld [vmem:[%s5692_s30 + $0x2c0] sm:$0xff] }
  0xa0   : > { %4781 = vmatmul.mubr.msk.f32.gmra.mxu0 %vm800_vm1, %v4047_v20  ;;  %v4179_v20 = vld [vmem:[%s5692_s30 + $0x348] sm:$0xff] }
  0xa1   : > { %4755 = vmatmul.mubr.msk.f32.gmra.mxu1 %vm800_vm1, %v4014_v19  ;;  %4783 = vmatprep.mubr.msk.f32.mxu0 %vm800_vm1, %v4048_v22  ;;  %v4146_v19 = vld [vmem:[%s5692_s30 + $0x2c8] sm:$0xff]  ;;  %v4180_v22 = vld [vmem:[%s5692_s30 + $0x350] sm:$0xff] }
  0xa2   : > { %4757 = vmatprep.mubr.msk.f32.mxu1 %vm800_vm1, %v4015_v21  ;;  %v4147_v21 = vld [vmem:[%s5692_s30 + $0x2d0] sm:$0xff] }
  0xa4   : > { %4784 = vmatmul.mubr.msk.f32.gmra.mxu0 %vm800_vm1, %v4049_v24  ;;  %v4181_v24 = vld [vmem:[%s5692_s30 + $0x358] sm:$0xff] }
  0xa5   : > { %4758 = vmatmul.mubr.msk.f32.gmra.mxu1 %vm800_vm1, %v4016_v23  ;;  %4786 = vmatprep.mubr.msk.f32.mxu0 %vm800_vm1, %v4050_v26  ;;  %v4148_v23 = vld [vmem:[%s5692_s30 + $0x2d8] sm:$0xff]  ;;  %v4182_v26 = vld [vmem:[%s5692_s30 + $0x360] sm:$0xff] }
  0xa6   : > { %4760 = vmatprep.mubr.msk.f32.mxu1 %vm800_vm1, %v4017_v25  ;;  %v4149_v25 = vld [vmem:[%s5692_s30 + $0x2e0] sm:$0xff] }
  0xa8   : > { %4787 = vmatmul.mubr.msk.f32.gmra.mxu0 %vm800_vm1, %v4051_v28  ;;  %v4183_v28 = vld [vmem:[%s5692_s30 + $0x368] sm:$0xff] }
  0xa9   : > { %4761 = vmatmul.mubr.msk.f32.gmra.mxu1 %vm800_vm1, %v4018_v27  ;;  %4789 = vmatprep.mubr.msk.f32.mxu0 %vm800_vm1, %v4052_v30  ;;  %v4150_v27 = vld [vmem:[%s5692_s30 + $0x2e8] sm:$0xff]  ;;  %v4184_v30 = vld [vmem:[%s5692_s30 + $0x370] sm:$0xff] }
  0xaa   : > { %4763 = vmatprep.mubr.msk.f32.mxu1 %vm800_vm1, %v4019_v29  ;;  %v4151_v29 = vld [vmem:[%s5692_s30 + $0x2f0] sm:$0xff] }
  0xac   : > { %4790 = vmatmul.mubr.msk.f32.gmra.mxu0 %vm800_vm1, %v4053_v32  ;;  %v4185_v32 = vld [vmem:[%s5692_s30 + $0x378] sm:$0xff] }
  0xad   : > { %4764 = vmatmul.mubr.msk.f32.gmra.mxu1 %vm800_vm1, %v4020_v31  ;;  %4820 = vmatprep.mubr.msk.f32.mxu0 %vm800_vm1, %v4104_v34  ;;  %v4152_v31 = vld [vmem:[%s5692_s30 + $0x2f8] sm:$0xff] }
  0xae   : > { %4794 = vmatprep.mubr.msk.f32.mxu1 %vm800_vm1, %v4071_v33  ;;  %v5941_v33 = vld [vmem:[%s6970_s6 + $0xf8] sm:$0xff] }
  0xaf   : > { %v5946_v34 = vld [vmem:[%s6970_s6 + $0x178] sm:$0xff] }
  0xb0   : > { %4821 = vmatmul.mubr.msk.f32.vlgmr.msra.gmra.mxu0 %vm800_vm1, %v4105_v36  ;;  %v2518_v36 = vld [vmem:[%s6970_s6 + $0xf0] sm:$0xff] }
  0xb1   : > { %4795 = vmatmul.mubr.msk.f32.vlgmr.msra.gmra.mxu1 %vm800_vm1, %v4072_v35  ;;  %4871 = vmatpush3.msk.msra.mxu0 %vm849_vm0, %v5674_v48  ;;  %v2503_v35 = vld [vmem:[%s6970_s6 + $0x78] sm:$0xff] }
  0xb2   : > { %4845 = vmatpush3.msk.msra.mxu1 %vm849_vm0, %v5674_v48  ;;  %4797 = vmatprep.mubr.msk.f32.mxu1 %vm800_vm1, %v4073_v37  ;;  %v4111_v48 = vld [vmem:[%s5692_s30 + $0x238] sm:$0xff]  ;;  %v2534_v37 = vld [vmem:[%s6970_s6 + $0x170] sm:$0xff]  ;;  %s4203_s30 = sshll.u32 %s2538_s22, 7  ;;  %s4214_s22 = sld [smem:[#allocation5 + $0x2]] }
  0xb3   : > { %4823 = vmatprep.mubr.msk.f32.mxu0 %vm800_vm1, %v4106_v38  ;;  %4346 = vmatprep.subr.mxu1 %v5941_v33  ;;  %v2502_v38 = vld [vmem:[%s6970_s6 + $0x70] sm:$0xff]  ;;  %s6220_s17 = scalar_lea.vmem [#allocation2], %s4203_s30 }
  0xb4   : > { %4824 = vmatmul.mubr.msk.f32.gmra.mxu0 %vm800_vm1, %v4107_v40  ;;  %4896 = vmatprep.subr.mxu0 %v5946_v34  ;;  %v2533_v40 = vld [vmem:[%s6970_s6 + $0x168] sm:$0xff] }
  0xb5   : > { %4798 = vmatmul.mubr.msk.f32.gmra.mxu1 %vm800_vm1, %v4074_v39  ;;  %4826 = vmatprep.mubr.msk.f32.mxu0 %vm800_vm1, %v4108_v42  ;;  %v2517_v39 = vld [vmem:[%s6970_s6 + $0xe8] sm:$0xff]  ;;  %v2516_v42 = vld [vmem:[%s6970_s6 + $0xe0] sm:$0xff] }
  0xb6   : > { %4800 = vmatprep.mubr.msk.f32.mxu1 %vm800_vm1, %v4075_v41  ;;  %v2501_v41 = vld [vmem:[%s6970_s6 + $0x68] sm:$0xff] }
  0xb8   : > { %4827 = vmatmul.mubr.msk.f32.gmra.mxu0 %vm800_vm1, %v4109_v44  ;;  %v2500_v44 = vld [vmem:[%s6970_s6 + $0x60] sm:$0xff] }
  0xb9   : > { %4801 = vmatmul.mubr.msk.f32.gmra.mxu1 %vm800_vm1, %v4076_v43  ;;  %4829 = vmatprep.mubr.msk.f32.mxu0 %vm800_vm1, %v4110_v46  ;;  %v2532_v43 = vld [vmem:[%s6970_s6 + $0x160] sm:$0xff]  ;;  %v2531_v46 = vld [vmem:[%s6970_s6 + $0x158] sm:$0xff] }
  0xba   : > { %4803 = vmatprep.mubr.msk.f32.mxu1 %vm800_vm1, %v4077_v45  ;;  %v2515_v45 = vld [vmem:[%s6970_s6 + $0xd8] sm:$0xff] }
  0xbc   : > { %4830 = vmatmul.mubr.msk.f32.gmra.mxu0 %vm800_vm1, %v4111_v48  ;;  %v2514_v48 = vld [vmem:[%s6970_s6 + $0xd0] sm:$0xff] }
  0xbd   : > { %4804 = vmatmul.mubr.msk.f32.gmra.mxu1 %vm800_vm1, %v4078_v47  ;;  %4832 = vmatprep.mubr.msk.f32.mxu0 %vm800_vm1, %v4112_v50  ;;  %v2499_v47 = vld [vmem:[%s6970_s6 + $0x58] sm:$0xff]  ;;  %v2498_v50 = vld [vmem:[%s6970_s6 + $0x50] sm:$0xff] }
  0xbe   : > { %4806 = vmatprep.mubr.msk.f32.mxu1 %vm800_vm1, %v4079_v49  ;;  %v2530_v49 = vld [vmem:[%s6970_s6 + $0x150] sm:$0xff] }
  0xc0   : > { %4833 = vmatmul.mubr.msk.f32.gmra.mxu0 %vm800_vm1, %v4113_v52  ;;  %v2529_v52 = vld [vmem:[%s6970_s6 + $0x148] sm:$0xff] }
  0xc1   : > { %4807 = vmatmul.mubr.msk.f32.gmra.mxu1 %vm800_vm1, %v4080_v51  ;;  %4835 = vmatprep.mubr.msk.f32.mxu0 %vm800_vm1, %v4114_v54  ;;  %v2513_v51 = vld [vmem:[%s6970_s6 + $0xc8] sm:$0xff]  ;;  %v2512_v54 = vld [vmem:[%s6970_s6 + $0xc0] sm:$0xff] }
  0xc2   : > { %4809 = vmatprep.mubr.msk.f32.mxu1 %vm800_vm1, %v4081_v53  ;;  %v2497_v53 = vld [vmem:[%s6970_s6 + $0x48] sm:$0xff] }
  0xc4   : > { %4836 = vmatmul.mubr.msk.f32.gmra.mxu0 %vm800_vm1, %v4115_v56  ;;  %v2496_v56 = vld [vmem:[%s6970_s6 + $0x40] sm:$0xff] }
  0xc5   : > { %4810 = vmatmul.mubr.msk.f32.gmra.mxu1 %vm800_vm1, %v4082_v55  ;;  %4838 = vmatprep.mubr.msk.f32.mxu0 %vm800_vm1, %v4116_v58  ;;  %v2528_v55 = vld [vmem:[%s6970_s6 + $0x140] sm:$0xff]  ;;  %v2527_v58 = vld [vmem:[%s6970_s6 + $0x138] sm:$0xff] }
  0xc6   : > { %4812 = vmatprep.mubr.msk.f32.mxu1 %vm800_vm1, %v4083_v57  ;;  %v2511_v57 = vld [vmem:[%s6970_s6 + $0xb8] sm:$0xff] }
  0xc8   : > { %4839 = vmatmul.mubr.msk.f32.gmra.mxu0 %vm800_vm1, %v4117_v60  ;;  %v2510_v60 = vld [vmem:[%s6970_s6 + $0xb0] sm:$0xff] }
  0xc9   : > { %4813 = vmatmul.mubr.msk.f32.gmra.mxu1 %vm800_vm1, %v4084_v59  ;;  %4841 = vmatprep.mubr.msk.f32.mxu0 %vm800_vm1, %v4118_v62  ;;  %v2495_v59 = vld [vmem:[%s6970_s6 + $0x38] sm:$0xff]  ;;  %v2494_v62 = vld [vmem:[%s6970_s6 + $0x30] sm:$0xff] }
  0xca   : > { %4815 = vmatprep.mubr.msk.f32.mxu1 %vm800_vm1, %v4085_v61  ;;  %v2526_v61 = vld [vmem:[%s6970_s6 + $0x130] sm:$0xff] }
  0xcc   : > { %4842 = vmatmul.mubr.msk.f32.gmra.mxu0 %vm800_vm1, %v4119_v0  ;;  %v2525_v0 = vld [vmem:[%s6970_s6 + $0x128] sm:$0xff] }
  0xcd   : > { %4816 = vmatmul.mubr.msk.f32.gmra.mxu1 %vm800_vm1, %v4086_v63  ;;  %4872 = vmatprep.mubr.msk.f32.mxu0 %vm800_vm1, %v4170_v2  ;;  %v2509_v63 = vld [vmem:[%s6970_s6 + $0xa8] sm:$0xff]  ;;  %v2508_v2 = vld [vmem:[%s6970_s6 + $0xa0] sm:$0xff] }
  0xce   : > { %4846 = vmatprep.mubr.msk.f32.mxu1 %vm800_vm1, %v4137_v1  ;;  %v2493_v1 = vld [vmem:[%s6970_s6 + $0x28] sm:$0xff] }
  0xd0   : > { %4873 = vmatmul.mubr.msk.f32.vlgmr.msra.gmra.mxu0 %vm800_vm1, %v4171_v4  ;;  %v2492_v4 = vld [vmem:[%s6970_s6 + $0x20] sm:$0xff] }
  0xd1   : > { %4847 = vmatmul.mubr.msk.f32.vlgmr.msra.gmra.mxu1 %vm800_vm1, %v4138_v3  ;;  %4875 = vmatprep.mubr.msk.f32.mxu0 %vm800_vm1, %v4172_v6  ;;  %v2524_v3 = vld [vmem:[%s6970_s6 + $0x120] sm:$0xff]  ;;  %v2491_v6 = vld [vmem:[%s6970_s6 + $0x18] sm:$0xff] }
  0xd2   : > { %4849 = vmatprep.mubr.msk.f32.mxu1 %vm800_vm1, %v4139_v5  ;;  %4347 = vmatpush3.msra.mxu1 %v2503_v35  ;;  %v2507_v5 = vld [vmem:[%s6970_s6 + $0x98] sm:$0xff] }
  0xd3   : > { %4897 = vmatpush3.msra.mxu0 %v5946_v34  ;;  %4348 = vmatprep.subr.mxu1 %v2518_v36 }
  0xd4   : > { %4876 = vmatmul.mubr.msk.f32.gmra.mxu0 %vm800_vm1, %v4173_v8  ;;  %4898 = vmatprep.subr.mxu0 %v2534_v37  ;;  %v2506_v8 = vld [vmem:[%s6970_s6 + $0x90] sm:$0xff] }
  0xd5   : > { %4850 = vmatmul.mubr.msk.f32.gmra.mxu1 %vm800_vm1, %v4140_v7  ;;  %4878 = vmatprep.mubr.msk.f32.mxu0 %vm800_vm1, %v4174_v10  ;;  %v2523_v7 = vld [vmem:[%s6970_s6 + $0x118] sm:$0xff]  ;;  %v2522_v10 = vld [vmem:[%s6970_s6 + $0x110] sm:$0xff] }
  0xd6   : > { %4852 = vmatprep.mubr.msk.f32.mxu1 %vm800_vm1, %v4141_v9  ;;  %4349 = vmatpush3.msra.mxu1 %v2502_v38  ;;  %v2490_v9 = vld [vmem:[%s6970_s6 + $0x10] sm:$0xff] }
  0xd7   : > { %4899 = vmatpush3.msra.mxu0 %v2534_v37  ;;  %4350 = vmatprep.subr.mxu1 %v2517_v39 }
  0xd8   : > { %4879 = vmatmul.mubr.msk.f32.gmra.mxu0 %vm800_vm1, %v4175_v12  ;;  %4900 = vmatprep.subr.mxu0 %v2533_v40  ;;  %v2521_v12 = vld [vmem:[%s6970_s6 + $0x108] sm:$0xff] }
  0xd9   : > { %4853 = vmatmul.mubr.msk.f32.gmra.mxu1 %vm800_vm1, %v4142_v11  ;;  %4881 = vmatprep.mubr.msk.f32.mxu0 %vm800_vm1, %v4176_v14  ;;  %v2505_v11 = vld [vmem:[%s6970_s6 + $0x88] sm:$0xff]  ;;  %v2504_v14 = vld [vmem:[%s6970_s6 + $0x80] sm:$0xff] }
  0xda   : > { %4855 = vmatprep.mubr.msk.f32.mxu1 %vm800_vm1, %v4143_v13  ;;  %4351 = vmatpush3.msra.mxu1 %v2501_v41  ;;  %v2489_v13 = vld [vmem:[%s6970_s6 + $0x8] sm:$0xff] }
  0xdb   : > { %4901 = vmatpush3.msra.mxu0 %v2533_v40  ;;  %4352 = vmatprep.subr.mxu1 %v2516_v42 }
  0xdc   : > { %4882 = vmatmul.mubr.msk.f32.gmra.mxu0 %vm800_vm1, %v4177_v16  ;;  %4902 = vmatprep.subr.mxu0 %v2532_v43  ;;  %v2488_v16 = vld [vmem:[%s6970_s6] sm:$0xff] }
  0xdd   : > { %4856 = vmatmul.mubr.msk.f32.gmra.mxu1 %vm800_vm1, %v4144_v15  ;;  %4884 = vmatprep.mubr.msk.f32.mxu0 %vm800_vm1, %v4178_v18  ;;  %v2520_v15 = vld [vmem:[%s6970_s6 + $0x100] sm:$0xff] }
  0xde   : > { %4858 = vmatprep.mubr.msk.f32.mxu1 %vm800_vm1, %v4145_v17  ;;  %4353 = vmatpush3.msra.mxu1 %v2500_v44  ;;  %v6094_v17 = vld [vmem:[%s6969_s5] ss:$0 sm:$0xff] }
  0xdf   : > { %4903 = vmatpush3.msra.mxu0 %v2532_v43  ;;  %4354 = vmatprep.subr.mxu1 %v2515_v45 }
  0xe0   : > { %4885 = vmatmul.mubr.msk.f32.gmra.mxu0 %vm800_vm1, %v4179_v20  ;;  %4904 = vmatprep.subr.mxu0 %v2531_v46 }
  0xe1   : > { %4859 = vmatmul.mubr.msk.f32.gmra.mxu1 %vm800_vm1, %v4146_v19  ;;  %4887 = vmatprep.mubr.msk.f32.mxu0 %vm800_vm1, %v4180_v22 }
  0xe2   : > { %4861 = vmatprep.mubr.msk.f32.mxu1 %vm800_vm1, %v4147_v21  ;;  %4355 = vmatpush3.msra.mxu1 %v2499_v47 }
  0xe3   : > { %4905 = vmatpush3.msra.mxu0 %v2531_v46  ;;  %4356 = vmatprep.subr.mxu1 %v2514_v48 }
  0xe4   : > { %4888 = vmatmul.mubr.msk.f32.gmra.mxu0 %vm800_vm1, %v4181_v24  ;;  %4906 = vmatprep.subr.mxu0 %v2530_v49 }
  0xe5   : > { %4862 = vmatmul.mubr.msk.f32.gmra.mxu1 %vm800_vm1, %v4148_v23  ;;  %4890 = vmatprep.mubr.msk.f32.mxu0 %vm800_vm1, %v4182_v26 }
  0xe6   : > { %4864 = vmatprep.mubr.msk.f32.mxu1 %vm800_vm1, %v4149_v25  ;;  %4357 = vmatpush3.msra.mxu1 %v2498_v50 }
  0xe7   : > { %4907 = vmatpush3.msra.mxu0 %v2530_v49  ;;  %4358 = vmatprep.subr.mxu1 %v2513_v51 }
  0xe8   : > { %4891 = vmatmul.mubr.msk.f32.gmra.mxu0 %vm800_vm1, %v4183_v28  ;;  %4908 = vmatprep.subr.mxu0 %v2529_v52 }
  0xe9   : > { %4865 = vmatmul.mubr.msk.f32.gmra.mxu1 %vm800_vm1, %v4150_v27  ;;  %4893 = vmatprep.mubr.msk.f32.mxu0 %vm800_vm1, %v4184_v30 }
  0xea   : > { %4867 = vmatprep.mubr.msk.f32.mxu1 %vm800_vm1, %v4151_v29  ;;  %4359 = vmatpush3.msra.mxu1 %v2497_v53 }
  0xeb   : > { %4909 = vmatpush3.msra.mxu0 %v2529_v52  ;;  %4360 = vmatprep.subr.mxu1 %v2512_v54 }
  0xec   : > { %4894 = vmatmul.mubr.msk.f32.gmra.mxu0 %vm800_vm1, %v4185_v32  ;;  %4910 = vmatprep.subr.mxu0 %v2528_v55 }
  0xed   : > { %4868 = vmatmul.mubr.msk.f32.gmra.mxu1 %vm800_vm1, %v4152_v31  ;;  %4911 = vmatpush3.msra.mxu0 %v2528_v55 }
  0xee   : > { %4361 = vmatpush3.msra.mxu1 %v2496_v56  ;;  %4912 = vmatprep.subr.mxu0 %v2527_v58 }
  0xef   : > { %4362 = vmatprep.subr.mxu1 %v2511_v57  ;;  %4913 = vmatpush3.msra.mxu0 %v2527_v58 }
  0xf0   : > { %4363 = vmatpush3.msra.mxu1 %v2495_v59  ;;  %4914 = vmatprep.subr.mxu0 %v2526_v61 }
  0xf1   : > { %4364 = vmatprep.subr.mxu1 %v2510_v60  ;;  %4915 = vmatpush3.msra.mxu0 %v2526_v61 }
  0xf2   : > { %4365 = vmatpush3.msra.mxu1 %v2494_v62  ;;  %4916 = vmatprep.subr.mxu0 %v2525_v0 }
  0xf3   : > { %4366 = vmatprep.subr.mxu1 %v2509_v63  ;;  %4917 = vmatpush3.msra.mxu0 %v2525_v0 }
  0xf4   : > { %4367 = vmatpush3.msra.mxu1 %v2493_v1  ;;  %4918 = vmatprep.subr.mxu0 %v2524_v3 }
  0xf5   : > { %4368 = vmatprep.subr.mxu1 %v2508_v2  ;;  %4919 = vmatpush3.msra.mxu0 %v2524_v3 }
  0xf6   : > { %4369 = vmatpush3.msra.mxu1 %v2492_v4  ;;  %4920 = vmatprep.subr.mxu0 %v2523_v7 }
  0xf7   : > { %4370 = vmatprep.subr.mxu1 %v2507_v5  ;;  %4921 = vmatpush3.msra.mxu0 %v2523_v7 }
  0xf8   : > { %4371 = vmatpush3.msra.mxu1 %v2491_v6  ;;  %4922 = vmatprep.subr.mxu0 %v2522_v10 }
  0xf9   : > { %4372 = vmatprep.subr.mxu1 %v2506_v8  ;;  %4923 = vmatpush3.msra.mxu0 %v2522_v10 }
  0xfa   : > { %4373 = vmatpush3.msra.mxu1 %v2490_v9  ;;  %4924 = vmatprep.subr.mxu0 %v2521_v12 }
  0xfb   : > { %4374 = vmatprep.subr.mxu1 %v2505_v11  ;;  %4925 = vmatpush3.msra.mxu0 %v2521_v12 }
  0xfc   : > { %4375 = vmatpush3.msra.mxu1 %v2489_v13  ;;  %4926 = vmatprep.subr.mxu0 %v2520_v15 }
  0xfd   : > { %4376 = vmatprep.subr.mxu1 %v2504_v14  ;;  %4927 = vmatpush3.msra.mxu0 %v2520_v15 }
  0xfe   : > { %4377 = vmatpush3.msra.mxu1 %v2488_v16  ;;  %4458 = vmatprep.subr.mxu0 %v5941_v33 }
  0xff   : > { %4952 = vmatprep.subr.mxu1 %v5946_v34 }
 0x140   : > { %v4718_v18 = vpop.f32.mrf.mxu0 }
 0x141   : > { %v4730_v19 = vpop.f32.mrf.mxu1  ;;  %v925_v20 = vadd.f32 %v4718_v18, %v6094_v17 }
 0x142   : > { %v965_v21 = vadd.f32 %v4730_v19, %v6094_v17  ;;  %v919_v22 = vpop.f32.mrf.mxu0 }
 0x143   : > { %v959_v23 = vpop.f32.mrf.mxu1  ;;  %v999_v24 = vmax.f32 %v925_v20, 0.0  ;;  %v920_v26 = vadd.f32 %v6094_v17, %v919_v22 }
 0x144   : > { %v1007_v25 = vmax.f32 %v965_v21, 0.0  ;;  %v960_v27 = vadd.f32 %v6094_v17, %v959_v23  ;;  %v4721_v28 = vpop.f32.mrf.mxu0 }
 0x145   : > { %v4733_v29 = vpop.f32.mrf.mxu1  ;;  %1015 = vst [vmem:[#allocation2 + $0x8] sm:$0xff] %v999_v24  ;;  %v998_v30 = vmax.f32 %v920_v26, 0.0  ;;  %v935_v32 = vadd.f32 %v4721_v28, %v6094_v17 }
 0x146   : > { %1023 = vst [vmem:[#allocation2 + $0x48] sm:$0xff] %v1007_v25  ;;  %v1006_v31 = vmax.f32 %v960_v27, 0.0  ;;  %v975_v33 = vadd.f32 %v4733_v29, %v6094_v17  ;;  %v929_v34 = vpop.f32.mrf.mxu0 }
 0x147   : > { %v969_v35 = vpop.f32.mrf.mxu1  ;;  %1014 = vst [vmem:[#allocation2] sm:$0xff] %v998_v30  ;;  %v1001_v36 = vmax.f32 %v935_v32, 0.0  ;;  %v930_v38 = vadd.f32 %v6094_v17, %v929_v34 }
 0x148   : > { %1022 = vst [vmem:[#allocation2 + $0x40] sm:$0xff] %v1006_v31  ;;  %v1009_v37 = vmax.f32 %v975_v33, 0.0  ;;  %v970_v39 = vadd.f32 %v6094_v17, %v969_v35  ;;  %v4724_v40 = vpop.f32.mrf.mxu0 }
 0x149   : > { %v4736_v41 = vpop.f32.mrf.mxu1  ;;  %1017 = vst [vmem:[#allocation2 + $0x18] sm:$0xff] %v1001_v36  ;;  %v1000_v42 = vmax.f32 %v930_v38, 0.0  ;;  %v945_v44 = vadd.f32 %v4724_v40, %v6094_v17 }
 0x14a   : > { %1025 = vst [vmem:[#allocation2 + $0x58] sm:$0xff] %v1009_v37  ;;  %v1008_v43 = vmax.f32 %v970_v39, 0.0  ;;  %v985_v45 = vadd.f32 %v4736_v41, %v6094_v17  ;;  %v939_v46 = vpop.f32.mrf.mxu0 }
 0x14b   : > { %v979_v47 = vpop.f32.mrf.mxu1  ;;  %1016 = vst [vmem:[#allocation2 + $0x10] sm:$0xff] %v1000_v42  ;;  %v1003_v48 = vmax.f32 %v945_v44, 0.0  ;;  %v940_v50 = vadd.f32 %v6094_v17, %v939_v46 }
 0x14c   : > { %1024 = vst [vmem:[#allocation2 + $0x50] sm:$0xff] %v1008_v43  ;;  %v1011_v49 = vmax.f32 %v985_v45, 0.0  ;;  %v980_v51 = vadd.f32 %v6094_v17, %v979_v47  ;;  %v4727_v52 = vpop.f32.mrf.mxu0 }
 0x14d   : > { %v4739_v53 = vpop.f32.mrf.mxu1  ;;  %1019 = vst [vmem:[#allocation2 + $0x28] sm:$0xff] %v1003_v48  ;;  %v1002_v54 = vmax.f32 %v940_v50, 0.0  ;;  %v955_v56 = vadd.f32 %v4727_v52, %v6094_v17 }
 0x14e   : > { %1027 = vst [vmem:[#allocation2 + $0x68] sm:$0xff] %v1011_v49  ;;  %v1010_v55 = vmax.f32 %v980_v51, 0.0  ;;  %v995_v57 = vadd.f32 %v4739_v53, %v6094_v17  ;;  %v949_v58 = vpop.f32.mrf.mxu0 }
 0x14f   : > { %v989_v59 = vpop.f32.mrf.mxu1  ;;  %1018 = vst [vmem:[#allocation2 + $0x20] sm:$0xff] %v1002_v54  ;;  %v1005_v60 = vmax.f32 %v955_v56, 0.0  ;;  %v950_v62 = vadd.f32 %v6094_v17, %v949_v58 }
 0x150   : > { %1026 = vst [vmem:[#allocation2 + $0x60] sm:$0xff] %v1010_v55  ;;  %v1013_v61 = vmax.f32 %v995_v57, 0.0  ;;  %v990_v63 = vadd.f32 %v6094_v17, %v989_v59  ;;  %v4770_v1 = vpop.f32.mrf.mxu0 }
 0x151   : > { %v4744_v0 = vpop.f32.mrf.mxu1  ;;  %1021 = vst [vmem:[#allocation2 + $0x38] sm:$0xff] %v1005_v60  ;;  %v1004_v2 = vmax.f32 %v950_v62, 0.0  ;;  %v1410_v5 = vadd.f32 %v4770_v1, %v6094_v17 }
 0x152   : > { %1029 = vst [vmem:[#allocation2 + $0x78] sm:$0xff] %v1013_v61  ;;  %v1012_v3 = vmax.f32 %v990_v63, 0.0  ;;  %v1167_v4 = vadd.f32 %v4744_v0, %v6094_v17  ;;  %v1404_v7 = vpop.f32.mrf.mxu0 }
 0x153   : > { %v1161_v6 = vpop.f32.mrf.mxu1  ;;  %1020 = vst [vmem:[#allocation2 + $0x30] sm:$0xff] %v1004_v2  ;;  %v1484_v9 = vmax.f32 %v1410_v5, 0.0  ;;  %v1405_v11 = vadd.f32 %v6094_v17, %v1404_v7 }
 0x154   : > { %1028 = vst [vmem:[#allocation2 + $0x70] sm:$0xff] %v1012_v3  ;;  %v1241_v8 = vmax.f32 %v1167_v4, 0.0  ;;  %v1162_v10 = vadd.f32 %v6094_v17, %v1161_v6  ;;  %v4773_v13 = vpop.f32.mrf.mxu0 }
 0x155   : > { %v4747_v12 = vpop.f32.mrf.mxu1  ;;  %1501 = vst [vmem:[#allocation2 + $0x108] sm:$0xff] %v1484_v9  ;;  %v1483_v15 = vmax.f32 %v1405_v11, 0.0  ;;  %v1420_v18 = vadd.f32 %v4773_v13, %v6094_v17 }
 0x156   : > { %1258 = vst [vmem:[#allocation2 + $0x88] sm:$0xff] %v1241_v8  ;;  %v1240_v14 = vmax.f32 %v1162_v10, 0.0  ;;  %v1177_v16 = vadd.f32 %v4747_v12, %v6094_v17  ;;  %v1414_v20 = vpop.f32.mrf.mxu0 }
 0x157   : > { %v1171_v19 = vpop.f32.mrf.mxu1  ;;  %1500 = vst [vmem:[#allocation2 + $0x100] sm:$0xff] %v1483_v15  ;;  %v1486_v22 = vmax.f32 %v1420_v18, 0.0  ;;  %v1415_v24 = vadd.f32 %v6094_v17, %v1414_v20 }
 0x158   : > { %1257 = vst [vmem:[#allocation2 + $0x80] sm:$0xff] %v1240_v14  ;;  %v1243_v21 = vmax.f32 %v1177_v16, 0.0  ;;  %v1172_v23 = vadd.f32 %v6094_v17, %v1171_v19  ;;  %v4776_v26 = vpop.f32.mrf.mxu0 }
 0x159   : > { %v4750_v25 = vpop.f32.mrf.mxu1  ;;  %1503 = vst [vmem:[#allocation2 + $0x118] sm:$0xff] %v1486_v22  ;;  %v1485_v28 = vmax.f32 %v1415_v24, 0.0  ;;  %v1430_v30 = vadd.f32 %v4776_v26, %v6094_v17 }
 0x15a   : > { %1260 = vst [vmem:[#allocation2 + $0x98] sm:$0xff] %v1243_v21  ;;  %v1242_v27 = vmax.f32 %v1172_v23, 0.0  ;;  %v1187_v29 = vadd.f32 %v4750_v25, %v6094_v17  ;;  %v1424_v32 = vpop.f32.mrf.mxu0 }
 0x15b   : > { %v1181_v31 = vpop.f32.mrf.mxu1  ;;  %1502 = vst [vmem:[#allocation2 + $0x110] sm:$0xff] %v1485_v28  ;;  %v1488_v34 = vmax.f32 %v1430_v30, 0.0  ;;  %v1425_v36 = vadd.f32 %v6094_v17, %v1424_v32 }
 0x15c   : > { %1259 = vst [vmem:[#allocation2 + $0x90] sm:$0xff] %v1242_v27  ;;  %v1245_v33 = vmax.f32 %v1187_v29, 0.0  ;;  %v1182_v35 = vadd.f32 %v6094_v17, %v1181_v31  ;;  %v4779_v38 = vpop.f32.mrf.mxu0 }
 0x15d   : > { %v4753_v37 = vpop.f32.mrf.mxu1  ;;  %1505 = vst [vmem:[#allocation2 + $0x128] sm:$0xff] %v1488_v34  ;;  %v1487_v40 = vmax.f32 %v1425_v36, 0.0  ;;  %v1440_v42 = vadd.f32 %v4779_v38, %v6094_v17 }
 0x15e   : > { %1262 = vst [vmem:[#allocation2 + $0xa8] sm:$0xff] %v1245_v33  ;;  %v1244_v39 = vmax.f32 %v1182_v35, 0.0  ;;  %v1197_v41 = vadd.f32 %v4753_v37, %v6094_v17  ;;  %v1434_v44 = vpop.f32.mrf.mxu0 }
 0x15f   : > { %v1191_v43 = vpop.f32.mrf.mxu1  ;;  %1504 = vst [vmem:[#allocation2 + $0x120] sm:$0xff] %v1487_v40  ;;  %v1490_v46 = vmax.f32 %v1440_v42, 0.0  ;;  %v1435_v48 = vadd.f32 %v6094_v17, %v1434_v44 }
 0x160   : > { %1261 = vst [vmem:[#allocation2 + $0xa0] sm:$0xff] %v1244_v39  ;;  %v1247_v45 = vmax.f32 %v1197_v41, 0.0  ;;  %v1192_v47 = vadd.f32 %v6094_v17, %v1191_v43  ;;  %v4782_v50 = vpop.f32.mrf.mxu0 }
 0x161   : > { %v4756_v49 = vpop.f32.mrf.mxu1  ;;  %1507 = vst [vmem:[#allocation2 + $0x138] sm:$0xff] %v1490_v46  ;;  %v1489_v52 = vmax.f32 %v1435_v48, 0.0  ;;  %v1450_v54 = vadd.f32 %v4782_v50, %v6094_v17 }
 0x162   : > { %1264 = vst [vmem:[#allocation2 + $0xb8] sm:$0xff] %v1247_v45  ;;  %v1246_v51 = vmax.f32 %v1192_v47, 0.0  ;;  %v1207_v53 = vadd.f32 %v4756_v49, %v6094_v17  ;;  %v1444_v56 = vpop.f32.mrf.mxu0 }
 0x163   : > { %v1201_v55 = vpop.f32.mrf.mxu1  ;;  %1506 = vst [vmem:[#allocation2 + $0x130] sm:$0xff] %v1489_v52  ;;  %v1492_v58 = vmax.f32 %v1450_v54, 0.0  ;;  %v1445_v60 = vadd.f32 %v6094_v17, %v1444_v56 }
 0x164   : > { %1263 = vst [vmem:[#allocation2 + $0xb0] sm:$0xff] %v1246_v51  ;;  %v1249_v57 = vmax.f32 %v1207_v53, 0.0  ;;  %v1202_v59 = vadd.f32 %v6094_v17, %v1201_v55  ;;  %v4785_v62 = vpop.f32.mrf.mxu0 }
 0x165   : > { %v4759_v61 = vpop.f32.mrf.mxu1  ;;  %1509 = vst [vmem:[#allocation2 + $0x148] sm:$0xff] %v1492_v58  ;;  %v1491_v0 = vmax.f32 %v1445_v60, 0.0  ;;  %v1460_v2 = vadd.f32 %v4785_v62, %v6094_v17 }
 0x166   : > { %1266 = vst [vmem:[#allocation2 + $0xc8] sm:$0xff] %v1249_v57  ;;  %v1248_v63 = vmax.f32 %v1202_v59, 0.0  ;;  %v1217_v1 = vadd.f32 %v4759_v61, %v6094_v17  ;;  %v1454_v4 = vpop.f32.mrf.mxu0 }
 0x167   : > { %v1211_v3 = vpop.f32.mrf.mxu1  ;;  %1508 = vst [vmem:[#allocation2 + $0x140] sm:$0xff] %v1491_v0  ;;  %v1494_v6 = vmax.f32 %v1460_v2, 0.0  ;;  %v1455_v8 = vadd.f32 %v6094_v17, %v1454_v4 }
 0x168   : > { %1265 = vst [vmem:[#allocation2 + $0xc0] sm:$0xff] %v1248_v63  ;;  %v1251_v5 = vmax.f32 %v1217_v1, 0.0  ;;  %v1212_v7 = vadd.f32 %v6094_v17, %v1211_v3  ;;  %v4788_v10 = vpop.f32.mrf.mxu0 }
 0x169   : > { %v4762_v9 = vpop.f32.mrf.mxu1  ;;  %1511 = vst [vmem:[#allocation2 + $0x158] sm:$0xff] %v1494_v6  ;;  %v1493_v12 = vmax.f32 %v1455_v8, 0.0  ;;  %v1470_v14 = vadd.f32 %v4788_v10, %v6094_v17 }
 0x16a   : > { %1268 = vst [vmem:[#allocation2 + $0xd8] sm:$0xff] %v1251_v5  ;;  %v1250_v11 = vmax.f32 %v1212_v7, 0.0  ;;  %v1227_v13 = vadd.f32 %v4762_v9, %v6094_v17  ;;  %v1464_v16 = vpop.f32.mrf.mxu0 }
 0x16b   : > { %v1221_v15 = vpop.f32.mrf.mxu1  ;;  %1510 = vst [vmem:[#allocation2 + $0x150] sm:$0xff] %v1493_v12  ;;  %v1496_v19 = vmax.f32 %v1470_v14, 0.0  ;;  %v1465_v21 = vadd.f32 %v6094_v17, %v1464_v16 }
 0x16c   : > { %1267 = vst [vmem:[#allocation2 + $0xd0] sm:$0xff] %v1250_v11  ;;  %v1253_v18 = vmax.f32 %v1227_v13, 0.0  ;;  %v1222_v20 = vadd.f32 %v6094_v17, %v1221_v15  ;;  %v4791_v23 = vpop.f32.mrf.mxu0 }
 0x16d   : > { %v4765_v22 = vpop.f32.mrf.mxu1  ;;  %1513 = vst [vmem:[#allocation2 + $0x168] sm:$0xff] %v1496_v19  ;;  %v1495_v25 = vmax.f32 %v1465_v21, 0.0  ;;  %v1480_v27 = vadd.f32 %v4791_v23, %v6094_v17 }
 0x16e   : > { %1270 = vst [vmem:[#allocation2 + $0xe8] sm:$0xff] %v1253_v18  ;;  %v1252_v24 = vmax.f32 %v1222_v20, 0.0  ;;  %v1237_v26 = vadd.f32 %v4765_v22, %v6094_v17  ;;  %v1474_v29 = vpop.f32.mrf.mxu0 }
 0x16f   : > { %v1231_v28 = vpop.f32.mrf.mxu1  ;;  %1512 = vst [vmem:[#allocation2 + $0x160] sm:$0xff] %v1495_v25  ;;  %v1498_v31 = vmax.f32 %v1480_v27, 0.0  ;;  %v1475_v33 = vadd.f32 %v6094_v17, %v1474_v29 }
 0x170   : > { %1269 = vst [vmem:[#allocation2 + $0xe0] sm:$0xff] %v1252_v24  ;;  %v1255_v30 = vmax.f32 %v1237_v26, 0.0  ;;  %v1232_v32 = vadd.f32 %v6094_v17, %v1231_v28  ;;  %v4822_v35 = vpop.f32.mrf.mxu0 }
 0x171   : > { %v4796_v34 = vpop.f32.mrf.mxu1  ;;  %1515 = vst [vmem:[#allocation2 + $0x178] sm:$0xff] %v1498_v31  ;;  %v1497_v37 = vmax.f32 %v1475_v33, 0.0  ;;  %v1896_v39 = vadd.f32 %v4822_v35, %v6094_v17 }
 0x172   : > { %1272 = vst [vmem:[#allocation2 + $0xf8] sm:$0xff] %v1255_v30  ;;  %v1254_v36 = vmax.f32 %v1232_v32, 0.0  ;;  %v1653_v38 = vadd.f32 %v4796_v34, %v6094_v17  ;;  %v1890_v41 = vpop.f32.mrf.mxu0 }
 0x173   : > { %v1647_v40 = vpop.f32.mrf.mxu1  ;;  %1514 = vst [vmem:[#allocation2 + $0x170] sm:$0xff] %v1497_v37  ;;  %v1970_v43 = vmax.f32 %v1896_v39, 0.0  ;;  %v1891_v45 = vadd.f32 %v6094_v17, %v1890_v41 }
 0x174   : > { %1271 = vst [vmem:[#allocation2 + $0xf0] sm:$0xff] %v1254_v36  ;;  %v1727_v42 = vmax.f32 %v1653_v38, 0.0  ;;  %v1648_v44 = vadd.f32 %v6094_v17, %v1647_v40  ;;  %v4825_v47 = vpop.f32.mrf.mxu0 }
 0x175   : > { %v4799_v46 = vpop.f32.mrf.mxu1  ;;  %1987 = vst [vmem:[#allocation2 + $0x208] sm:$0xff] %v1970_v43  ;;  %v1969_v49 = vmax.f32 %v1891_v45, 0.0  ;;  %v1906_v51 = vadd.f32 %v4825_v47, %v6094_v17 }
 0x176   : > { %1744 = vst [vmem:[#allocation2 + $0x188] sm:$0xff] %v1727_v42  ;;  %v1726_v48 = vmax.f32 %v1648_v44, 0.0  ;;  %v1663_v50 = vadd.f32 %v4799_v46, %v6094_v17  ;;  %v1900_v53 = vpop.f32.mrf.mxu0 }
 0x177   : > { %v1657_v52 = vpop.f32.mrf.mxu1  ;;  %1986 = vst [vmem:[#allocation2 + $0x200] sm:$0xff] %v1969_v49  ;;  %v1972_v55 = vmax.f32 %v1906_v51, 0.0  ;;  %v1901_v57 = vadd.f32 %v6094_v17, %v1900_v53 }
 0x178   : > { %1743 = vst [vmem:[#allocation2 + $0x180] sm:$0xff] %v1726_v48  ;;  %v1729_v54 = vmax.f32 %v1663_v50, 0.0  ;;  %v1658_v56 = vadd.f32 %v6094_v17, %v1657_v52  ;;  %v4828_v59 = vpop.f32.mrf.mxu0 }
 0x179   : > { %v4802_v58 = vpop.f32.mrf.mxu1  ;;  %1989 = vst [vmem:[#allocation2 + $0x218] sm:$0xff] %v1972_v55  ;;  %v1971_v61 = vmax.f32 %v1901_v57, 0.0  ;;  %v1916_v63 = vadd.f32 %v4828_v59, %v6094_v17 }
 0x17a   : > { %1746 = vst [vmem:[#allocation2 + $0x198] sm:$0xff] %v1729_v54  ;;  %v1728_v60 = vmax.f32 %v1658_v56, 0.0  ;;  %v1673_v62 = vadd.f32 %v4802_v58, %v6094_v17  ;;  %v1910_v1 = vpop.f32.mrf.mxu0 }
 0x17b   : > { %v1667_v0 = vpop.f32.mrf.mxu1  ;;  %1988 = vst [vmem:[#allocation2 + $0x210] sm:$0xff] %v1971_v61  ;;  %v1974_v3 = vmax.f32 %v1916_v63, 0.0  ;;  %v1911_v5 = vadd.f32 %v6094_v17, %v1910_v1 }
 0x17c   : > { %1745 = vst [vmem:[#allocation2 + $0x190] sm:$0xff] %v1728_v60  ;;  %v1731_v2 = vmax.f32 %v1673_v62, 0.0  ;;  %v1668_v4 = vadd.f32 %v6094_v17, %v1667_v0  ;;  %v4831_v7 = vpop.f32.mrf.mxu0 }
 0x17d   : > { %v4805_v6 = vpop.f32.mrf.mxu1  ;;  %1991 = vst [vmem:[#allocation2 + $0x228] sm:$0xff] %v1974_v3  ;;  %v1973_v9 = vmax.f32 %v1911_v5, 0.0  ;;  %v1926_v11 = vadd.f32 %v4831_v7, %v6094_v17 }
 0x17e   : > { %1748 = vst [vmem:[#allocation2 + $0x1a8] sm:$0xff] %v1731_v2  ;;  %v1730_v8 = vmax.f32 %v1668_v4, 0.0  ;;  %v1683_v10 = vadd.f32 %v4805_v6, %v6094_v17  ;;  %v1920_v13 = vpop.f32.mrf.mxu0 }
 0x17f   : > { %v1677_v12 = vpop.f32.mrf.mxu1  ;;  %1990 = vst [vmem:[#allocation2 + $0x220] sm:$0xff] %v1973_v9  ;;  %v1976_v15 = vmax.f32 %v1926_v11, 0.0  ;;  %v1921_v18 = vadd.f32 %v6094_v17, %v1920_v13 }
 0x180   : > { %1747 = vst [vmem:[#allocation2 + $0x1a0] sm:$0xff] %v1730_v8  ;;  %v1733_v14 = vmax.f32 %v1683_v10, 0.0  ;;  %v1678_v16 = vadd.f32 %v6094_v17, %v1677_v12  ;;  %v4834_v20 = vpop.f32.mrf.mxu0 }
 0x181   : > { %v4808_v19 = vpop.f32.mrf.mxu1  ;;  %1993 = vst [vmem:[#allocation2 + $0x238] sm:$0xff] %v1976_v15  ;;  %v1975_v22 = vmax.f32 %v1921_v18, 0.0  ;;  %v1936_v24 = vadd.f32 %v4834_v20, %v6094_v17 }
 0x182   : > { %1750 = vst [vmem:[#allocation2 + $0x1b8] sm:$0xff] %v1733_v14  ;;  %v1732_v21 = vmax.f32 %v1678_v16, 0.0  ;;  %v1693_v23 = vadd.f32 %v4808_v19, %v6094_v17  ;;  %v1930_v26 = vpop.f32.mrf.mxu0 }
 0x183   : > { %v1687_v25 = vpop.f32.mrf.mxu1  ;;  %1992 = vst [vmem:[#allocation2 + $0x230] sm:$0xff] %v1975_v22  ;;  %v1978_v28 = vmax.f32 %v1936_v24, 0.0  ;;  %v1931_v30 = vadd.f32 %v6094_v17, %v1930_v26 }
 0x184   : > { %1749 = vst [vmem:[#allocation2 + $0x1b0] sm:$0xff] %v1732_v21  ;;  %v1735_v27 = vmax.f32 %v1693_v23, 0.0  ;;  %v1688_v29 = vadd.f32 %v6094_v17, %v1687_v25  ;;  %v4837_v32 = vpop.f32.mrf.mxu0 }
 0x185   : > { %v4811_v31 = vpop.f32.mrf.mxu1  ;;  %1995 = vst [vmem:[#allocation2 + $0x248] sm:$0xff] %v1978_v28  ;;  %v1977_v34 = vmax.f32 %v1931_v30, 0.0  ;;  %v1946_v36 = vadd.f32 %v4837_v32, %v6094_v17 }
 0x186   : > { %1752 = vst [vmem:[#allocation2 + $0x1c8] sm:$0xff] %v1735_v27  ;;  %v1734_v33 = vmax.f32 %v1688_v29, 0.0  ;;  %v1703_v35 = vadd.f32 %v4811_v31, %v6094_v17  ;;  %v1940_v38 = vpop.f32.mrf.mxu0 }
 0x187   : > { %v1697_v37 = vpop.f32.mrf.mxu1  ;;  %1994 = vst [vmem:[#allocation2 + $0x240] sm:$0xff] %v1977_v34  ;;  %v1980_v40 = vmax.f32 %v1946_v36, 0.0  ;;  %v1941_v42 = vadd.f32 %v6094_v17, %v1940_v38 }
 0x188   : > { %1751 = vst [vmem:[#allocation2 + $0x1c0] sm:$0xff] %v1734_v33  ;;  %v1737_v39 = vmax.f32 %v1703_v35, 0.0  ;;  %v1698_v41 = vadd.f32 %v6094_v17, %v1697_v37  ;;  %v4840_v44 = vpop.f32.mrf.mxu0 }
 0x189   : > { %v4814_v43 = vpop.f32.mrf.mxu1  ;;  %1997 = vst [vmem:[#allocation2 + $0x258] sm:$0xff] %v1980_v40  ;;  %v1979_v46 = vmax.f32 %v1941_v42, 0.0  ;;  %v1956_v48 = vadd.f32 %v4840_v44, %v6094_v17 }
 0x18a   : > { %1754 = vst [vmem:[#allocation2 + $0x1d8] sm:$0xff] %v1737_v39  ;;  %v1736_v45 = vmax.f32 %v1698_v41, 0.0  ;;  %v1713_v47 = vadd.f32 %v4814_v43, %v6094_v17  ;;  %v1950_v50 = vpop.f32.mrf.mxu0 }
 0x18b   : > { %v1707_v49 = vpop.f32.mrf.mxu1  ;;  %1996 = vst [vmem:[#allocation2 + $0x250] sm:$0xff] %v1979_v46  ;;  %v1982_v52 = vmax.f32 %v1956_v48, 0.0  ;;  %v1951_v54 = vadd.f32 %v6094_v17, %v1950_v50 }
 0x18c   : > { %1753 = vst [vmem:[#allocation2 + $0x1d0] sm:$0xff] %v1736_v45  ;;  %v1739_v51 = vmax.f32 %v1713_v47, 0.0  ;;  %v1708_v53 = vadd.f32 %v6094_v17, %v1707_v49  ;;  %v4843_v56 = vpop.f32.mrf.mxu0 }
 0x18d   : > { %v4817_v55 = vpop.f32.mrf.mxu1  ;;  %1999 = vst [vmem:[#allocation2 + $0x268] sm:$0xff] %v1982_v52  ;;  %v1981_v58 = vmax.f32 %v1951_v54, 0.0  ;;  %v1966_v60 = vadd.f32 %v4843_v56, %v6094_v17 }
 0x18e   : > { %1756 = vst [vmem:[#allocation2 + $0x1e8] sm:$0xff] %v1739_v51  ;;  %v1738_v57 = vmax.f32 %v1708_v53, 0.0  ;;  %v1723_v59 = vadd.f32 %v4817_v55, %v6094_v17  ;;  %v1960_v62 = vpop.f32.mrf.mxu0 }
 0x18f   : > { %v1717_v61 = vpop.f32.mrf.mxu1  ;;  %1998 = vst [vmem:[#allocation2 + $0x260] sm:$0xff] %v1981_v58  ;;  %v1984_v0 = vmax.f32 %v1966_v60, 0.0  ;;  %v1961_v2 = vadd.f32 %v6094_v17, %v1960_v62 }
 0x190   : > { %1755 = vst [vmem:[#allocation2 + $0x1e0] sm:$0xff] %v1738_v57  ;;  %v1741_v63 = vmax.f32 %v1723_v59, 0.0  ;;  %v1718_v1 = vadd.f32 %v6094_v17, %v1717_v61  ;;  %v4874_v4 = vpop.f32.mrf.mxu0 }
 0x191   : > { %v4848_v3 = vpop.f32.mrf.mxu1  ;;  %2001 = vst [vmem:[#allocation2 + $0x278] sm:$0xff] %v1984_v0  ;;  %v1983_v6 = vmax.f32 %v1961_v2, 0.0  ;;  %v2382_v8 = vadd.f32 %v4874_v4, %v6094_v17 }
 0x192   : > { %1758 = vst [vmem:[#allocation2 + $0x1f8] sm:$0xff] %v1741_v63  ;;  %v1740_v5 = vmax.f32 %v1718_v1, 0.0  ;;  %v2139_v7 = vadd.f32 %v4848_v3, %v6094_v17  ;;  %v2376_v10 = vpop.f32.mrf.mxu0 }
 0x193   : > { %v2133_v9 = vpop.f32.mrf.mxu1  ;;  %2000 = vst [vmem:[#allocation2 + $0x270] sm:$0xff] %v1983_v6  ;;  %v2456_v12 = vmax.f32 %v2382_v8, 0.0  ;;  %v2377_v14 = vadd.f32 %v6094_v17, %v2376_v10 }
 0x194   : > { %1757 = vst [vmem:[#allocation2 + $0x1f0] sm:$0xff] %v1740_v5  ;;  %v2213_v11 = vmax.f32 %v2139_v7, 0.0  ;;  %v2134_v13 = vadd.f32 %v6094_v17, %v2133_v9  ;;  %v4877_v16 = vpop.f32.mrf.mxu0 }
 0x195   : > { %v4851_v15 = vpop.f32.mrf.mxu1  ;;  %2473 = vst [vmem:[#allocation2 + $0x308] sm:$0xff] %v2456_v12  ;;  %v2455_v19 = vmax.f32 %v2377_v14, 0.0  ;;  %v2392_v21 = vadd.f32 %v4877_v16, %v6094_v17 }
 0x196   : > { %2230 = vst [vmem:[#allocation2 + $0x288] sm:$0xff] %v2213_v11  ;;  %v2212_v18 = vmax.f32 %v2134_v13, 0.0  ;;  %v2149_v20 = vadd.f32 %v4851_v15, %v6094_v17  ;;  %v2386_v23 = vpop.f32.mrf.mxu0 }
 0x197   : > { %v2143_v22 = vpop.f32.mrf.mxu1  ;;  %2472 = vst [vmem:[#allocation2 + $0x300] sm:$0xff] %v2455_v19  ;;  %v2458_v25 = vmax.f32 %v2392_v21, 0.0  ;;  %v2387_v27 = vadd.f32 %v6094_v17, %v2386_v23 }
 0x198   : > { %2229 = vst [vmem:[#allocation2 + $0x280] sm:$0xff] %v2212_v18  ;;  %v2215_v24 = vmax.f32 %v2149_v20, 0.0  ;;  %v2144_v26 = vadd.f32 %v6094_v17, %v2143_v22  ;;  %v4880_v29 = vpop.f32.mrf.mxu0 }
 0x199   : > { %v4854_v28 = vpop.f32.mrf.mxu1  ;;  %2475 = vst [vmem:[#allocation2 + $0x318] sm:$0xff] %v2458_v25  ;;  %v2457_v31 = vmax.f32 %v2387_v27, 0.0  ;;  %v2402_v33 = vadd.f32 %v4880_v29, %v6094_v17 }
 0x19a   : > { %2232 = vst [vmem:[#allocation2 + $0x298] sm:$0xff] %v2215_v24  ;;  %v2214_v30 = vmax.f32 %v2144_v26, 0.0  ;;  %v2159_v32 = vadd.f32 %v4854_v28, %v6094_v17  ;;  %v2396_v35 = vpop.f32.mrf.mxu0 }
 0x19b   : > { %v2153_v34 = vpop.f32.mrf.mxu1  ;;  %2474 = vst [vmem:[#allocation2 + $0x310] sm:$0xff] %v2457_v31  ;;  %v2460_v37 = vmax.f32 %v2402_v33, 0.0  ;;  %v2397_v39 = vadd.f32 %v6094_v17, %v2396_v35 }
 0x19c   : > { %2231 = vst [vmem:[#allocation2 + $0x290] sm:$0xff] %v2214_v30  ;;  %v2217_v36 = vmax.f32 %v2159_v32, 0.0  ;;  %v2154_v38 = vadd.f32 %v6094_v17, %v2153_v34  ;;  %v4883_v41 = vpop.f32.mrf.mxu0 }
 0x19d   : > { %v4857_v40 = vpop.f32.mrf.mxu1  ;;  %2477 = vst [vmem:[#allocation2 + $0x328] sm:$0xff] %v2460_v37  ;;  %v2459_v43 = vmax.f32 %v2397_v39, 0.0  ;;  %v2412_v45 = vadd.f32 %v4883_v41, %v6094_v17 }
 0x19e   : > { %2234 = vst [vmem:[#allocation2 + $0x2a8] sm:$0xff] %v2217_v36  ;;  %v2216_v42 = vmax.f32 %v2154_v38, 0.0  ;;  %v2169_v44 = vadd.f32 %v4857_v40, %v6094_v17  ;;  %v2406_v47 = vpop.f32.mrf.mxu0 }
 0x19f   : > { %v2163_v46 = vpop.f32.mrf.mxu1  ;;  %2476 = vst [vmem:[#allocation2 + $0x320] sm:$0xff] %v2459_v43  ;;  %v2462_v49 = vmax.f32 %v2412_v45, 0.0  ;;  %v2407_v51 = vadd.f32 %v6094_v17, %v2406_v47  ;;  %v6235_v45 = vld [vmem:[%s6970_s6 + $0x178] sm:$0xff] }
 0x1a0   : > { %2233 = vst [vmem:[#allocation2 + $0x2a0] sm:$0xff] %v2216_v42  ;;  %v2219_v48 = vmax.f32 %v2169_v44, 0.0  ;;  %v2164_v50 = vadd.f32 %v6094_v17, %v2163_v46  ;;  %v4886_v53 = vpop.f32.mrf.mxu0  ;;  %v6229_v44 = vld [vmem:[%s6970_s6 + $0x78] sm:$0xff] }
 0x1a1   : > { %v4860_v52 = vpop.f32.mrf.mxu1  ;;  %2479 = vst [vmem:[#allocation2 + $0x338] sm:$0xff] %v2462_v49  ;;  %v2461_v55 = vmax.f32 %v2407_v51, 0.0  ;;  %v2422_v57 = vadd.f32 %v4886_v53, %v6094_v17  ;;  %v6249_v49 = vld [vmem:[%s6970_s6 + $0x170] sm:$0xff] }
 0x1a2   : > { %2236 = vst [vmem:[#allocation2 + $0x2b8] sm:$0xff] %v2219_v48  ;;  %v2218_v54 = vmax.f32 %v2164_v50, 0.0  ;;  %v2179_v56 = vadd.f32 %v4860_v52, %v6094_v17  ;;  %v2416_v59 = vpop.f32.mrf.mxu0  ;;  %v6243_v48 = vld [vmem:[%s6970_s6 + $0xf0] sm:$0xff] }
 0x1a3   : > { %v2173_v58 = vpop.f32.mrf.mxu1  ;;  %2478 = vst [vmem:[#allocation2 + $0x330] sm:$0xff] %v2461_v55  ;;  %v2464_v61 = vmax.f32 %v2422_v57, 0.0  ;;  %v2417_v63 = vadd.f32 %v6094_v17, %v2416_v59  ;;  %v6257_v52 = vld [vmem:[%s6970_s6 + $0x70] sm:$0xff]  ;;  %v6266_v55 = vld [vmem:[%s6970_s6 + $0xe8] sm:$0xff] }
 0x1a4   : > { %2235 = vst [vmem:[#allocation2 + $0x2b0] sm:$0xff] %v2218_v54  ;;  %v2221_v60 = vmax.f32 %v2179_v56, 0.0  ;;  %v2174_v62 = vadd.f32 %v6094_v17, %v2173_v58  ;;  %v4889_v1 = vpop.f32.mrf.mxu0  ;;  %v6272_v56 = vld [vmem:[%s6970_s6 + $0x168] sm:$0xff] }
 0x1a5   : > { %v4863_v0 = vpop.f32.mrf.mxu1  ;;  %2481 = vst [vmem:[#allocation2 + $0x348] sm:$0xff] %v2464_v61  ;;  %v2463_v3 = vmax.f32 %v2417_v63, 0.0  ;;  %v2432_v5 = vadd.f32 %v4889_v1, %v6094_v17  ;;  %v6280_v59 = vld [vmem:[%s6970_s6 + $0x68] sm:$0xff]  ;;  %v6295_v63 = vld [vmem:[%s6970_s6 + $0x160] sm:$0xff] }
 0x1a6   : > { %2238 = vst [vmem:[#allocation2 + $0x2c8] sm:$0xff] %v2221_v60  ;;  %v2220_v2 = vmax.f32 %v2174_v62, 0.0  ;;  %v2189_v4 = vadd.f32 %v4863_v0, %v6094_v17  ;;  %v2426_v7 = vpop.f32.mrf.mxu0  ;;  %v6289_v62 = vld [vmem:[%s6970_s6 + $0xe0] sm:$0xff] }
 0x1a7   : > { %v2183_v6 = vpop.f32.mrf.mxu1  ;;  %2480 = vst [vmem:[#allocation2 + $0x340] sm:$0xff] %v2463_v3  ;;  %v2466_v9 = vmax.f32 %v2432_v5, 0.0  ;;  %v2427_v11 = vadd.f32 %v6094_v17, %v2426_v7  ;;  %v6312_v5 = vld [vmem:[%s6970_s6 + $0xd8] sm:$0xff] }
 0x1a8   : > { %2237 = vst [vmem:[#allocation2 + $0x2c0] sm:$0xff] %v2220_v2  ;;  %v2223_v8 = vmax.f32 %v2189_v4, 0.0  ;;  %v2184_v10 = vadd.f32 %v6094_v17, %v2183_v6  ;;  %v4892_v13 = vpop.f32.mrf.mxu0  ;;  %v6303_v2 = vld [vmem:[%s6970_s6 + $0x60] sm:$0xff]  ;;  %v6318_v6 = vld [vmem:[%s6970_s6 + $0x158] sm:$0xff] }
 0x1a9   : > { %v4866_v12 = vpop.f32.mrf.mxu1  ;;  %2483 = vst [vmem:[#allocation2 + $0x358] sm:$0xff] %v2466_v9  ;;  %v2465_v15 = vmax.f32 %v2427_v11, 0.0  ;;  %v2442_v18 = vadd.f32 %v4892_v13, %v6094_v17  ;;  %v6326_v9 = vld [vmem:[%s6970_s6 + $0x58] sm:$0xff]  ;;  %v6341_v13 = vld [vmem:[%s6970_s6 + $0x150] sm:$0xff] }
 0x1aa   : > { %2240 = vst [vmem:[#allocation2 + $0x2d8] sm:$0xff] %v2223_v8  ;;  %v2222_v14 = vmax.f32 %v2184_v10, 0.0  ;;  %v2199_v16 = vadd.f32 %v4866_v12, %v6094_v17  ;;  %v2436_v20 = vpop.f32.mrf.mxu0  ;;  %v6335_v12 = vld [vmem:[%s6970_s6 + $0xd0] sm:$0xff] }
 0x1ab   : > { %v2193_v19 = vpop.f32.mrf.mxu1  ;;  %2482 = vst [vmem:[#allocation2 + $0x350] sm:$0xff] %v2465_v15  ;;  %v2468_v22 = vmax.f32 %v2442_v18, 0.0  ;;  %v2437_v24 = vadd.f32 %v6094_v17, %v2436_v20  ;;  %v6358_v20 = vld [vmem:[%s6970_s6 + $0xc8] sm:$0xff] }
 0x1ac   : > { %2239 = vst [vmem:[#allocation2 + $0x2d0] sm:$0xff] %v2222_v14  ;;  %v2225_v21 = vmax.f32 %v2199_v16, 0.0  ;;  %v2194_v23 = vadd.f32 %v6094_v17, %v2193_v19  ;;  %v4895_v26 = vpop.f32.mrf.mxu0  ;;  %v6349_v16 = vld [vmem:[%s6970_s6 + $0x50] sm:$0xff] }
 0x1ad   : > { %v4869_v25 = vpop.f32.mrf.mxu1  ;;  %2485 = vst [vmem:[#allocation2 + $0x368] sm:$0xff] %v2468_v22  ;;  %v2467_v28 = vmax.f32 %v2437_v24, 0.0  ;;  %v2452_v30 = vadd.f32 %v4895_v26, %v6094_v17  ;;  %v6372_v24 = vld [vmem:[%s6970_s6 + $0x48] sm:$0xff] }
 0x1ae   : > { %2242 = vst [vmem:[#allocation2 + $0x2e8] sm:$0xff] %v2225_v21  ;;  %v2224_v27 = vmax.f32 %v2194_v23, 0.0  ;;  %v2209_v29 = vadd.f32 %v4869_v25, %v6094_v17  ;;  %v2446_v32 = vpop.f32.mrf.mxu0  ;;  %v6364_v21 = vld [vmem:[%s6970_s6 + $0x148] sm:$0xff] }
 0x1af   : > { %v2203_v31 = vpop.f32.mrf.mxu1  ;;  %2484 = vst [vmem:[#allocation2 + $0x360] sm:$0xff] %v2467_v28  ;;  %v2470_v34 = vmax.f32 %v2452_v30, 0.0  ;;  %v2447_v36 = vadd.f32 %v6094_v17, %v2446_v32  ;;  %v6387_v28 = vld [vmem:[%s6970_s6 + $0x140] sm:$0xff] }
 0x1b0   : > { %2241 = vst [vmem:[#allocation2 + $0x2e0] sm:$0xff] %v2224_v27  ;;  %v2227_v33 = vmax.f32 %v2209_v29, 0.0  ;;  %v2204_v35 = vadd.f32 %v6094_v17, %v2203_v31  ;;  %v6381_v27 = vld [vmem:[%s6970_s6 + $0xc0] sm:$0xff]  ;;  %v6400_v31 = vld [vmem:[%s6970_s6 + $0xb8] sm:$0xff] }
 0x1b1   : > { %2487 = vst [vmem:[#allocation2 + $0x378] sm:$0xff] %v2470_v34  ;;  %v2469_v38 = vmax.f32 %v2447_v36, 0.0  ;;  %v6394_v30 = vld [vmem:[%s6970_s6 + $0x40] sm:$0xff]  ;;  %v6414_v34 = vld [vmem:[%s6970_s6 + $0x138] sm:$0xff]  ;;  %v6421_v36 = vld [vmem:[%s6970_s6 + $0xb0] sm:$0xff] }
 0x1b2   : > { %2244 = vst [vmem:[#allocation2 + $0x2f8] sm:$0xff] %v2227_v33  ;;  %v2226_v37 = vmax.f32 %v2204_v35, 0.0  ;;  %v6408_v33 = vld [vmem:[%s6970_s6 + $0x38] sm:$0xff] }
 0x1b3   : > { %2486 = vst [vmem:[#allocation2 + $0x370] sm:$0xff] %v2469_v38  ;;  %v6434_v38 = vld [vmem:[%s6970_s6 + $0x130] sm:$0xff] }
 0x1b4   : > { %2243 = vst [vmem:[#allocation2 + $0x2f0] sm:$0xff] %v2226_v37  ;;  %v6428_v37 = vld [vmem:[%s6970_s6 + $0x30] sm:$0xff] }
 0x1bb   : > { %v2560_v39 = vld [vmem:[%s6214_s12] sm:$0xff]  ;;  %v2579_v41 = vld [vmem:[%s6217_s13 + $0x8] sm:$0xff]  ;;  %v2580_v43 = vld [vmem:[%s6217_s13 + $0x10] sm:$0xff] }
 0x1bc   : > { %v2578_v17 = vld [vmem:[%s6217_s13] sm:$0xff]  ;;  %2664 = vmatprep.mubr.f32.mxu1 %v2560_v39  ;;  %v2561_v42 = vld [vmem:[%s6214_s12 + $0x8] sm:$0xff]  ;;  %v2581_v47 = vld [vmem:[%s6217_s13 + $0x18] sm:$0xff] }
 0x1bd   : > { %v2541_v40 = vld [vmem:[%s6220_s17] sm:$0xff]  ;;  %4928 = vmatprep.mubr.f32.mxu0 %v2578_v17  ;;  %v2542_v46 = vld [vmem:[%s6220_s17 + $0x8] sm:$0xff]  ;;  %v2562_v50 = vld [vmem:[%s6214_s12 + $0x10] sm:$0xff] }
 0x1be   : > { %2665 = vmatmul.mubr.f32.vlgmr.msra.gmra.mxu1 %v2541_v40  ;;  %4929 = vmatmul.mubr.f32.vlgmr.msra.gmra.mxu0 %v2579_v41  ;;  %v2582_v51 = vld [vmem:[%s6217_s13 + $0x20] sm:$0xff]  ;;  %v2543_v53 = vld [vmem:[%s6220_s17 + $0x10] sm:$0xff]  ;;  %v2583_v54 = vld [vmem:[%s6217_s13 + $0x28] sm:$0xff] }
 0x1bf   : > { %2669 = vmatprep.mubr.f32.mxu1 %v2561_v42  ;;  %4931 = vmatprep.mubr.f32.mxu0 %v2580_v43  ;;  %v2563_v57 = vld [vmem:[%s6214_s12 + $0x18] sm:$0xff]  ;;  %v2584_v58 = vld [vmem:[%s6217_s13 + $0x30] sm:$0xff]  ;;  %v2564_v0 = vld [vmem:[%s6214_s12 + $0x20] sm:$0xff] }
 0x1c0   : > { %4459 = vmatpush3.msra.mxu0 %v6229_v44  ;;  %4953 = vmatpush3.msra.mxu1 %v6235_v45  ;;  %v2544_v60 = vld [vmem:[%s6220_s17 + $0x18] sm:$0xff]  ;;  %v2586_v1 = vld [vmem:[%s6217_s13 + $0x40] sm:$0xff]  ;;  %v2587_v4 = vld [vmem:[%s6217_s13 + $0x48] sm:$0xff] }
 0x1c1   : > { %4460 = vmatprep.subr.mxu0 %v6243_v48  ;;  %4954 = vmatprep.subr.mxu1 %v6249_v49  ;;  %v2585_v61 = vld [vmem:[%s6217_s13 + $0x38] sm:$0xff]  ;;  %v2545_v3 = vld [vmem:[%s6220_s17 + $0x20] sm:$0xff]  ;;  %v2565_v7 = vld [vmem:[%s6214_s12 + $0x28] sm:$0xff] }
 0x1c2   : > { %2670 = vmatmul.mubr.f32.gmra.mxu1 %v2542_v46  ;;  %4932 = vmatmul.mubr.f32.gmra.mxu0 %v2581_v47  ;;  %v2588_v8 = vld [vmem:[%s6217_s13 + $0x50] sm:$0xff]  ;;  %v2546_v10 = vld [vmem:[%s6220_s17 + $0x28] sm:$0xff]  ;;  %v2589_v11 = vld [vmem:[%s6217_s13 + $0x58] sm:$0xff] }
 0x1c3   : > { %2674 = vmatprep.mubr.f32.mxu1 %v2562_v50  ;;  %4934 = vmatprep.mubr.f32.mxu0 %v2582_v51  ;;  %v2566_v14 = vld [vmem:[%s6214_s12 + $0x30] sm:$0xff]  ;;  %v2590_v15 = vld [vmem:[%s6217_s13 + $0x60] sm:$0xff]  ;;  %v2591_v19 = vld [vmem:[%s6217_s13 + $0x68] sm:$0xff] }
 0x1c4   : > { %4461 = vmatpush3.msra.mxu0 %v6257_v52  ;;  %4955 = vmatpush3.msra.mxu1 %v6249_v49  ;;  %v2547_v18 = vld [vmem:[%s6220_s17 + $0x30] sm:$0xff]  ;;  %v2567_v22 = vld [vmem:[%s6214_s12 + $0x38] sm:$0xff]  ;;  %v2568_v29 = vld [vmem:[%s6214_s12 + $0x40] sm:$0xff] }
 0x1c5   : > { %4462 = vmatprep.subr.mxu0 %v6266_v55  ;;  %4956 = vmatprep.subr.mxu1 %v6272_v56  ;;  %v2592_v23 = vld [vmem:[%s6217_s13 + $0x70] sm:$0xff]  ;;  %v2548_v25 = vld [vmem:[%s6220_s17 + $0x38] sm:$0xff]  ;;  %v2549_v32 = vld [vmem:[%s6220_s17 + $0x40] sm:$0xff] }
 0x1c6   : > { %2675 = vmatmul.mubr.f32.gmra.mxu1 %v2543_v53  ;;  %4935 = vmatmul.mubr.f32.gmra.mxu0 %v2583_v54  ;;  %v2593_v26 = vld [vmem:[%s6217_s13 + $0x78] sm:$0xff]  ;;  %v2569_v35 = vld [vmem:[%s6214_s12 + $0x48] sm:$0xff]  ;;  %v2570_v40 = vld [vmem:[%s6214_s12 + $0x50] sm:$0xff] }
 0x1c7   : > { %2679 = vmatprep.mubr.f32.mxu1 %v2563_v57  ;;  %4937 = vmatprep.mubr.f32.mxu0 %v2584_v58  ;;  %v2550_v39 = vld [vmem:[%s6220_s17 + $0x48] sm:$0xff]  ;;  %v6461_v43 = vld [vmem:[%s6970_s6 + $0xa0] sm:$0xff]  ;;  %v2551_v46 = vld [vmem:[%s6220_s17 + $0x50] sm:$0xff] }
 0x1c8   : > { %4463 = vmatpush3.msra.mxu0 %v6280_v59  ;;  %4957 = vmatpush3.msra.mxu1 %v6272_v56  ;;  %v6441_v17 = vld [vmem:[%s6970_s6 + $0xa8] sm:$0xff]  ;;  %v6469_v47 = vld [vmem:[%s6970_s6 + $0x20] sm:$0xff]  ;;  %v2571_v51 = vld [vmem:[%s6214_s12 + $0x58] sm:$0xff] }
 0x1c9   : > { %4464 = vmatprep.subr.mxu0 %v6289_v62  ;;  %4958 = vmatprep.subr.mxu1 %v6295_v63  ;;  %v6449_v41 = vld [vmem:[%s6970_s6 + $0x28] sm:$0xff]  ;;  %v6475_v50 = vld [vmem:[%s6970_s6 + $0x120] sm:$0xff]  ;;  %v6482_v53 = vld [vmem:[%s6970_s6 + $0x98] sm:$0xff] }
 0x1ca   : > { %2680 = vmatmul.mubr.f32.gmra.mxu1 %v2544_v60  ;;  %4938 = vmatmul.mubr.f32.gmra.mxu0 %v2585_v61  ;;  %v6455_v42 = vld [vmem:[%s6970_s6 + $0x128] sm:$0xff]  ;;  %v6489_v54 = vld [vmem:[%s6970_s6 + $0x18] sm:$0xff]  ;;  %v6502_v60 = vld [vmem:[%s6970_s6 + $0x90] sm:$0xff] }
 0x1cb   : > { %2684 = vmatprep.mubr.f32.mxu1 %v2564_v0  ;;  %4940 = vmatprep.mubr.f32.mxu0 %v2586_v1  ;;  %v6495_v57 = vld [vmem:[%s6970_s6 + $0x118] sm:$0xff]  ;;  %v2572_v61 = vld [vmem:[%s6214_s12 + $0x60] sm:$0xff]  ;;  %v6510_v0 = vld [vmem:[%s6970_s6 + $0x10] sm:$0xff] }
 0x1cc   : > { %4465 = vmatpush3.msra.mxu0 %v6303_v2  ;;  %4959 = vmatpush3.msra.mxu1 %v6295_v63  ;;  %v2552_v58 = vld [vmem:[%s6220_s17 + $0x58] sm:$0xff]  ;;  %v6516_v1 = vld [vmem:[%s6970_s6 + $0x110] sm:$0xff] }
 0x1cd   : > { %4466 = vmatprep.subr.mxu0 %v6312_v5  ;;  %4960 = vmatprep.subr.mxu1 %v6318_v6 }
 0x1ce   : > { %2685 = vmatmul.mubr.f32.gmra.mxu1 %v2545_v3  ;;  %4941 = vmatmul.mubr.f32.gmra.mxu0 %v2587_v4  ;;  %v6522_v3 = vld [vmem:[%s6970_s6 + $0x88] sm:$0xff]  ;;  %v2553_v4 = vld [vmem:[%s6220_s17 + $0x60] sm:$0xff] }
 0x1cf   : > { %2689 = vmatprep.mubr.f32.mxu1 %v2565_v7  ;;  %4943 = vmatprep.mubr.f32.mxu0 %v2588_v8  ;;  %v6530_v7 = vld [vmem:[%s6970_s6 + $0x8] sm:$0xff] }
 0x1d0   : > { %4467 = vmatpush3.msra.mxu0 %v6326_v9  ;;  %4961 = vmatpush3.msra.mxu1 %v6318_v6  ;;  %v6536_v8 = vld [vmem:[%s6970_s6 + $0x108] sm:$0xff] }
 0x1d1   : > { %4468 = vmatprep.subr.mxu0 %v6335_v12  ;;  %4962 = vmatprep.subr.mxu1 %v6341_v13  ;;  %6985 = vst [vmem:[#allocation12_spill] sm:$0xff] %v6536_v8 }
 0x1d2   : > { %2690 = vmatmul.mubr.f32.gmra.mxu1 %v2546_v10  ;;  %4944 = vmatmul.mubr.f32.gmra.mxu0 %v2589_v11  ;;  %v2573_v10 = vld [vmem:[%s6214_s12 + $0x68] sm:$0xff]  ;;  %v6543_v11 = vld [vmem:[%s6970_s6 + $0x80] sm:$0xff] }
 0x1d3   : > { %2694 = vmatprep.mubr.f32.mxu1 %v2566_v14  ;;  %4946 = vmatprep.mubr.f32.mxu0 %v2590_v15  ;;  %6986 = vst [vmem:[#allocation13_spill] sm:$0xff] %v6543_v11  ;;  %v6550_v14 = vld [vmem:[%s6970_s6] sm:$0xff] }
 0x1d4   : > { %4469 = vmatpush3.msra.mxu0 %v6349_v16  ;;  %4963 = vmatpush3.msra.mxu1 %v6341_v13  ;;  %6987 = vst [vmem:[#allocation14_spill] sm:$0xff] %v6550_v14  ;;  %v6556_v15 = vld [vmem:[%s6970_s6 + $0x100] sm:$0xff] }
 0x1d5   : > { %4470 = vmatprep.subr.mxu0 %v6358_v20  ;;  %4964 = vmatprep.subr.mxu1 %v6364_v21  ;;  %6988 = vst [vmem:[#allocation15_spill] sm:$0xff] %v6556_v15 }
 0x1d6   : > { %2695 = vmatmul.mubr.f32.gmra.mxu1 %v2547_v18  ;;  %4947 = vmatmul.mubr.f32.gmra.mxu0 %v2591_v19  ;;  %v2554_v18 = vld [vmem:[%s6220_s17 + $0x68] sm:$0xff]  ;;  %v2574_v19 = vld [vmem:[%s6214_s12 + $0x70] sm:$0xff] }
 0x1d7   : > { %2699 = vmatprep.mubr.f32.mxu1 %v2567_v22  ;;  %4949 = vmatprep.mubr.f32.mxu0 %v2592_v23  ;;  %v5215_v22 = vld [vmem:[%s6970_s6 + $0xf8] sm:$0xff]  ;;  %v2555_v23 = vld [vmem:[%s6220_s17 + $0x70] sm:$0xff] }
 0x1d8   : > { %4471 = vmatpush3.msra.mxu0 %v6372_v24  ;;  %4965 = vmatpush3.msra.mxu1 %v6364_v21 }
 0x1d9   : > { %4472 = vmatprep.subr.mxu0 %v6381_v27  ;;  %4966 = vmatprep.subr.mxu1 %v6387_v28 }
 0x1da   : > { %2700 = vmatmul.mubr.f32.gmra.mxu1 %v2548_v25  ;;  %4950 = vmatmul.mubr.f32.gmra.mxu0 %v2593_v26  ;;  %v2575_v25 = vld [vmem:[%s6214_s12 + $0x78] sm:$0xff]  ;;  %s4210_s12 = sld [smem:[#allocation6 + $0x1]] }
 0x1db   : > { %2704 = vmatprep.mubr.f32.mxu1 %v2568_v29  ;;  %4473 = vmatpush3.msra.mxu0 %v6394_v30  ;;  %v2556_v26 = vld [vmem:[%s6220_s17 + $0x78] sm:$0xff]  ;;  %s4207_s17 = sld [smem:[#allocation4 + $0x1]] }
 0x1dc   : > { %4474 = vmatprep.subr.mxu0 %v6400_v31  ;;  %4967 = vmatpush3.msra.mxu1 %v6387_v28 }
 0x1dd   : > { %4475 = vmatpush3.msra.mxu0 %v6408_v33  ;;  %4968 = vmatprep.subr.mxu1 %v6414_v34 }
 0x1de   : > { %2705 = vmatmul.mubr.f32.gmra.mxu1 %v2549_v32  ;;  %4476 = vmatprep.subr.mxu0 %v6421_v36 }
 0x1df   : > { %2709 = vmatprep.mubr.f32.mxu1 %v2569_v35  ;;  %4969 = vmatpush3.msra.mxu1 %v6414_v34 }
 0x1e0   : > { %4477 = vmatpush3.msra.mxu0 %v6428_v37  ;;  %4970 = vmatprep.subr.mxu1 %v6434_v38  ;;  %s4211_s30 = sshll.u32 %s4210_s12, 7  ;;  %s4218_s12 = sshll.u32 %s4213_s1, 7 }
 0x1e1   : > { %4478 = vmatprep.subr.mxu0 %v6441_v17  ;;  %4971 = vmatpush3.msra.mxu1 %v6434_v38  ;;  %s4212_s18 = sshll.u32 %s4207_s17, 7  ;;  %s6606_s20 = scalar_lea.vmem [#allocation2], %s4211_s30 }
 0x1e2   : > { %2710 = vmatmul.mubr.f32.gmra.mxu1 %v2550_v39  ;;  %4479 = vmatpush3.msra.mxu0 %v6449_v41  ;;  %v6572_v39 = vld [vmem:[%s6971_s7] ss:$0 sm:$0xff]  ;;  %s6609_s21 = scalar_lea.vmem [#allocation2], %s4212_s18  ;;  %s4215_s17 = sshll.u32 %s4214_s22, 7 }
 0x1e3   : > { %2714 = vmatprep.mubr.f32.mxu1 %v2570_v40  ;;  %4972 = vmatprep.subr.mxu1 %v6455_v42  ;;  %s6757_s30 = scalar_lea.vmem [#allocation2], %s4218_s12  ;;  %s6760_s18 = scalar_lea.vmem [#allocation2], %s4215_s17 }
 0x1e4   : > { %4480 = vmatprep.subr.mxu0 %v6461_v43  ;;  %4973 = vmatpush3.msra.mxu1 %v6455_v42  ;;  %s3881_s22 = scalar_lea.sflag [#allocation9], %s5677_s24 }
 0x1e5   : > { %4481 = vmatpush3.msra.mxu0 %v6469_v47  ;;  %4974 = vmatprep.subr.mxu1 %v6475_v50 }
 0x1e6   : > { %2715 = vmatmul.mubr.f32.gmra.mxu1 %v2551_v46  ;;  %4482 = vmatprep.subr.mxu0 %v6482_v53 }
 0x1e7   : > { %2719 = vmatprep.mubr.f32.mxu1 %v2571_v51  ;;  %4975 = vmatpush3.msra.mxu1 %v6475_v50 }
 0x1e8   : > { %4483 = vmatpush3.msra.mxu0 %v6489_v54  ;;  %4976 = vmatprep.subr.mxu1 %v6495_v57 }
 0x1e9   : > { %4484 = vmatprep.subr.mxu0 %v6502_v60  ;;  %4977 = vmatpush3.msra.mxu1 %v6495_v57 }
 0x1ea   : > { %2720 = vmatmul.mubr.f32.gmra.mxu1 %v2552_v58  ;;  %4485 = vmatpush3.msra.mxu0 %v6510_v0 }
 0x1eb   : > { %2724 = vmatprep.mubr.f32.mxu1 %v2572_v61  ;;  %4978 = vmatprep.subr.mxu1 %v6516_v1 }
 0x1ec   : > { %4486 = vmatprep.subr.mxu0 %v6522_v3  ;;  %4979 = vmatpush3.msra.mxu1 %v6516_v1 }
 0x1ed   : > { %4487 = vmatpush3.msra.mxu0 %v6530_v7  ;;  %4980 = vmatprep.subr.mxu1 %v6536_v8 }
 0x1ee   : > { %2725 = vmatmul.mubr.f32.gmra.mxu1 %v2553_v4  ;;  %4488 = vmatprep.subr.mxu0 %v6543_v11 }
 0x1ef   : > { %2729 = vmatprep.mubr.f32.mxu1 %v2573_v10  ;;  %4981 = vmatpush3.msra.mxu1 %v6536_v8 }
 0x1f0   : > { %4489 = vmatpush3.msra.mxu0 %v6550_v14  ;;  %4982 = vmatprep.subr.mxu1 %v6556_v15 }
 0x1f1   : > { %4983 = vmatpush3.msra.mxu1 %v6556_v15  ;;  %5008 = vmatprep.subr.mxu0 %v6235_v45 }
 0x1f2   : > { %2730 = vmatmul.mubr.f32.gmra.mxu1 %v2554_v18  ;;  %4570 = vmatprep.subr.mxu1 %v5215_v22 }
 0x1f3   : > { %2734 = vmatprep.mubr.f32.mxu1 %v2574_v19 }
 0x1f6   : > { %2735 = vmatmul.mubr.f32.gmra.mxu1 %v2555_v23 }
 0x1f7   : > { %2739 = vmatprep.mubr.f32.mxu1 %v2575_v25 }
 0x1fa   : > { %2740 = vmatmul.mubr.f32.gmra.mxu1 %v2556_v26 }
 0x27e   : > { %v4378_v29 = vpop.f32.mrf.mxu1  ;;  %v4930_v32 = vpop.f32.mrf.mxu0 }
 0x280   : > { %v4379_v35 = vpop.f32.mrf.mxu1  ;;  %v2811_v58 = vpop.f32.mrf.mxu0 }
 0x281   : > { %v4380_v40 = vadd.f32 %v4379_v35, %v4378_v29 }
 0x282   : > { %v4381_v46 = vpop.f32.mrf.mxu1  ;;  %v4933_v23 = vpop.f32.mrf.mxu0 }
 0x283   : > { %v2667_v51 = vadd.f32 %v4380_v40, %v6572_v39 }
 0x284   : > { %v4382_v61 = vpop.f32.mrf.mxu1  ;;  %v2821_v40 = vpop.f32.mrf.mxu0 }
 0x285   : > { %v2812_v4 = vadd.f32 %v2811_v58, %v2667_v51  ;;  %v4383_v10 = vadd.f32 %v4382_v61, %v4381_v46 }
 0x286   : > { %v4384_v18 = vpop.f32.mrf.mxu1 }
 0x287   : > { %v2890_v19 = vmax.f32 %v2812_v4, 0.0  ;;  %v2672_v22 = vadd.f32 %v4383_v10, %v6572_v39  ;;  %v4936_v10 = vpop.f32.mrf.mxu0 }
 0x288   : > { %v4385_v25 = vpop.f32.mrf.mxu1 }
 0x289   : > { %2906 = vst [vmem:[%s6217_s13] sm:$0xff] %v2890_v19  ;;  %v2817_v26 = vadd.f32 %v4930_v32, %v2672_v22  ;;  %v4386_v15 = vadd.f32 %v4385_v25, %v4384_v18  ;;  %v2831_v25 = vpop.f32.mrf.mxu0 }
 0x28a   : > { %v4387_v14 = vpop.f32.mrf.mxu1 }
 0x28b   : > { %v2891_v29 = vmax.f32 %v2817_v26, 0.0  ;;  %v2677_v35 = vadd.f32 %v4386_v15, %v6572_v39 }
 0x28c   : > { %v4388_v11 = vpop.f32.mrf.mxu1 }
 0x28d   : > { %2907 = vst [vmem:[%s6217_s13 + $0x8] sm:$0xff] %v2891_v29  ;;  %v2822_v51 = vadd.f32 %v2821_v40, %v2677_v35  ;;  %v4389_v46 = vadd.f32 %v4388_v11, %v4387_v14 }
 0x28e   : > { %v4390_v58 = vpop.f32.mrf.mxu1 }
 0x28f   : > { %v2892_v61 = vmax.f32 %v2822_v51, 0.0  ;;  %v2682_v4 = vadd.f32 %v4389_v46, %v6572_v39  ;;  %v4939_v51 = vpop.f32.mrf.mxu0 }
 0x290   : > { %v4391_v8 = vpop.f32.mrf.mxu1 }
 0x291   : > { %2908 = vst [vmem:[%s6217_s13 + $0x10] sm:$0xff] %v2892_v61  ;;  %v2827_v32 = vadd.f32 %v4933_v23, %v2682_v4  ;;  %v4392_v18 = vadd.f32 %v4391_v8, %v4390_v58 }
 0x292   : > { %v4393_v19 = vpop.f32.mrf.mxu1 }
 0x293   : > { %v2893_v22 = vmax.f32 %v2827_v32, 0.0  ;;  %v2687_v15 = vadd.f32 %v4392_v18, %v6572_v39  ;;  %v2841_v32 = vpop.f32.mrf.mxu0 }
 0x294   : > { %v4394_v26 = vpop.f32.mrf.mxu1 }
 0x295   : > { %2909 = vst [vmem:[%s6217_s13 + $0x18] sm:$0xff] %v2893_v22  ;;  %v2832_v29 = vadd.f32 %v2831_v25, %v2687_v15  ;;  %v4395_v11 = vadd.f32 %v4394_v26, %v4393_v19 }
 0x296   : > { %v4396_v14 = vpop.f32.mrf.mxu1 }
 0x297   : > { %v2894_v35 = vmax.f32 %v2832_v29, 0.0  ;;  %v2692_v40 = vadd.f32 %v4395_v11, %v6572_v39  ;;  %v4942_v29 = vpop.f32.mrf.mxu0 }
 0x298   : > { %v4397_v46 = vpop.f32.mrf.mxu1 }
 0x299   : > { %2910 = vst [vmem:[%s6217_s13 + $0x20] sm:$0xff] %v2894_v35  ;;  %v2837_v23 = vadd.f32 %v4936_v10, %v2692_v40  ;;  %v4398_v8 = vadd.f32 %v4397_v46, %v4396_v14 }
 0x29a   : > { %v4399_v58 = vpop.f32.mrf.mxu1 }
 0x29b   : > { %v2895_v61 = vmax.f32 %v2837_v23, 0.0  ;;  %v2697_v4 = vadd.f32 %v4398_v8, %v6572_v39  ;;  %v2851_v23 = vpop.f32.mrf.mxu0 }
 0x29c   : > { %v4400_v18 = vpop.f32.mrf.mxu1 }
 0x29d   : > { %2911 = vst [vmem:[%s6217_s13 + $0x28] sm:$0xff] %v2895_v61  ;;  %v2842_v22 = vadd.f32 %v2841_v32, %v2697_v4  ;;  %v4401_v19 = vadd.f32 %v4400_v18, %v4399_v58 }
 0x29e   : > { %v4402_v15 = vpop.f32.mrf.mxu1 }
 0x29f   : > { %v2896_v25 = vmax.f32 %v2842_v22, 0.0  ;;  %v2702_v26 = vadd.f32 %v4401_v19, %v6572_v39  ;;  %v4945_v22 = vpop.f32.mrf.mxu0 }
 0x2a0   : > { %v4403_v11 = vpop.f32.mrf.mxu1 }
 0x2a1   : > { %2912 = vst [vmem:[%s6217_s13 + $0x30] sm:$0xff] %v2896_v25  ;;  %v2847_v10 = vadd.f32 %v4939_v51, %v2702_v26  ;;  %v4404_v14 = vadd.f32 %v4403_v11, %v4402_v15 }
 0x2a2   : > { %v4405_v35 = vpop.f32.mrf.mxu1 }
 0x2a3   : > { %v2897_v40 = vmax.f32 %v2847_v10, 0.0  ;;  %v2707_v46 = vadd.f32 %v4404_v14, %v6572_v39  ;;  %v2861_v10 = vpop.f32.mrf.mxu0 }
 0x2a4   : > { %v4406_v8 = vpop.f32.mrf.mxu1 }
 0x2a5   : > { %2913 = vst [vmem:[%s6217_s13 + $0x38] sm:$0xff] %v2897_v40  ;;  %v2852_v61 = vadd.f32 %v2851_v23, %v2707_v46  ;;  %v4407_v58 = vadd.f32 %v4406_v8, %v4405_v35 }
 0x2a6   : > { %v4408_v4 = vpop.f32.mrf.mxu1 }
 0x2a7   : > { %v2898_v32 = vmax.f32 %v2852_v61, 0.0  ;;  %v2712_v18 = vadd.f32 %v4407_v58, %v6572_v39  ;;  %v4948_v61 = vpop.f32.mrf.mxu0 }
 0x2a8   : > { %v4409_v19 = vpop.f32.mrf.mxu1 }
 0x2a9   : > { %2914 = vst [vmem:[%s6217_s13 + $0x40] sm:$0xff] %v2898_v32  ;;  %v2857_v51 = vadd.f32 %v4942_v29, %v2712_v18  ;;  %v4410_v15 = vadd.f32 %v4409_v19, %v4408_v4 }
 0x2aa   : > { %v4411_v25 = vpop.f32.mrf.mxu1 }
 0x2ab   : > { %v2899_v26 = vmax.f32 %v2857_v51, 0.0  ;;  %v2717_v11 = vadd.f32 %v4410_v15, %v6572_v39  ;;  %v2871_v51 = vpop.f32.mrf.mxu0 }
 0x2ac   : > { %v4412_v14 = vpop.f32.mrf.mxu1 }
 0x2ad   : > { %2915 = vst [vmem:[%s6217_s13 + $0x48] sm:$0xff] %v2899_v26  ;;  %v2862_v40 = vadd.f32 %v2861_v10, %v2717_v11  ;;  %v4413_v35 = vadd.f32 %v4412_v14, %v4411_v25 }
 0x2ae   : > { %v4414_v46 = vpop.f32.mrf.mxu1 }
 0x2af   : > { %v2900_v23 = vmax.f32 %v2862_v40, 0.0  ;;  %v2722_v8 = vadd.f32 %v4413_v35, %v6572_v39  ;;  %v4951_v40 = vpop.f32.mrf.mxu0 }
 0x2b0   : > { %v4415_v58 = vpop.f32.mrf.mxu1 }
 0x2b1   : > { %2916 = vst [vmem:[%s6217_s13 + $0x50] sm:$0xff] %v2900_v23  ;;  %v2867_v29 = vadd.f32 %v4945_v22, %v2722_v8  ;;  %v4416_v4 = vadd.f32 %v4415_v58, %v4414_v46 }
 0x2b2   : > { %v4417_v32 = vpop.f32.mrf.mxu1 }
 0x2b3   : > { %v2901_v18 = vmax.f32 %v2867_v29, 0.0  ;;  %v2727_v19 = vadd.f32 %v4416_v4, %v6572_v39  ;;  %v2881_v29 = vpop.f32.mrf.mxu0 }
 0x2b4   : > { %v4418_v15 = vpop.f32.mrf.mxu1 }
 0x2b5   : > { %2917 = vst [vmem:[%s6217_s13 + $0x58] sm:$0xff] %v2901_v18  ;;  %v2872_v26 = vadd.f32 %v2871_v51, %v2727_v19  ;;  %v4419_v25 = vadd.f32 %v4418_v15, %v4417_v32 }
 0x2b6   : > { %v4420_v11 = vpop.f32.mrf.mxu1 }
 0x2b7   : > { %v2902_v10 = vmax.f32 %v2872_v26, 0.0  ;;  %v2732_v14 = vadd.f32 %v4419_v25, %v6572_v39 }
 0x2b8   : > { %v4421_v35 = vpop.f32.mrf.mxu1 }
 0x2b9   : > { %2918 = vst [vmem:[%s6217_s13 + $0x60] sm:$0xff] %v2902_v10  ;;  %v2877_v22 = vadd.f32 %v4948_v61, %v2732_v14  ;;  %v4422_v46 = vadd.f32 %v4421_v35, %v4420_v11 }
 0x2ba   : > { %v4423_v23 = vpop.f32.mrf.mxu1 }
 0x2bb   : > { %v2903_v8 = vmax.f32 %v2877_v22, 0.0  ;;  %v2737_v58 = vadd.f32 %v4422_v46, %v6572_v39 }
 0x2bc   : > { %v4424_v4 = vpop.f32.mrf.mxu1 }
 0x2bd   : > { %2919 = vst [vmem:[%s6217_s13 + $0x68] sm:$0xff] %v2903_v8  ;;  %v2882_v32 = vadd.f32 %v2881_v29, %v2737_v58  ;;  %v4425_v18 = vadd.f32 %v4424_v4, %v4423_v23 }
 0x2bf   : > { %v2904_v19 = vmax.f32 %v2882_v32, 0.0  ;;  %v2742_v51 = vadd.f32 %v4425_v18, %v6572_v39 }
 0x2c1   : > { %2920 = vst [vmem:[%s6217_s13 + $0x70] sm:$0xff] %v2904_v19  ;;  %v2887_v15 = vadd.f32 %v4951_v40, %v2742_v51 }
 0x2c3   : > { %v2905_v61 = vmax.f32 %v2887_v15, 0.0 }
 0x2c5   : > { %2921 = vst [vmem:[%s6217_s13 + $0x78] sm:$0xff] %v2905_v61  ;;  %s4216_s13 = sld [smem:[#allocation6 + $0x2]] }
 0x2cb   : > { %s4217_s23 = sshll.u32 %s4216_s13, 7 }
 0x2cc   : > { %v2945_v26 = vld [vmem:[%s6606_s20] sm:$0xff]  ;;  %v2964_v10 = vld [vmem:[%s6609_s21 + $0x8] sm:$0xff]  ;;  %v2965_v40 = vld [vmem:[%s6609_s21 + $0x10] sm:$0xff]  ;;  %s6754_s25 = scalar_lea.vmem [#allocation2], %s4217_s23  ;;  %s5320_s23 = smov [#allocation8]  }
 0x2cd   : > { %v2963_v25 = vld [vmem:[%s6609_s21] sm:$0xff]  ;;  %3043 = vmatprep.mubr.f32.mxu0 %v2945_v26  ;;  %v2946_v14 = vld [vmem:[%s6606_s20 + $0x8] sm:$0xff]  ;;  %v2966_v22 = vld [vmem:[%s6609_s21 + $0x18] sm:$0xff]  ;;  %s5257_s12 = sshll.u32 %s5320_s23, 4  ;;  %s5258_s12 = int_to_ptr.vmem [resolvable:$false] %s5257_s12 }
 0x2ce   : > { %v2926_v11 = vld [vmem:[%s6612_s0] sm:$0xff]  ;;  %4984 = vmatprep.mubr.f32.mxu1 %v2963_v25  ;;  %v2927_v35 = vld [vmem:[%s6612_s0 + $0x8] sm:$0xff]  ;;  %v2947_v46 = vld [vmem:[%s6606_s20 + $0x10] sm:$0xff]  ;;  %s5259_s17 = scalar_lea.vmem %s5258_s12, 4096 }
 0x2cf   : > { %3044 = vmatmul.mubr.f32.vlgmr.msra.gmra.mxu0 %v2926_v11  ;;  %4985 = vmatmul.mubr.f32.vlgmr.msra.gmra.mxu1 %v2964_v10  ;;  %v2967_v23 = vld [vmem:[%s6609_s21 + $0x20] sm:$0xff]  ;;  %v2969_v8 = vld [vmem:[%s6609_s21 + $0x30] sm:$0xff] }
 0x2d0   : > { %3048 = vmatprep.mubr.f32.mxu0 %v2946_v14  ;;  %4987 = vmatprep.mubr.f32.mxu1 %v2965_v40  ;;  %v2971_v58 = vld [vmem:[%s6609_s21 + $0x40] sm:$0xff]  ;;  %v2973_v29 = vld [vmem:[%s6609_s21 + $0x50] sm:$0xff] }
 0x2d1   : > { %4571 = vmatpush3.msra.mxu1 %v6229_v44  ;;  %5009 = vmatpush3.msra.mxu0 %v6235_v45  ;;  %v2928_v44 = vld [vmem:[%s6612_s0 + $0x10] sm:$0xff]  ;;  %v2968_v45 = vld [vmem:[%s6609_s21 + $0x28] sm:$0xff]  ;;  %v2975_v4 = vld [vmem:[%s6609_s21 + $0x60] sm:$0xff] }
 0x2d2   : > { %4572 = vmatprep.subr.mxu1 %v6243_v48  ;;  %5010 = vmatprep.subr.mxu0 %v6249_v49  ;;  %v2948_v48 = vld [vmem:[%s6606_s20 + $0x18] sm:$0xff]  ;;  %v2977_v32 = vld [vmem:[%s6609_s21 + $0x70] sm:$0xff] }
 0x2d3   : > { %3049 = vmatmul.mubr.f32.gmra.mxu0 %v2927_v35  ;;  %4988 = vmatmul.mubr.f32.gmra.mxu1 %v2966_v22 }
 0x2d4   : > { %3053 = vmatprep.mubr.f32.mxu0 %v2947_v46  ;;  %4990 = vmatprep.mubr.f32.mxu1 %v2967_v23 }
 0x2d5   : > { %4573 = vmatpush3.msra.mxu1 %v6257_v52  ;;  %5011 = vmatpush3.msra.mxu0 %v6249_v49  ;;  %v2929_v49 = vld [vmem:[%s6612_s0 + $0x18] sm:$0xff] }
 0x2d6   : > { %4574 = vmatprep.subr.mxu1 %v6266_v55  ;;  %5012 = vmatprep.subr.mxu0 %v6272_v56  ;;  %v2970_v52 = vld [vmem:[%s6609_s21 + $0x38] sm:$0xff]  ;;  %v2949_v55 = vld [vmem:[%s6606_s20 + $0x20] sm:$0xff] }
 0x2d7   : > { %3054 = vmatmul.mubr.f32.gmra.mxu0 %v2928_v44  ;;  %4991 = vmatmul.mubr.f32.gmra.mxu1 %v2968_v45 }
 0x2d8   : > { %3058 = vmatprep.mubr.f32.mxu0 %v2948_v48  ;;  %4993 = vmatprep.mubr.f32.mxu1 %v2969_v8 }
 0x2d9   : > { %4575 = vmatpush3.msra.mxu1 %v6280_v59  ;;  %5013 = vmatpush3.msra.mxu0 %v6272_v56  ;;  %v2930_v56 = vld [vmem:[%s6612_s0 + $0x20] sm:$0xff]  ;;  %v2972_v59 = vld [vmem:[%s6609_s21 + $0x48] sm:$0xff] }
 0x2da   : > { %4576 = vmatprep.subr.mxu1 %v6289_v62  ;;  %5014 = vmatprep.subr.mxu0 %v6295_v63  ;;  %v2950_v62 = vld [vmem:[%s6606_s20 + $0x28] sm:$0xff] }
 0x2db   : > { %3059 = vmatmul.mubr.f32.gmra.mxu0 %v2929_v49  ;;  %4994 = vmatmul.mubr.f32.gmra.mxu1 %v2970_v52 }
 0x2dc   : > { %3063 = vmatprep.mubr.f32.mxu0 %v2949_v55  ;;  %4996 = vmatprep.mubr.f32.mxu1 %v2971_v58 }
 0x2dd   : > { %4577 = vmatpush3.msra.mxu1 %v6303_v2  ;;  %5015 = vmatpush3.msra.mxu0 %v6295_v63  ;;  %v2931_v63 = vld [vmem:[%s6612_s0 + $0x28] sm:$0xff]  ;;  %v2974_v2 = vld [vmem:[%s6609_s21 + $0x58] sm:$0xff] }
 0x2de   : > { %4578 = vmatprep.subr.mxu1 %v6312_v5  ;;  %5016 = vmatprep.subr.mxu0 %v6318_v6  ;;  %v2951_v5 = vld [vmem:[%s6606_s20 + $0x30] sm:$0xff] }
 0x2df   : > { %3064 = vmatmul.mubr.f32.gmra.mxu0 %v2930_v56  ;;  %4997 = vmatmul.mubr.f32.gmra.mxu1 %v2972_v59 }
 0x2e0   : > { %3068 = vmatprep.mubr.f32.mxu0 %v2950_v62  ;;  %4999 = vmatprep.mubr.f32.mxu1 %v2973_v29 }
 0x2e1   : > { %4579 = vmatpush3.msra.mxu1 %v6326_v9  ;;  %5017 = vmatpush3.msra.mxu0 %v6318_v6  ;;  %v2932_v6 = vld [vmem:[%s6612_s0 + $0x30] sm:$0xff]  ;;  %v2976_v9 = vld [vmem:[%s6609_s21 + $0x68] sm:$0xff] }
 0x2e2   : > { %4580 = vmatprep.subr.mxu1 %v6335_v12  ;;  %5018 = vmatprep.subr.mxu0 %v6341_v13  ;;  %v2952_v12 = vld [vmem:[%s6606_s20 + $0x38] sm:$0xff] }
 0x2e3   : > { %3069 = vmatmul.mubr.f32.gmra.mxu0 %v2931_v63  ;;  %5000 = vmatmul.mubr.f32.gmra.mxu1 %v2974_v2 }
 0x2e4   : > { %3073 = vmatprep.mubr.f32.mxu0 %v2951_v5  ;;  %5002 = vmatprep.mubr.f32.mxu1 %v2975_v4 }
 0x2e5   : > { %4581 = vmatpush3.msra.mxu1 %v6349_v16  ;;  %5019 = vmatpush3.msra.mxu0 %v6341_v13  ;;  %v2933_v13 = vld [vmem:[%s6612_s0 + $0x38] sm:$0xff] }
 0x2e6   : > { %4582 = vmatprep.subr.mxu1 %v6358_v20  ;;  %5020 = vmatprep.subr.mxu0 %v6364_v21  ;;  %v2978_v16 = vld [vmem:[%s6609_s21 + $0x78] sm:$0xff]  ;;  %v2953_v20 = vld [vmem:[%s6606_s20 + $0x40] sm:$0xff] }
 0x2e7   : > { %3074 = vmatmul.mubr.f32.gmra.mxu0 %v2932_v6  ;;  %5003 = vmatmul.mubr.f32.gmra.mxu1 %v2976_v9 }
 0x2e8   : > { %3078 = vmatprep.mubr.f32.mxu0 %v2952_v12  ;;  %5005 = vmatprep.mubr.f32.mxu1 %v2977_v32 }
 0x2e9   : > { %4583 = vmatpush3.msra.mxu1 %v6372_v24  ;;  %5021 = vmatpush3.msra.mxu0 %v6364_v21  ;;  %v2934_v21 = vld [vmem:[%s6612_s0 + $0x40] sm:$0xff]  ;;  %v2954_v24 = vld [vmem:[%s6606_s20 + $0x48] sm:$0xff] }
 0x2ea   : > { %4584 = vmatprep.subr.mxu1 %v6381_v27  ;;  %5022 = vmatprep.subr.mxu0 %v6387_v28  ;;  %v2935_v27 = vld [vmem:[%s6612_s0 + $0x48] sm:$0xff] }
 0x2eb   : > { %3079 = vmatmul.mubr.f32.gmra.mxu0 %v2933_v13  ;;  %5006 = vmatmul.mubr.f32.gmra.mxu1 %v2978_v16 }
 0x2ec   : > { %3083 = vmatprep.mubr.f32.mxu0 %v2953_v20  ;;  %4585 = vmatpush3.msra.mxu1 %v6394_v30  ;;  %v2936_v30 = vld [vmem:[%s6612_s0 + $0x50] sm:$0xff] }
 0x2ed   : > { %4586 = vmatprep.subr.mxu1 %v6400_v31  ;;  %5023 = vmatpush3.msra.mxu0 %v6387_v28  ;;  %v2955_v28 = vld [vmem:[%s6606_s20 + $0x50] sm:$0xff]  ;;  %v2956_v31 = vld [vmem:[%s6606_s20 + $0x58] sm:$0xff] }
 0x2ee   : > { %4587 = vmatpush3.msra.mxu1 %v6408_v33  ;;  %5024 = vmatprep.subr.mxu0 %v6414_v34  ;;  %v2937_v33 = vld [vmem:[%s6612_s0 + $0x58] sm:$0xff] }
 0x2ef   : > { %3084 = vmatmul.mubr.f32.gmra.mxu0 %v2934_v21  ;;  %4588 = vmatprep.subr.mxu1 %v6421_v36  ;;  %v2938_v36 = vld [vmem:[%s6612_s0 + $0x60] sm:$0xff] }
 0x2f0   : > { %3088 = vmatprep.mubr.f32.mxu0 %v2954_v24  ;;  %5025 = vmatpush3.msra.mxu0 %v6414_v34  ;;  %v2957_v34 = vld [vmem:[%s6606_s20 + $0x60] sm:$0xff] }
 0x2f1   : > { %4589 = vmatpush3.msra.mxu1 %v6428_v37  ;;  %5026 = vmatprep.subr.mxu0 %v6434_v38  ;;  %v6989_v37 = vld [vmem:[#allocation12_spill] sm:$0xff] }
 0x2f2   : > { %4590 = vmatprep.subr.mxu1 %v6441_v17  ;;  %5027 = vmatpush3.msra.mxu0 %v6434_v38  ;;  %v2958_v38 = vld [vmem:[%s6606_s20 + $0x68] sm:$0xff] }
 0x2f3   : > { %3089 = vmatmul.mubr.f32.gmra.mxu0 %v2935_v27  ;;  %4591 = vmatpush3.msra.mxu1 %v6449_v41  ;;  %v6990_v17 = vld [vmem:[#allocation13_spill] sm:$0xff]  ;;  %v6991_v41 = vld [vmem:[#allocation14_spill] sm:$0xff] }
 0x2f4   : > { %3093 = vmatprep.mubr.f32.mxu0 %v2955_v28  ;;  %5028 = vmatprep.subr.mxu0 %v6455_v42 }
 0x2f5   : > { %4592 = vmatprep.subr.mxu1 %v6461_v43  ;;  %5029 = vmatpush3.msra.mxu0 %v6455_v42  ;;  %v6992_v42 = vld [vmem:[#allocation15_spill] sm:$0xff]  ;;  %v2939_v43 = vld [vmem:[%s6612_s0 + $0x68] sm:$0xff] }
 0x2f6   : > { %4593 = vmatpush3.msra.mxu1 %v6469_v47  ;;  %5030 = vmatprep.subr.mxu0 %v6475_v50  ;;  %v2959_v47 = vld [vmem:[%s6606_s20 + $0x70] sm:$0xff] }
 0x2f7   : > { %3094 = vmatmul.mubr.f32.gmra.mxu0 %v2936_v30  ;;  %4594 = vmatprep.subr.mxu1 %v6482_v53  ;;  %v2960_v53 = vld [vmem:[%s6606_s20 + $0x78] sm:$0xff]  ;;  %s4226_s20 = sshll.u32 %s3979_s29, 11 }
 0x2f8   : > { %3098 = vmatprep.mubr.f32.mxu0 %v2956_v31  ;;  %5031 = vmatpush3.msra.mxu0 %v6475_v50  ;;  %v2940_v50 = vld [vmem:[%s6612_s0 + $0x70] sm:$0xff]  ;;  %s6919_s1 = scalar_lea.hbm %s6974_s10, %s4226_s20 }
 0x2f9   : > { %4595 = vmatpush3.msra.mxu1 %v6489_v54  ;;  %5032 = vmatprep.subr.mxu0 %v6495_v57  ;;  %v2941_v54 = vld [vmem:[%s6612_s0 + $0x78] sm:$0xff] }
 0x2fa   : > { %4596 = vmatprep.subr.mxu1 %v6502_v60  ;;  %5033 = vmatpush3.msra.mxu0 %v6495_v57 }
 0x2fb   : > { %3099 = vmatmul.mubr.f32.gmra.mxu0 %v2937_v33  ;;  %4597 = vmatpush3.msra.mxu1 %v6510_v0 }
 0x2fc   : > { %3103 = vmatprep.mubr.f32.mxu0 %v2957_v34  ;;  %5034 = vmatprep.subr.mxu0 %v6516_v1 }
 0x2fd   : > { %4598 = vmatprep.subr.mxu1 %v6522_v3  ;;  %5035 = vmatpush3.msra.mxu0 %v6516_v1 }
 0x2fe   : > { %4599 = vmatpush3.msra.mxu1 %v6530_v7  ;;  %5036 = vmatprep.subr.mxu0 %v6989_v37 }
 0x2ff   : > { %3104 = vmatmul.mubr.f32.gmra.mxu0 %v2938_v36  ;;  %4600 = vmatprep.subr.mxu1 %v6990_v17 }
 0x300   : > { %3108 = vmatprep.mubr.f32.mxu0 %v2958_v38  ;;  %5037 = vmatpush3.msra.mxu0 %v6989_v37 }
 0x301   : > { %4601 = vmatpush3.msra.mxu1 %v6991_v41  ;;  %5038 = vmatprep.subr.mxu0 %v6992_v42 }
 0x302   : > { %5039 = vmatpush3.msra.mxu0 %v6992_v42 }
 0x303   : > { %3109 = vmatmul.mubr.f32.gmra.mxu0 %v2939_v43 }
 0x304   : > { %3113 = vmatprep.mubr.f32.mxu0 %v2959_v47 }
 0x307   : > { %3114 = vmatmul.mubr.f32.gmra.mxu0 %v2940_v50 }
 0x308   : > { %3118 = vmatprep.mubr.f32.mxu0 %v2960_v53 }
 0x30b   : > { %3119 = vmatmul.mubr.f32.gmra.mxu0 %v2941_v54 }
 0x38f   : > { %v4490_v57 = vpop.f32.mrf.mxu0  ;;  %v4986_v60 = vpop.f32.mrf.mxu1 }
 0x391   : > { %v4491_v0 = vpop.f32.mrf.mxu0  ;;  %v3190_v18 = vpop.f32.mrf.mxu1 }
 0x392   : > { %v4492_v1 = vadd.f32 %v4491_v0, %v4490_v57 }
 0x393   : > { %v4493_v3 = vpop.f32.mrf.mxu0  ;;  %v4989_v11 = vpop.f32.mrf.mxu1 }
 0x394   : > { %v3046_v7 = vadd.f32 %v4492_v1, %v6572_v39 }
 0x395   : > { %v4494_v19 = vpop.f32.mrf.mxu0  ;;  %v3200_v23 = vpop.f32.mrf.mxu1 }
 0x396   : > { %v3191_v51 = vadd.f32 %v3190_v18, %v3046_v7  ;;  %v4495_v15 = vadd.f32 %v4494_v19, %v4493_v3 }
 0x397   : > { %v4496_v61 = vpop.f32.mrf.mxu0  ;;  %v4992_v55 = vpop.f32.mrf.mxu1 }
 0x398   : > { %v3269_v26 = vmax.f32 %v3191_v51, 0.0  ;;  %v3051_v25 = vadd.f32 %v4495_v15, %v6572_v39 }
 0x399   : > { %v4497_v10 = vpop.f32.mrf.mxu0  ;;  %v3210_v2 = vpop.f32.mrf.mxu1 }
 0x39a   : > { %3285 = vst [vmem:[%s6609_s21] sm:$0xff] %v3269_v26  ;;  %v3196_v14 = vadd.f32 %v4986_v60, %v3051_v25  ;;  %v4498_v40 = vadd.f32 %v4497_v10, %v4496_v61 }
 0x39b   : > { %v4499_v35 = vpop.f32.mrf.mxu0  ;;  %v4995_v13 = vpop.f32.mrf.mxu1 }
 0x39c   : > { %v3270_v22 = vmax.f32 %v3196_v14, 0.0  ;;  %v3056_v46 = vadd.f32 %v4498_v40, %v6572_v39 }
 0x39d   : > { %v4500_v44 = vpop.f32.mrf.mxu0  ;;  %v3220_v30 = vpop.f32.mrf.mxu1 }
 0x39e   : > { %3286 = vst [vmem:[%s6609_s21 + $0x8] sm:$0xff] %v3270_v22  ;;  %v3201_v45 = vadd.f32 %v3200_v23, %v3056_v46  ;;  %v4501_v48 = vadd.f32 %v4500_v44, %v4499_v35 }
 0x39f   : > { %v4502_v8 = vpop.f32.mrf.mxu0  ;;  %v4998_v17 = vpop.f32.mrf.mxu1 }
 0x3a0   : > { %v3271_v49 = vmax.f32 %v3201_v45, 0.0  ;;  %v3061_v52 = vadd.f32 %v4501_v48, %v6572_v39 }
 0x3a1   : > { %v4503_v58 = vpop.f32.mrf.mxu0  ;;  %v3230_v54 = vpop.f32.mrf.mxu1 }
 0x3a2   : > { %3287 = vst [vmem:[%s6609_s21 + $0x10] sm:$0xff] %v3271_v49  ;;  %v3206_v56 = vadd.f32 %v4989_v11, %v3061_v52  ;;  %v4504_v59 = vadd.f32 %v4503_v58, %v4502_v8 }
 0x3a3   : > { %v4505_v62 = vpop.f32.mrf.mxu0  ;;  %v5001_v18 = vpop.f32.mrf.mxu1 }
 0x3a4   : > { %v3272_v29 = vmax.f32 %v3206_v56, 0.0  ;;  %v3066_v63 = vadd.f32 %v4504_v59, %v6572_v39 }
 0x3a5   : > { %v4506_v5 = vpop.f32.mrf.mxu0  ;;  %v3240_v11 = vpop.f32.mrf.mxu1 }
 0x3a6   : > { %3288 = vst [vmem:[%s6609_s21 + $0x18] sm:$0xff] %v3272_v29  ;;  %v3211_v4 = vadd.f32 %v3210_v2, %v3066_v63  ;;  %v4507_v6 = vadd.f32 %v4506_v5, %v4505_v62 }
 0x3a7   : > { %v4508_v9 = vpop.f32.mrf.mxu0  ;;  %v5004_v23 = vpop.f32.mrf.mxu1 }
 0x3a8   : > { %v3273_v12 = vmax.f32 %v3211_v4, 0.0  ;;  %v3071_v32 = vadd.f32 %v4507_v6, %v6572_v39 }
 0x3a9   : > { %v4509_v16 = vpop.f32.mrf.mxu0 }
 0x3aa   : > { %3289 = vst [vmem:[%s6609_s21 + $0x20] sm:$0xff] %v3273_v12  ;;  %v3216_v20 = vadd.f32 %v4992_v55, %v3071_v32  ;;  %v4510_v21 = vadd.f32 %v4509_v16, %v4508_v9  ;;  %v3250_v55 = vpop.f32.mrf.mxu1 }
 0x3ab   : > { %v4511_v24 = vpop.f32.mrf.mxu0 }
 0x3ac   : > { %v3274_v27 = vmax.f32 %v3216_v20, 0.0  ;;  %v3076_v28 = vadd.f32 %v4510_v21, %v6572_v39  ;;  %v5007_v2 = vpop.f32.mrf.mxu1 }
 0x3ad   : > { %v4512_v31 = vpop.f32.mrf.mxu0 }
 0x3ae   : > { %3290 = vst [vmem:[%s6609_s21 + $0x28] sm:$0xff] %v3274_v27  ;;  %v3221_v33 = vadd.f32 %v3220_v30, %v3076_v28  ;;  %v4513_v34 = vadd.f32 %v4512_v31, %v4511_v24 }
 0x3af   : > { %v4514_v36 = vpop.f32.mrf.mxu0 }
 0x3b0   : > { %v3275_v37 = vmax.f32 %v3221_v33, 0.0  ;;  %v3081_v38 = vadd.f32 %v4513_v34, %v6572_v39 }
 0x3b1   : > { %v4515_v41 = vpop.f32.mrf.mxu0 }
 0x3b2   : > { %3291 = vst [vmem:[%s6609_s21 + $0x30] sm:$0xff] %v3275_v37  ;;  %v3226_v42 = vadd.f32 %v4995_v13, %v3081_v38  ;;  %v4516_v43 = vadd.f32 %v4515_v41, %v4514_v36  ;;  %v3260_v13 = vpop.f32.mrf.mxu1 }
 0x3b3   : > { %v4517_v47 = vpop.f32.mrf.mxu0 }
 0x3b4   : > { %v3276_v50 = vmax.f32 %v3226_v42, 0.0  ;;  %v3086_v53 = vadd.f32 %v4516_v43, %v6572_v39 }
 0x3b5   : > { %v4518_v57 = vpop.f32.mrf.mxu0 }
 0x3b6   : > { %3292 = vst [vmem:[%s6609_s21 + $0x38] sm:$0xff] %v3276_v50  ;;  %v3231_v60 = vadd.f32 %v3230_v54, %v3086_v53  ;;  %v4519_v0 = vadd.f32 %v4518_v57, %v4517_v47 }
 0x3b7   : > { %v4520_v1 = vpop.f32.mrf.mxu0 }
 0x3b8   : > { %v3277_v3 = vmax.f32 %v3231_v60, 0.0  ;;  %v3091_v7 = vadd.f32 %v4519_v0, %v6572_v39 }
 0x3b9   : > { %v4521_v19 = vpop.f32.mrf.mxu0 }
 0x3ba   : > { %3293 = vst [vmem:[%s6609_s21 + $0x40] sm:$0xff] %v3277_v3  ;;  %v3236_v51 = vadd.f32 %v4998_v17, %v3091_v7  ;;  %v4522_v15 = vadd.f32 %v4521_v19, %v4520_v1 }
 0x3bb   : > { %v4523_v61 = vpop.f32.mrf.mxu0 }
 0x3bc   : > { %v3278_v26 = vmax.f32 %v3236_v51, 0.0  ;;  %v3096_v25 = vadd.f32 %v4522_v15, %v6572_v39 }
 0x3bd   : > { %v4524_v10 = vpop.f32.mrf.mxu0 }
 0x3be   : > { %3294 = vst [vmem:[%s6609_s21 + $0x48] sm:$0xff] %v3278_v26  ;;  %v3241_v14 = vadd.f32 %v3240_v11, %v3096_v25  ;;  %v4525_v40 = vadd.f32 %v4524_v10, %v4523_v61 }
 0x3bf   : > { %v4526_v35 = vpop.f32.mrf.mxu0 }
 0x3c0   : > { %v3279_v22 = vmax.f32 %v3241_v14, 0.0  ;;  %v3101_v46 = vadd.f32 %v4525_v40, %v6572_v39 }
 0x3c1   : > { %v4527_v44 = vpop.f32.mrf.mxu0 }
 0x3c2   : > { %3295 = vst [vmem:[%s6609_s21 + $0x50] sm:$0xff] %v3279_v22  ;;  %v3246_v45 = vadd.f32 %v5001_v18, %v3101_v46  ;;  %v4528_v48 = vadd.f32 %v4527_v44, %v4526_v35 }
 0x3c3   : > { %v4529_v8 = vpop.f32.mrf.mxu0 }
 0x3c4   : > { %v3280_v49 = vmax.f32 %v3246_v45, 0.0  ;;  %v3106_v52 = vadd.f32 %v4528_v48, %v6572_v39 }
 0x3c5   : > { %v4530_v58 = vpop.f32.mrf.mxu0 }
 0x3c6   : > { %3296 = vst [vmem:[%s6609_s21 + $0x58] sm:$0xff] %v3280_v49  ;;  %v3251_v56 = vadd.f32 %v3250_v55, %v3106_v52  ;;  %v4531_v59 = vadd.f32 %v4530_v58, %v4529_v8 }
 0x3c7   : > { %v4532_v62 = vpop.f32.mrf.mxu0 }
 0x3c8   : > { %v3281_v29 = vmax.f32 %v3251_v56, 0.0  ;;  %v3111_v63 = vadd.f32 %v4531_v59, %v6572_v39 }
 0x3c9   : > { %v4533_v5 = vpop.f32.mrf.mxu0 }
 0x3ca   : > { %3297 = vst [vmem:[%s6609_s21 + $0x60] sm:$0xff] %v3281_v29  ;;  %v3256_v4 = vadd.f32 %v5004_v23, %v3111_v63  ;;  %v4534_v6 = vadd.f32 %v4533_v5, %v4532_v62  ;;  %v3711_v63 = vld [vmem:[%s6972_s8 + $0x78] sm:$0xff]  ;;  %v3709_v5 = vld [vmem:[%s6972_s8 + $0x68] sm:$0xff] }
 0x3cb   : > { %v4535_v9 = vpop.f32.mrf.mxu0  ;;  %5064 = vmatprep.subr.mxu0 %v3711_v63 }
 0x3cc   : > { %v3282_v12 = vmax.f32 %v3256_v4, 0.0  ;;  %v3116_v32 = vadd.f32 %v4534_v6, %v6572_v39  ;;  %v3708_v4 = vld [vmem:[%s6972_s8 + $0x60] sm:$0xff]  ;;  %v3707_v6 = vld [vmem:[%s6972_s8 + $0x58] sm:$0xff] }
 0x3cd   : > { %v4536_v16 = vpop.f32.mrf.mxu0 }
 0x3ce   : > { %3298 = vst [vmem:[%s6609_s21 + $0x68] sm:$0xff] %v3282_v12  ;;  %v3261_v20 = vadd.f32 %v3260_v13, %v3116_v32  ;;  %v4537_v21 = vadd.f32 %v4536_v16, %v4535_v9  ;;  %v3706_v9 = vld [vmem:[%s6972_s8 + $0x50] sm:$0xff]  ;;  %v3705_v12 = vld [vmem:[%s6972_s8 + $0x48] sm:$0xff]  ;;  %v3704_v32 = vld [vmem:[%s6972_s8 + $0x40] sm:$0xff] }
 0x3cf   : > { %v3703_v13 = vld [vmem:[%s6972_s8 + $0x38] sm:$0xff]  ;;  %v3702_v16 = vld [vmem:[%s6972_s8 + $0x30] sm:$0xff] }
 0x3d0   : > { %v3283_v24 = vmax.f32 %v3261_v20, 0.0  ;;  %v3121_v27 = vadd.f32 %v4537_v21, %v6572_v39  ;;  %v3701_v20 = vld [vmem:[%s6972_s8 + $0x28] sm:$0xff]  ;;  %v3700_v21 = vld [vmem:[%s6972_s8 + $0x20] sm:$0xff] }
 0x3d2   : > { %3299 = vst [vmem:[%s6609_s21 + $0x70] sm:$0xff] %v3283_v24  ;;  %v3266_v28 = vadd.f32 %v5007_v2, %v3121_v27  ;;  %v3710_v2 = vld [vmem:[%s6972_s8 + $0x70] sm:$0xff]  ;;  %v3699_v24 = vld [vmem:[%s6972_s8 + $0x18] sm:$0xff] }
 0x3d3   : > { %v3698_v27 = vld [vmem:[%s6972_s8 + $0x10] sm:$0xff] }
 0x3d4   : > { %v3284_v30 = vmax.f32 %v3266_v28, 0.0  ;;  %v3697_v28 = vld [vmem:[%s6972_s8 + $0x8] sm:$0xff] }
 0x3d6   : > { %3300 = vst [vmem:[%s6609_s21 + $0x78] sm:$0xff] %v3284_v30  ;;  %v3696_v30 = vld [vmem:[%s6972_s8] sm:$0xff] }
 0x3dd   : > { %v3324_v31 = vld [vmem:[%s6754_s25] sm:$0xff]  ;;  %v3343_v34 = vld [vmem:[%s6757_s30 + $0x8] sm:$0xff]  ;;  %v3344_v37 = vld [vmem:[%s6757_s30 + $0x10] sm:$0xff] }
 0x3de   : > { %v3342_v33 = vld [vmem:[%s6757_s30] sm:$0xff]  ;;  %3422 = vmatprep.mubr.f32.mxu1 %v3324_v31  ;;  %v3325_v36 = vld [vmem:[%s6754_s25 + $0x8] sm:$0xff]  ;;  %v3345_v17 = vld [vmem:[%s6757_s30 + $0x18] sm:$0xff] }
 0x3df   : > { %v3305_v39 = vld [vmem:[%s6760_s18] sm:$0xff]  ;;  %5040 = vmatprep.mubr.f32.mxu0 %v3342_v33  ;;  %v3306_v38 = vld [vmem:[%s6760_s18 + $0x8] sm:$0xff]  ;;  %v3326_v41 = vld [vmem:[%s6754_s25 + $0x10] sm:$0xff] }
 0x3e0   : > { %3423 = vmatmul.mubr.f32.vlgmr.msra.gmra.mxu1 %v3305_v39  ;;  %5041 = vmatmul.mubr.f32.vlgmr.msra.gmra.mxu0 %v3343_v34  ;;  %v3346_v42 = vld [vmem:[%s6757_s30 + $0x20] sm:$0xff]  ;;  %v3307_v43 = vld [vmem:[%s6760_s18 + $0x10] sm:$0xff]  ;;  %v3347_v47 = vld [vmem:[%s6757_s30 + $0x28] sm:$0xff] }
 0x3e1   : > { %3427 = vmatprep.mubr.f32.mxu1 %v3325_v36  ;;  %5043 = vmatprep.mubr.f32.mxu0 %v3344_v37  ;;  %v3327_v50 = vld [vmem:[%s6754_s25 + $0x18] sm:$0xff]  ;;  %v3348_v53 = vld [vmem:[%s6757_s30 + $0x30] sm:$0xff]  ;;  %v3328_v60 = vld [vmem:[%s6754_s25 + $0x20] sm:$0xff] }
 0x3e2   : > { %v3308_v54 = vld [vmem:[%s6760_s18 + $0x18] sm:$0xff]  ;;  %v3350_v0 = vld [vmem:[%s6757_s30 + $0x40] sm:$0xff]  ;;  %v3351_v3 = vld [vmem:[%s6757_s30 + $0x48] sm:$0xff]  ;;  %5065 = vmatpush3.msra.mxu0 %v3711_v63 }
 0x3e3   : > { %v3349_v57 = vld [vmem:[%s6757_s30 + $0x38] sm:$0xff]  ;;  %v3309_v1 = vld [vmem:[%s6760_s18 + $0x20] sm:$0xff]  ;;  %v3329_v7 = vld [vmem:[%s6754_s25 + $0x28] sm:$0xff]  ;;  %5066 = vmatprep.subr.mxu0 %v3710_v2 }
 0x3e4   : > { %3428 = vmatmul.mubr.f32.gmra.mxu1 %v3306_v38  ;;  %5044 = vmatmul.mubr.f32.gmra.mxu0 %v3345_v17  ;;  %v3352_v18 = vld [vmem:[%s6757_s30 + $0x50] sm:$0xff]  ;;  %v3310_v19 = vld [vmem:[%s6760_s18 + $0x28] sm:$0xff]  ;;  %v3353_v51 = vld [vmem:[%s6757_s30 + $0x58] sm:$0xff] }
 0x3e5   : > { %3432 = vmatprep.mubr.f32.mxu1 %v3326_v41  ;;  %5046 = vmatprep.mubr.f32.mxu0 %v3346_v42  ;;  %v3330_v15 = vld [vmem:[%s6754_s25 + $0x30] sm:$0xff]  ;;  %v3354_v61 = vld [vmem:[%s6757_s30 + $0x60] sm:$0xff]  ;;  %v3355_v25 = vld [vmem:[%s6757_s30 + $0x68] sm:$0xff] }
 0x3e6   : > { %v3311_v26 = vld [vmem:[%s6760_s18 + $0x30] sm:$0xff]  ;;  %v3331_v11 = vld [vmem:[%s6754_s25 + $0x38] sm:$0xff]  ;;  %v3332_v35 = vld [vmem:[%s6754_s25 + $0x40] sm:$0xff]  ;;  %5067 = vmatpush3.msra.mxu0 %v3710_v2 }
 0x3e7   : > { %v3356_v10 = vld [vmem:[%s6757_s30 + $0x70] sm:$0xff]  ;;  %v3312_v14 = vld [vmem:[%s6760_s18 + $0x38] sm:$0xff]  ;;  %v3313_v22 = vld [vmem:[%s6760_s18 + $0x40] sm:$0xff]  ;;  %5068 = vmatprep.subr.mxu0 %v3709_v5 }
 0x3e8   : > { %3433 = vmatmul.mubr.f32.gmra.mxu1 %v3307_v43  ;;  %5047 = vmatmul.mubr.f32.gmra.mxu0 %v3347_v47  ;;  %v3357_v40 = vld [vmem:[%s6757_s30 + $0x78] sm:$0xff]  ;;  %v3333_v46 = vld [vmem:[%s6754_s25 + $0x48] sm:$0xff]  ;;  %v3334_v44 = vld [vmem:[%s6754_s25 + $0x50] sm:$0xff] }
 0x3e9   : > { %3437 = vmatprep.mubr.f32.mxu1 %v3327_v50  ;;  %5049 = vmatprep.mubr.f32.mxu0 %v3348_v53  ;;  %v3314_v23 = vld [vmem:[%s6760_s18 + $0x48] sm:$0xff]  ;;  %v3315_v45 = vld [vmem:[%s6760_s18 + $0x50] sm:$0xff]  ;;  %v3335_v48 = vld [vmem:[%s6754_s25 + $0x58] sm:$0xff] }
 0x3ea   : > { %v3316_v8 = vld [vmem:[%s6760_s18 + $0x58] sm:$0xff]  ;;  %v3336_v49 = vld [vmem:[%s6754_s25 + $0x60] sm:$0xff]  ;;  %v3337_v55 = vld [vmem:[%s6754_s25 + $0x68] sm:$0xff]  ;;  %5069 = vmatpush3.msra.mxu0 %v3709_v5 }
 0x3eb   : > { %v3317_v52 = vld [vmem:[%s6760_s18 + $0x60] sm:$0xff]  ;;  %v3318_v58 = vld [vmem:[%s6760_s18 + $0x68] sm:$0xff]  ;;  %v3338_v56 = vld [vmem:[%s6754_s25 + $0x70] sm:$0xff]  ;;  %5070 = vmatprep.subr.mxu0 %v3708_v4 }
 0x3ec   : > { %3438 = vmatmul.mubr.f32.gmra.mxu1 %v3308_v54  ;;  %5050 = vmatmul.mubr.f32.gmra.mxu0 %v3349_v57  ;;  %v3319_v59 = vld [vmem:[%s6760_s18 + $0x70] sm:$0xff]  ;;  %v3339_v62 = vld [vmem:[%s6754_s25 + $0x78] sm:$0xff]  ;;  %v6859_v37 = vld [vmem:[%s6971_s7] ss:$0 sm:$0xff] }
 0x3ed   : > { %3442 = vmatprep.mubr.f32.mxu1 %v3328_v60  ;;  %5052 = vmatprep.mubr.f32.mxu0 %v3350_v0  ;;  %v3320_v29 = vld [vmem:[%s6760_s18 + $0x78] sm:$0xff] }
 0x3ee   : > { %5071 = vmatpush3.msra.mxu0 %v3708_v4 }
 0x3ef   : > { %5072 = vmatprep.subr.mxu0 %v3707_v6 }
 0x3f0   : > { %3443 = vmatmul.mubr.f32.gmra.mxu1 %v3309_v1  ;;  %5053 = vmatmul.mubr.f32.gmra.mxu0 %v3351_v3 }
 0x3f1   : > { %3447 = vmatprep.mubr.f32.mxu1 %v3329_v7  ;;  %5055 = vmatprep.mubr.f32.mxu0 %v3352_v18 }
 0x3f2   : > { %5073 = vmatpush3.msra.mxu0 %v3707_v6 }
 0x3f3   : > { %5074 = vmatprep.subr.mxu0 %v3706_v9 }
 0x3f4   : > { %3448 = vmatmul.mubr.f32.gmra.mxu1 %v3310_v19  ;;  %5056 = vmatmul.mubr.f32.gmra.mxu0 %v3353_v51 }
 0x3f5   : > { %3452 = vmatprep.mubr.f32.mxu1 %v3330_v15  ;;  %5058 = vmatprep.mubr.f32.mxu0 %v3354_v61 }
 0x3f6   : > { %5075 = vmatpush3.msra.mxu0 %v3706_v9 }
 0x3f7   : > { %5076 = vmatprep.subr.mxu0 %v3705_v12 }
 0x3f8   : > { %3453 = vmatmul.mubr.f32.gmra.mxu1 %v3311_v26  ;;  %5059 = vmatmul.mubr.f32.gmra.mxu0 %v3355_v25 }
 0x3f9   : > { %3457 = vmatprep.mubr.f32.mxu1 %v3331_v11  ;;  %5061 = vmatprep.mubr.f32.mxu0 %v3356_v10 }
 0x3fa   : > { %5077 = vmatpush3.msra.mxu0 %v3705_v12 }
 0x3fb   : > { %5078 = vmatprep.subr.mxu0 %v3704_v32 }
 0x3fc   : > { %3458 = vmatmul.mubr.f32.gmra.mxu1 %v3312_v14  ;;  %5062 = vmatmul.mubr.f32.gmra.mxu0 %v3357_v40 }
 0x3fd   : > { %3462 = vmatprep.mubr.f32.mxu1 %v3332_v35  ;;  %5079 = vmatpush3.msra.mxu0 %v3704_v32 }
 0x3fe   : > { %5080 = vmatprep.subr.mxu0 %v3703_v13 }
 0x3ff   : > { %5081 = vmatpush3.msra.mxu0 %v3703_v13 }
 0x400   : > { %3463 = vmatmul.mubr.f32.gmra.mxu1 %v3313_v22  ;;  %5082 = vmatprep.subr.mxu0 %v3702_v16 }
 0x401   : > { %3467 = vmatprep.mubr.f32.mxu1 %v3333_v46  ;;  %5083 = vmatpush3.msra.mxu0 %v3702_v16 }
 0x402   : > { %5084 = vmatprep.subr.mxu0 %v3701_v20 }
 0x403   : > { %5085 = vmatpush3.msra.mxu0 %v3701_v20 }
 0x404   : > { %3468 = vmatmul.mubr.f32.gmra.mxu1 %v3314_v23  ;;  %5086 = vmatprep.subr.mxu0 %v3700_v21 }
 0x405   : > { %3472 = vmatprep.mubr.f32.mxu1 %v3334_v44  ;;  %5087 = vmatpush3.msra.mxu0 %v3700_v21 }
 0x406   : > { %5088 = vmatprep.subr.mxu0 %v3699_v24 }
 0x407   : > { %5089 = vmatpush3.msra.mxu0 %v3699_v24 }
 0x408   : > { %3473 = vmatmul.mubr.f32.gmra.mxu1 %v3315_v45  ;;  %5090 = vmatprep.subr.mxu0 %v3698_v27 }
 0x409   : > { %3477 = vmatprep.mubr.f32.mxu1 %v3335_v48  ;;  %5091 = vmatpush3.msra.mxu0 %v3698_v27 }
 0x40a   : > { %5092 = vmatprep.subr.mxu0 %v3697_v28 }
 0x40b   : > { %5093 = vmatpush3.msra.mxu0 %v3697_v28 }
 0x40c   : > { %3478 = vmatmul.mubr.f32.gmra.mxu1 %v3316_v8  ;;  %5094 = vmatprep.subr.mxu0 %v3696_v30 }
 0x40d   : > { %3482 = vmatprep.mubr.f32.mxu1 %v3336_v49  ;;  %5095 = vmatpush3.msra.mxu0 %v3696_v30 }
 0x410   : > { %3483 = vmatmul.mubr.f32.gmra.mxu1 %v3317_v52 }
 0x411   : > { %3487 = vmatprep.mubr.f32.mxu1 %v3337_v55 }
 0x414   : > { %3488 = vmatmul.mubr.f32.gmra.mxu1 %v3318_v58 }
 0x415   : > { %3492 = vmatprep.mubr.f32.mxu1 %v3338_v56 }
 0x418   : > { %3493 = vmatmul.mubr.f32.gmra.mxu1 %v3319_v59 }
 0x419   : > { %3497 = vmatprep.mubr.f32.mxu1 %v3339_v62 }
 0x41c   : > { %3498 = vmatmul.mubr.f32.gmra.mxu1 %v3320_v29 }
 0x4a0   : > { %v4602_v31 = vpop.f32.mrf.mxu1  ;;  %v5042_v33 = vpop.f32.mrf.mxu0 }
 0x4a2   : > { %v4603_v39 = vpop.f32.mrf.mxu1  ;;  %v3569_v17 = vpop.f32.mrf.mxu0 }
 0x4a3   : > { %v4604_v34 = vadd.f32 %v4603_v39, %v4602_v31 }
 0x4a4   : > { %v4605_v36 = vpop.f32.mrf.mxu1  ;;  %v5045_v54 = vpop.f32.mrf.mxu0 }
 0x4a5   : > { %v3425_v38 = vadd.f32 %v6859_v37, %v4604_v34 }
 0x4a6   : > { %v4606_v41 = vpop.f32.mrf.mxu1  ;;  %v3579_v18 = vpop.f32.mrf.mxu0 }
 0x4a7   : > { %v3570_v42 = vadd.f32 %v3569_v17, %v3425_v38  ;;  %v4607_v43 = vadd.f32 %v4606_v41, %v4605_v36 }
 0x4a8   : > { %v4608_v47 = vpop.f32.mrf.mxu1  ;;  %v5048_v11 = vpop.f32.mrf.mxu0 }
 0x4a9   : > { %v3648_v50 = vmax.f32 %v3570_v42, 0.0  ;;  %v3430_v53 = vadd.f32 %v6859_v37, %v4607_v43 }
 0x4aa   : > { %v4609_v57 = vpop.f32.mrf.mxu1  ;;  %v3589_v23 = vpop.f32.mrf.mxu0 }
 0x4ab   : > { %3664 = vst [vmem:[%s6757_s30] sm:$0xff] %v3648_v50  ;;  %v3575_v60 = vadd.f32 %v5042_v33, %v3430_v53  ;;  %v4610_v0 = vadd.f32 %v4609_v57, %v4608_v47 }
 0x4ac   : > { %v4611_v1 = vpop.f32.mrf.mxu1  ;;  %v5051_v55 = vpop.f32.mrf.mxu0 }
 0x4ad   : > { %v3649_v3 = vmax.f32 %v3575_v60, 0.0  ;;  %v3435_v7 = vadd.f32 %v6859_v37, %v4610_v0 }
 0x4ae   : > { %v4612_v19 = vpop.f32.mrf.mxu1  ;;  %v3599_v2 = vpop.f32.mrf.mxu0 }
 0x4af   : > { %3665 = vst [vmem:[%s6757_s30 + $0x8] sm:$0xff] %v3649_v3  ;;  %v3580_v51 = vadd.f32 %v3579_v18, %v3435_v7  ;;  %v4613_v15 = vadd.f32 %v4612_v19, %v4611_v1 }
 0x4b0   : > { %v4614_v61 = vpop.f32.mrf.mxu1  ;;  %v5054_v13 = vpop.f32.mrf.mxu0 }
 0x4b1   : > { %v3650_v26 = vmax.f32 %v3580_v51, 0.0  ;;  %v3440_v25 = vadd.f32 %v6859_v37, %v4613_v15 }
 0x4b2   : > { %v4615_v10 = vpop.f32.mrf.mxu1  ;;  %v3609_v30 = vpop.f32.mrf.mxu0 }
 0x4b3   : > { %3666 = vst [vmem:[%s6757_s30 + $0x10] sm:$0xff] %v3650_v26  ;;  %v3585_v14 = vadd.f32 %v5045_v54, %v3440_v25  ;;  %v4616_v40 = vadd.f32 %v4615_v10, %v4614_v61 }
 0x4b4   : > { %v4617_v35 = vpop.f32.mrf.mxu1  ;;  %v5057_v17 = vpop.f32.mrf.mxu0 }
 0x4b5   : > { %v3651_v22 = vmax.f32 %v3585_v14, 0.0  ;;  %v3445_v46 = vadd.f32 %v6859_v37, %v4616_v40 }
 0x4b6   : > { %v4618_v44 = vpop.f32.mrf.mxu1  ;;  %v3619_v54 = vpop.f32.mrf.mxu0 }
 0x4b7   : > { %3667 = vst [vmem:[%s6757_s30 + $0x18] sm:$0xff] %v3651_v22  ;;  %v3590_v45 = vadd.f32 %v3589_v23, %v3445_v46  ;;  %v4619_v48 = vadd.f32 %v4618_v44, %v4617_v35 }
 0x4b8   : > { %v4620_v8 = vpop.f32.mrf.mxu1  ;;  %v5060_v18 = vpop.f32.mrf.mxu0 }
 0x4b9   : > { %v3652_v49 = vmax.f32 %v3590_v45, 0.0  ;;  %v3450_v52 = vadd.f32 %v6859_v37, %v4619_v48 }
 0x4ba   : > { %v4621_v58 = vpop.f32.mrf.mxu1 }
 0x4bb   : > { %3668 = vst [vmem:[%s6757_s30 + $0x20] sm:$0xff] %v3652_v49  ;;  %v3595_v56 = vadd.f32 %v5048_v11, %v3450_v52  ;;  %v4622_v59 = vadd.f32 %v4621_v58, %v4620_v8  ;;  %v3629_v11 = vpop.f32.mrf.mxu0 }
 0x4bc   : > { %v4623_v62 = vpop.f32.mrf.mxu1 }
 0x4bd   : > { %v3653_v29 = vmax.f32 %v3595_v56, 0.0  ;;  %v3455_v63 = vadd.f32 %v6859_v37, %v4622_v59  ;;  %v5063_v23 = vpop.f32.mrf.mxu0 }
 0x4be   : > { %v4624_v5 = vpop.f32.mrf.mxu1 }
 0x4bf   : > { %3669 = vst [vmem:[%s6757_s30 + $0x28] sm:$0xff] %v3653_v29  ;;  %v3600_v4 = vadd.f32 %v3599_v2, %v3455_v63  ;;  %v4625_v6 = vadd.f32 %v4624_v5, %v4623_v62 }
 0x4c0   : > { %v4626_v9 = vpop.f32.mrf.mxu1 }
 0x4c1   : > { %v3654_v12 = vmax.f32 %v3600_v4, 0.0  ;;  %v3460_v32 = vadd.f32 %v6859_v37, %v4625_v6 }
 0x4c2   : > { %v4627_v16 = vpop.f32.mrf.mxu1 }
 0x4c3   : > { %3670 = vst [vmem:[%s6757_s30 + $0x30] sm:$0xff] %v3654_v12  ;;  %v3605_v20 = vadd.f32 %v5051_v55, %v3460_v32  ;;  %v4628_v21 = vadd.f32 %v4627_v16, %v4626_v9  ;;  %v3639_v55 = vpop.f32.mrf.mxu0 }
 0x4c4   : > { %v4629_v24 = vpop.f32.mrf.mxu1 }
 0x4c5   : > { %v3655_v27 = vmax.f32 %v3605_v20, 0.0  ;;  %v3465_v28 = vadd.f32 %v6859_v37, %v4628_v21 }
 0x4c6   : > { %v4630_v31 = vpop.f32.mrf.mxu1 }
 0x4c7   : > { %3671 = vst [vmem:[%s6757_s30 + $0x38] sm:$0xff] %v3655_v27  ;;  %v3610_v33 = vadd.f32 %v3609_v30, %v3465_v28  ;;  %v4631_v39 = vadd.f32 %v4630_v31, %v4629_v24 }
 0x4c8   : > { %v4632_v34 = vpop.f32.mrf.mxu1 }
 0x4c9   : > { %v3656_v36 = vmax.f32 %v3610_v33, 0.0  ;;  %v3470_v38 = vadd.f32 %v6859_v37, %v4631_v39  ;;  %v4219_v33 = vld [vmem:[%s6973_s9] ss:$0 sm:$0xff] }
 0x4ca   : > { %v4633_v41 = vpop.f32.mrf.mxu1 }
 0x4cb   : > { %3672 = vst [vmem:[%s6757_s30 + $0x40] sm:$0xff] %v3656_v36  ;;  %v3615_v42 = vadd.f32 %v5054_v13, %v3470_v38  ;;  %v4634_v43 = vadd.f32 %v4633_v41, %v4632_v34 }
 0x4cc   : > { %v4635_v47 = vpop.f32.mrf.mxu1 }
 0x4cd   : > { %v3657_v50 = vmax.f32 %v3615_v42, 0.0  ;;  %v3475_v53 = vadd.f32 %v6859_v37, %v4634_v43 }
 0x4ce   : > { %v4636_v57 = vpop.f32.mrf.mxu1 }
 0x4cf   : > { %3673 = vst [vmem:[%s6757_s30 + $0x48] sm:$0xff] %v3657_v50  ;;  %v3620_v60 = vadd.f32 %v3619_v54, %v3475_v53  ;;  %v4637_v0 = vadd.f32 %v4636_v57, %v4635_v47 }
 0x4d0   : > { %v4638_v1 = vpop.f32.mrf.mxu1 }
 0x4d1   : > { %v3658_v3 = vmax.f32 %v3620_v60, 0.0  ;;  %v3480_v7 = vadd.f32 %v6859_v37, %v4637_v0 }
 0x4d2   : > { %v4639_v19 = vpop.f32.mrf.mxu1 }
 0x4d3   : > { %3674 = vst [vmem:[%s6757_s30 + $0x50] sm:$0xff] %v3658_v3  ;;  %v3625_v51 = vadd.f32 %v5057_v17, %v3480_v7  ;;  %v4640_v15 = vadd.f32 %v4639_v19, %v4638_v1 }
 0x4d4   : > { %v4641_v61 = vpop.f32.mrf.mxu1 }
 0x4d5   : > { %v3659_v26 = vmax.f32 %v3625_v51, 0.0  ;;  %v3485_v25 = vadd.f32 %v6859_v37, %v4640_v15 }
 0x4d6   : > { %v4642_v10 = vpop.f32.mrf.mxu1 }
 0x4d7   : > { %3675 = vst [vmem:[%s6757_s30 + $0x58] sm:$0xff] %v3659_v26  ;;  %v3630_v14 = vadd.f32 %v3629_v11, %v3485_v25  ;;  %v4643_v40 = vadd.f32 %v4642_v10, %v4641_v61 }
 0x4d8   : > { %v4644_v35 = vpop.f32.mrf.mxu1 }
 0x4d9   : > { %v3660_v22 = vmax.f32 %v3630_v14, 0.0  ;;  %v3490_v46 = vadd.f32 %v6859_v37, %v4643_v40 }
 0x4da   : > { %v4645_v44 = vpop.f32.mrf.mxu1 }
 0x4db   : > { %3676 = vst [vmem:[%s6757_s30 + $0x60] sm:$0xff] %v3660_v22  ;;  %v3635_v45 = vadd.f32 %v5060_v18, %v3490_v46  ;;  %v4646_v48 = vadd.f32 %v4645_v44, %v4644_v35 }
 0x4dc   : > { %v4647_v8 = vpop.f32.mrf.mxu1 }
 0x4dd   : > { %v3661_v49 = vmax.f32 %v3635_v45, 0.0  ;;  %v3495_v52 = vadd.f32 %v6859_v37, %v4646_v48 }
 0x4de   : > { %v4648_v58 = vpop.f32.mrf.mxu1 }
 0x4df   : > { %3677 = vst [vmem:[%s6757_s30 + $0x68] sm:$0xff] %v3661_v49  ;;  %v3640_v56 = vadd.f32 %v3639_v55, %v3495_v52  ;;  %v4649_v59 = vadd.f32 %v4648_v58, %v4647_v8 }
 0x4e1   : > { %v3662_v62 = vmax.f32 %v3640_v56, 0.0  ;;  %v3500_v29 = vadd.f32 %v6859_v37, %v4649_v59 }
 0x4e3   : > { %3678 = vst [vmem:[%s6757_s30 + $0x70] sm:$0xff] %v3662_v62  ;;  %v3645_v63 = vadd.f32 %v5063_v23, %v3500_v29 }
 0x4e5   : > { %v3663_v2 = vmax.f32 %v3645_v63, 0.0 }
 0x4e7   : > { %3679 = vst [vmem:[%s6757_s30 + $0x78] sm:$0xff] %v3663_v2  ;;  %s3986_s30 = sshll.u32 %s5677_s24, 7 }
 0x4e8   : > { %s6897_s19 = scalar_lea.vmem [#allocation8], %s3986_s30 }
 0x4e9   : > { %s3894_s21 = sshll.u32 %s6897_s19, 4  ;;  %s6921_s21 = int_to_ptr.vmem [resolvable:$true] %s3894_s21 }
 0x4ea   : > { %s5253_s29 = scalar_lea.vmem %s6921_s21, 2048  ;;  %p5260_p3 = scmp.lt.s32.totalorder %s6921_s21, %s5258_s12 }
 0x4eb   : > { %p5254_p0 = scmp.ne.s32.totalorder %s6921_s21, %s5253_s29  ;;  %p5261_p4 = scmp.lt.s32.totalorder %s5259_s17, %s5253_s29 }
 0x4ed   : > { %p5255_p1 = pnand %p5254_p0, %p5425_p7  ;;  %p5262_p5 = por %p5261_p4, %p5260_p3 }
 0x4ee   : > { %v3680_v5 = vld [vmem:[#allocation2 + $0x300] sm:$0xff]  ;;  %v3681_v4 = vld [vmem:[#allocation2 + $0x308] sm:$0xff]  ;;  %v3682_v6 = vld [vmem:[#allocation2 + $0x310] sm:$0xff] }
 0x4ef   : > { %5096 = vmatprep.mubr.f32.mxu0 %v3680_v5  ;;  %v3683_v9 = vld [vmem:[#allocation2 + $0x318] sm:$0xff]  ;;  %v3684_v12 = vld [vmem:[#allocation2 + $0x320] sm:$0xff]  ;;  %v3685_v32 = vld [vmem:[#allocation2 + $0x328] sm:$0xff]  ;;  %p5256_p2 = pneg %p5255_p1 }
 0x4f0   : > { %5097 = vmatmul.mubr.f32.vlgmr.msra.gmra.mxu0 %v3681_v4  ;;  %v3686_v13 = vld [vmem:[#allocation2 + $0x330] sm:$0xff]  ;;  %v3687_v16 = vld [vmem:[#allocation2 + $0x338] sm:$0xff]  ;;  %v3688_v37 = vld [vmem:[#allocation2 + $0x340] sm:$0xff] }
 0x4f1   : > { %5099 = vmatprep.mubr.f32.mxu0 %v3682_v6  ;;  %v3689_v20 = vld [vmem:[#allocation2 + $0x348] sm:$0xff]  ;;  %v3690_v21 = vld [vmem:[#allocation2 + $0x350] sm:$0xff]  ;;  %v3691_v24 = vld [vmem:[#allocation2 + $0x358] sm:$0xff]  ;;  %p5263_p6 = pnand %p5262_p5, %p5256_p2 }
 0x4f2   : > { %v3692_v27 = vld [vmem:[#allocation2 + $0x360] sm:$0xff]  ;;  %v3693_v28 = vld [vmem:[#allocation2 + $0x368] sm:$0xff]  ;;  %v3694_v30 = vld [vmem:[#allocation2 + $0x370] sm:$0xff] }
 0x4f3   : > { %v3695_v31 = vld [vmem:[#allocation2 + $0x378] sm:$0xff] }
 0x4f4   : > { %5100 = vmatmul.mubr.f32.gmra.mxu0 %v3683_v9 }
 0x4f5   : > { %5102 = vmatprep.mubr.f32.mxu0 %v3684_v12 }
 0x4f8   : > { %5103 = vmatmul.mubr.f32.gmra.mxu0 %v3685_v32 }
 0x4f9   : > { %5105 = vmatprep.mubr.f32.mxu0 %v3686_v13 }
 0x4fc   : > { %5106 = vmatmul.mubr.f32.gmra.mxu0 %v3687_v16 }
 0x4fd   : > { %5108 = vmatprep.mubr.f32.mxu0 %v3688_v37 }
 0x500   : > { %5109 = vmatmul.mubr.f32.gmra.mxu0 %v3689_v20 }
 0x501   : > { %5111 = vmatprep.mubr.f32.mxu0 %v3690_v21 }
 0x504   : > { %5112 = vmatmul.mubr.f32.gmra.mxu0 %v3691_v24 }
 0x505   : > { %5114 = vmatprep.mubr.f32.mxu0 %v3692_v27 }
 0x508   : > { %5115 = vmatmul.mubr.f32.gmra.mxu0 %v3693_v28 }
 0x509   : > { %5117 = vmatprep.mubr.f32.mxu0 %v3694_v30 }
 0x50c   : > { %5118 = vmatmul.mubr.f32.gmra.mxu0 %v3695_v31 }
 0x5b0   : > { %v5098_v39 = vpop.f32.mrf.mxu0 }
 0x5b1   : > { %v3791_v34 = vadd.f32 %v5098_v39, %v4219_v33 }
 0x5b2   : > { %v3785_v36 = vpop.f32.mrf.mxu0 }
 0x5b3   : > { %3865 = vst [vmem:[%s6897_s19 + $0x8] sm:$0xff] %v3791_v34  ;;  %v3786_v38 = vadd.f32 %v4219_v33, %v3785_v36 }
 0x5b4   : > { %v5101_v17 = vpop.f32.mrf.mxu0 }
 0x5b5   : > { %3864 = vst [vmem:[%s6897_s19] sm:$0xff] %v3786_v38  ;;  %v3801_v41 = vadd.f32 %v5101_v17, %v4219_v33 }
 0x5b6   : > { %v3795_v42 = vpop.f32.mrf.mxu0 }
 0x5b7   : > { %3867 = vst [vmem:[%s6897_s19 + $0x18] sm:$0xff] %v3801_v41  ;;  %v3796_v43 = vadd.f32 %v4219_v33, %v3795_v42 }
 0x5b8   : > { %v5104_v47 = vpop.f32.mrf.mxu0 }
 0x5b9   : > { %3866 = vst [vmem:[%s6897_s19 + $0x10] sm:$0xff] %v3796_v43  ;;  %v3811_v50 = vadd.f32 %v5104_v47, %v4219_v33 }
 0x5ba   : > { %v3805_v53 = vpop.f32.mrf.mxu0 }
 0x5bb   : > { %3869 = vst [vmem:[%s6897_s19 + $0x28] sm:$0xff] %v3811_v50  ;;  %v3806_v54 = vadd.f32 %v4219_v33, %v3805_v53 }
 0x5bc   : > { %v5107_v57 = vpop.f32.mrf.mxu0 }
 0x5bd   : > { %3868 = vst [vmem:[%s6897_s19 + $0x20] sm:$0xff] %v3806_v54  ;;  %v3821_v60 = vadd.f32 %v5107_v57, %v4219_v33 }
 0x5be   : > { %v3815_v0 = vpop.f32.mrf.mxu0 }
 0x5bf   : > { %3871 = vst [vmem:[%s6897_s19 + $0x38] sm:$0xff] %v3821_v60  ;;  %v3816_v1 = vadd.f32 %v4219_v33, %v3815_v0 }
 0x5c0   : > { %v5110_v3 = vpop.f32.mrf.mxu0 }
 0x5c1   : > { %3870 = vst [vmem:[%s6897_s19 + $0x30] sm:$0xff] %v3816_v1  ;;  %v3831_v7 = vadd.f32 %v5110_v3, %v4219_v33 }
 0x5c2   : > { %v3825_v18 = vpop.f32.mrf.mxu0 }
 0x5c3   : > { %3873 = vst [vmem:[%s6897_s19 + $0x48] sm:$0xff] %v3831_v7  ;;  %v3826_v19 = vadd.f32 %v4219_v33, %v3825_v18 }
 0x5c4   : > { %v5113_v51 = vpop.f32.mrf.mxu0 }
 0x5c5   : > { %3872 = vst [vmem:[%s6897_s19 + $0x40] sm:$0xff] %v3826_v19  ;;  %v3841_v15 = vadd.f32 %v5113_v51, %v4219_v33 }
 0x5c6   : > { %v3835_v61 = vpop.f32.mrf.mxu0 }
 0x5c7   : > { %3875 = vst [vmem:[%s6897_s19 + $0x58] sm:$0xff] %v3841_v15  ;;  %v3836_v26 = vadd.f32 %v4219_v33, %v3835_v61 }
 0x5c8   : > { %v5116_v25 = vpop.f32.mrf.mxu0 }
 0x5c9   : > { %3874 = vst [vmem:[%s6897_s19 + $0x50] sm:$0xff] %v3836_v26  ;;  %v3851_v11 = vadd.f32 %v5116_v25, %v4219_v33 }
 0x5ca   : > { %v3845_v10 = vpop.f32.mrf.mxu0 }
 0x5cb   : > { %3877 = vst [vmem:[%s6897_s19 + $0x68] sm:$0xff] %v3851_v11  ;;  %v3846_v14 = vadd.f32 %v4219_v33, %v3845_v10 }
 0x5cc   : > { %v5119_v40 = vpop.f32.mrf.mxu0 }
 0x5cd   : > { %3876 = vst [vmem:[%s6897_s19 + $0x60] sm:$0xff] %v3846_v14  ;;  %v3861_v35 = vadd.f32 %v5119_v40, %v4219_v33 }
 0x5ce   : > { %v3855_v22 = vpop.f32.mrf.mxu0 }
 0x5cf   : > { %3879 = vst [vmem:[%s6897_s19 + $0x78] sm:$0xff] %v3861_v35  ;;  %v3856_v46 = vadd.f32 %v4219_v33, %v3855_v22 }
 0x5d1   : > { %3878 = vst [vmem:[%s6897_s19 + $0x70] sm:$0xff] %v3856_v46 }
 0x5d2   : > { %5266 = shalt.err (!%p5263_p6)
}
 0x5d3   : > { %s5267_s30 = scalar_lea.hbm %s6919_s1, 2048  ;;  %s5271_s19 = scalar_lea.hbm %s6974_s10, 4096 }
 0x5d4   : > { %p5268_p8 = scmp.ne.s32.totalorder %s6919_s1, %s5267_s30  ;;  %p5272_p13 = scmp.lt.s32.totalorder %s6919_s1, %s6974_s10 }
 0x5d5   : > { %p5273_p0 = scmp.lt.s32.totalorder %s5271_s19, %s5267_s30 }
 0x5d6   : > { %p5269_p11 = pnand %p5268_p8, %p5425_p7 }
 0x5d7   : > { %p5274_p1 = por %p5273_p0, %p5272_p13 }
 0x5d8   : > { %p5270_p12 = pneg %p5269_p11 }
 0x5da   : > { %p5275_p2 = pnand %p5274_p1, %p5270_p12 }
 0x5dc   : > { %5278 = shalt.err (!%p5275_p2)
}
 0x5dd   : > { %s5321_s13 = smov 128   ;;  %s5322_s29 = smov 8  }
 0x5de   : > { %5124 = dma.vmem_to_hbm [thread:$0]  (%p5425_p7), %s6921_s21, 2048, %s6919_s1, %s3881_s22, %s5321_s13, %s5321_s13, %s5322_s29  }
 0x5df PF: > { %s3909_s23 = sand.u32 1, %s5303_s26   ;;  %p5127_p3 = pnand %p3982_p10, %p5429_p9 }
 0x5e0   : > { %s3910_s12 = scalar_lea.sflag [#allocation9], %s3909_s23 }
 0x5e1   : > { %p5128_p4 = pneg %p5127_p3 }
 0x5e3   : > { %5298 = dma.done.wait (%p5128_p4), %s3910_s12, 2048  }
 0x5e4   : > { %5300 = vsyncadd (%p5128_p4), %s3910_s12, 4294965248  ;;  %p34_p5 = scmp.ge.s32.totalorder %s5410_s11, 4   ;;  %s6993_s26 = smov %s5307_s27 }
 0x5e5   : > { %s6994_s27 = smov %s5311_s2  ;;  %s6995_s2 = smov %s5423_s14 }
 0x5e6   : > { %s6996_s28 = smov %s5410_s11  ;;  %36 = sbr.rel (!%p34_p5) target bundleno = 38 (0x26), region = 147 }
 0x5eb   :  { %3915 = vsyncpa [#allocation9], 1 }
 0x5ec   :  { %3917 = vsyncpa [#allocation9 + $0x1], 1 }

</bundles_post_ra>
